<compile_context>
chip_gen: v6e
topology: v6e:2x2x1
jax: 0.10.0
libtpu: 0.0.40
codegen_flags: <defaults>
</compile_context>

<pallas_src>
import functools

import jax
import jax.numpy as jnp
import numpy as np
from jax import lax
from jax.experimental import pallas as pl
from jax.experimental.pallas import tpu as pltpu

MATMUL_DTYPE = jnp.bfloat16   # input projections + final Linear (MXU operands)
GATES_DTYPE = jnp.bfloat16    # chunk gate buffer storage
LANE = 128
SUBLANE = 8
TC_MAX = 32                   # max time-chunk (bounds code size of the static
                              # layer-0 projection loop and scratch VMEM)


def _round_up(x, m):
    return (x + m - 1) // m * m


# ----------------------------------------------------------------------------
# Fused Pallas kernel
# ----------------------------------------------------------------------------
def _fused_lstm_kernel(*refs, num_layers, seq_chunk, batch_blk, hs, hg,
                       num_chunks):
    """One grid step = one (batch_block, time_chunk) tile.

    Ref layout (in order):
      x_ref                       (B, TC, D)     f32, batch-first chunk
      per layer l in [0, L):
        w_ih_t[l]                 (D_l, 4*HG)    bf16 (transposed, gate-padded)
        w_hh_t[l]                 (HS,  4*HG)    f32  (kept f32 for accuracy)
        bias[l]                   (1,   4*HG)    f32  (b_ih + b_hh)
      lin_w_t                     (HS, Op)       bf16
      lin_b                       (1, Op)        f32
      out_ref                     (B, Op)        f32
      gates_sc  scratch           (TC, B, 4*HG)  bf16  per-chunk gate buffer
      hseq_sc   scratch           (TC, B, HS)    f32   layer l -> l+1 hiddens
      h_state   scratch           (L, B, HS)     f32   carried across chunks
      c_state   scratch           (L, B, HS)     f32   carried across chunks

    HS = round_up(H, 8)   : true state / contraction width (small-H friendly)
    HG = round_up(H, 128) : per-gate slab width (lane-aligned slab slicing)
    """
    TC, B, HS, HG = seq_chunk, batch_blk, hs, hg
    Gp = 4 * HG

    x_ref = refs[0]
    layer_refs = refs[1:1 + 3 * num_layers]
    lin_w_ref = refs[1 + 3 * num_layers]
    lin_b_ref = refs[2 + 3 * num_layers]
    out_ref = refs[3 + 3 * num_layers]
    gates_sc, hseq_sc, h_state, c_state = refs[4 + 3 * num_layers:]

    chunk = pl.program_id(1)

    # ---- first chunk of this batch block: reset carried (h, c) state -------
    @pl.when(chunk == 0)
    def _():
        h_state[...] = jnp.zeros_like(h_state)
        c_state[...] = jnp.zeros_like(c_state)

    # ---- hoisted input projections (outside the serial recurrence) ---------
    def project_layer0():
        w_ih = layer_refs[0][...]                       # (D, Gp) bf16
        bias = layer_refs[2][...]                       # (1, Gp) f32
        # Direct from the batch-first x block: no relayout scratch, no copy
        # phase.  With small input_dim each matmul is one tiny RHS push.
        # TODO(synk): for large input_dim, hoist these TC matmuls into a
        #             single (TC*B, D) @ (D, Gp) matmul (time-major gather).
        for t in range(TC):                             # static, unrolled
            xt = x_ref[:, t, :].astype(MATMUL_DTYPE)    # (B, D)
            xg = jnp.dot(xt, w_ih, preferred_element_type=jnp.float32) + bias
            gates_sc[t] = xg.astype(gates_sc.dtype)

    def project_layer(layer):
        w_ih = layer_refs[3 * layer][...]               # (HS, Gp) bf16
        bias = layer_refs[3 * layer + 2][...]           # (1, Gp)  f32
        hin = hseq_sc[...].reshape(TC * B, HS).astype(MATMUL_DTYPE)
        xg = jnp.dot(hin, w_ih, preferred_element_type=jnp.float32) + bias
        gates_sc[...] = xg.reshape(TC, B, Gp).astype(gates_sc.dtype)

    # ---- serial recurrence: only the (B,HS)@(HS,4HG) hidden matmul and the
    #      gate/state elementwise math stay inside the time loop -------------
    def run_recurrence(layer, write_seq):
        w_hh = layer_refs[3 * layer + 1][...]           # (HS, Gp) f32

        def step(t, carry):
            h, c = carry                                # (B, HS) f32
            g = gates_sc[t].astype(jnp.float32) + jnp.dot(
                h, w_hh, preferred_element_type=jnp.float32)
            # Gate order [i | f | g | o]; slabs start at lane-aligned offsets
            # (multiples of HG); only the first HS lanes of each slab are live.
            i_g = jax.nn.sigmoid(g[:, 0 * HG:0 * HG + HS])
            f_g = jax.nn.sigmoid(g[:, 1 * HG:1 * HG + HS])
            g_g = jnp.tanh(g[:, 2 * HG:2 * HG + HS])
            o_g = jax.nn.sigmoid(g[:, 3 * HG:3 * HG + HS])
            c_new = f_g * c + i_g * g_g
            h_new = o_g * jnp.tanh(c_new)
            if write_seq:
                hseq_sc[t] = h_new
            return h_new, c_new

        carry0 = (h_state[layer], c_state[layer])
        unroll = TC if TC <= 8 else 4
        h_last, c_last = lax.fori_loop(0, TC, step, carry0, unroll=unroll)
        h_state[layer] = h_last
        c_state[layer] = c_last
        return h_last

    project_layer0()
    h_last = run_recurrence(0, write_seq=num_layers > 1)
    # gates_sc is fully consumed by layer l's recurrence before layer l+1's
    # projection overwrites it; hseq_sc is fully consumed by the projection
    # before layer l+1's recurrence overwrites it.
    for layer in range(1, num_layers):
        project_layer(layer)
        h_last = run_recurrence(layer, write_seq=layer < num_layers - 1)

    # ---- last chunk: Linear head on the final timestep of the last layer ---
    @pl.when(chunk == num_chunks - 1)
    def _():
        out_ref[...] = (
            jnp.dot(h_last.astype(MATMUL_DTYPE), lin_w_ref[...],
                    preferred_element_type=jnp.float32) + lin_b_ref[...])


# ----------------------------------------------------------------------------
# Wrapper: VMEM budgeting, chunk selection, specs
# ----------------------------------------------------------------------------
def _vmem_budget_bytes():
    """Generation-aware VMEM budget (cap ~48 MiB on v7x's 64 MiB, up to
    ~100 MiB on v5e/v6e's 128 MiB), with a safe fallback."""
    cap = 128 * 1024 * 1024
    try:
        info = pltpu.get_tpu_info()
        cap = int(getattr(info, "vmem_capacity_bytes", cap))
    except Exception:
        pass
    return max(32 << 20, min(100 << 20, cap - (16 << 20)))


def _pick_time_chunk(T, per_step_bytes, fixed_bytes, budget_bytes):
    """Largest time-chunk TC with TC | T, (TC % 8 == 0 or TC == T),
    TC <= TC_MAX, and a VMEM footprint within budget."""
    cands = [d for d in range(1, T + 1)
             if T % d == 0 and (d % SUBLANE == 0 or d == T)]
    small = [d for d in cands if d <= TC_MAX] or [min(cands)]
    for tc in sorted(small, reverse=True):
        if fixed_bytes + tc * per_step_bytes <= budget_bytes:
            return tc
    return min(small)


def lstm_model_forward(x, packed):
    """x: (B, T, input_dim) batch-first (PyTorch layout). Returns (B, output_dim)."""
    B, T, D = x.shape
    HS, HG, Op = packed["hs"], packed["hg"], packed["op"]
    L = len(packed["layers"])
    Gp = 4 * HG

    # Split the batch into two blocks (-> both v7x TensorCores via the
    # "parallel" grid axis) when there are at least two full sublane tiles.
    if _round_up(B, SUBLANE) >= 2 * SUBLANE:
        nb, b_pad = 2, _round_up(B, 2 * SUBLANE)
    else:
        nb, b_pad = 1, _round_up(B, SUBLANE)
    b_blk = b_pad // nb

    # --- VMEM footprint -> chunk size + vmem_limit ---------------------------
    weight_bytes = 0
    for (w_ih_t, w_hh_t, bias) in packed["layers"]:
        weight_bytes += int(w_ih_t.size) * w_ih_t.dtype.itemsize
        weight_bytes += int(w_hh_t.size) * w_hh_t.dtype.itemsize
        weight_bytes += int(bias.size) * bias.dtype.itemsize
    weight_bytes += int(packed["lin_w_t"].size) * packed["lin_w_t"].dtype.itemsize
    weight_bytes += int(packed["lin_b"].size) * packed["lin_b"].dtype.itemsize

    fixed_bytes = (weight_bytes
                   + 2 * L * b_blk * HS * 4          # carried h/c state
                   + 2 * b_blk * Op * 4)             # output block
    per_step_bytes = (2 * b_blk * D * 4              # x chunk (double-buffered)
                      + b_blk * Gp * np.dtype(GATES_DTYPE).itemsize
                      + b_blk * HS * 4)              # hidden sequence
    budget = _vmem_budget_bytes()
    tc = _pick_time_chunk(T, per_step_bytes, fixed_bytes, budget - (4 << 20))
    nc = T // tc
    vmem_limit = int(min(budget, max(32 << 20,
                                     fixed_bytes + tc * per_step_bytes + (8 << 20))))

    x_p = x.astype(jnp.float32)
    if b_pad != B:
        x_p = jnp.pad(x_p, ((0, b_pad - B), (0, 0), (0, 0)))

    args = [x_p]
    for triple in packed["layers"]:
        args.extend(triple)
    args += [packed["lin_w_t"], packed["lin_b"]]

    in_specs = [pl.BlockSpec((b_blk, tc, D), lambda i, j: (i, j, 0))]
    # Weights: whole-array blocks with constant index maps -> fetched once and
    # kept resident across the whole grid.
    in_specs += [pl.BlockSpec(a.shape, lambda i, j: (0, 0)) for a in args[1:]]
    out_specs = pl.BlockSpec((b_blk, Op), lambda i, j: (i, 0))

    kernel = functools.partial(
        _fused_lstm_kernel, num_layers=L, seq_chunk=tc, batch_blk=b_blk,
        hs=HS, hg=HG, num_chunks=nc)

    out = pl.pallas_call(
        kernel,
        out_shape=jax.ShapeDtypeStruct((b_pad, Op), jnp.float32),
        grid_spec=pltpu.PrefetchScalarGridSpec(
            num_scalar_prefetch=0,
            grid=(nb, nc),
            in_specs=in_specs,
            out_specs=out_specs,
            scratch_shapes=[
                pltpu.VMEM((tc, b_blk, Gp), GATES_DTYPE),   # gates_sc
                pltpu.VMEM((tc, b_blk, HS), jnp.float32),   # hseq_sc
                pltpu.VMEM((L, b_blk, HS), jnp.float32),    # h_state
                pltpu.VMEM((L, b_blk, HS), jnp.float32),    # c_state
            ]),
        compiler_params=pltpu.CompilerParams(
            dimension_semantics=("parallel", "arbitrary"),
            vmem_limit_bytes=vmem_limit),
    )(*args)

    return out[:B, :packed["output_dim"]]


# ----------------------------------------------------------------------------
# Parameters: PyTorch-shaped init + padded/transposed kernel packing
# ----------------------------------------------------------------------------
def init_params(key, input_dim, hidden_dim, num_layers, output_dim):
    """PyTorch-convention parameters (gate order [i|f|g|o])."""
    params = {"lstm": [], "hidden_dim": hidden_dim, "output_dim": output_dim}
    scale = 1.0 / float(hidden_dim) ** 0.5
    for layer in range(num_layers):
        d_in = input_dim if layer == 0 else hidden_dim
        key, k1, k2, k3, k4 = jax.random.split(key, 5)
        params["lstm"].append({
            "weight_ih": jax.random.uniform(k1, (4 * hidden_dim, d_in), jnp.float32, -scale, scale),
            "weight_hh": jax.random.uniform(k2, (4 * hidden_dim, hidden_dim), jnp.float32, -scale, scale),
            "bias_ih": jax.random.uniform(k3, (4 * hidden_dim,), jnp.float32, -scale, scale),
            "bias_hh": jax.random.uniform(k4, (4 * hidden_dim,), jnp.float32, -scale, scale),
        })
    key, k5, k6 = jax.random.split(key, 3)
    params["linear_w"] = jax.random.uniform(k5, (output_dim, hidden_dim), jnp.float32, -scale, scale)
    params["linear_b"] = jax.random.uniform(k6, (output_dim,), jnp.float32, -scale, scale)
    return params


def _pad_gate_matrix(w, H, HG, d_in, d_pad):
    """(4H, d_in) PyTorch weight -> (d_pad, 4*HG), transposed; each gate block
    zero-padded H -> HG on its output axis and d_in -> d_pad on its input axis
    so gate slabs start at lane-aligned offsets."""
    w4 = w.reshape(4, H, d_in)
    w4 = jnp.pad(w4, ((0, 0), (0, HG - H), (0, d_pad - d_in)))
    return w4.reshape(4 * HG, d_pad).T


def pack_params(params, input_dim):
    """Zero-padding preserves exact semantics: padded hidden units see zero
    weights/bias, and with zero initial state their cell/hidden state stays
    exactly zero through every step."""
    H = params["hidden_dim"]
    O = params["output_dim"]
    HS = _round_up(H, SUBLANE)   # state / contraction width
    HG = _round_up(H, LANE)      # per-gate slab width (lane-aligned slicing)
    Op = _round_up(O, LANE)

    layers = []
    for layer, p in enumerate(params["lstm"]):
        d_in = input_dim if layer == 0 else H
        d_pad = input_dim if layer == 0 else HS
        w_ih_t = _pad_gate_matrix(p["weight_ih"], H, HG, d_in, d_pad).astype(MATMUL_DTYPE)
        # Recurrent weights stay float32: bf16 here would compound rounding
        # error across every timestep of every layer (correctness feedback).
        w_hh_t = _pad_gate_matrix(p["weight_hh"], H, HG, H, HS).astype(jnp.float32)
        bias = jnp.pad((p["bias_ih"] + p["bias_hh"]).reshape(4, H),
                       ((0, 0), (0, HG - H))).reshape(1, 4 * HG).astype(jnp.float32)
        layers.append((w_ih_t, w_hh_t, bias))

    lin_w_t = jnp.pad(params["linear_w"], ((0, Op - O), (0, HS - H))).T.astype(MATMUL_DTYPE)
    lin_b = jnp.pad(params["linear_b"], (0, Op - O)).reshape(1, Op).astype(jnp.float32)

    return {"layers": layers, "lin_w_t": lin_w_t, "lin_b": lin_b,
            "hs": HS, "hg": HG, "op": Op, "output_dim": O}


# ----------------------------------------------------------------------------
# Pure-JAX reference (float32) for a correctness sanity check
# ----------------------------------------------------------------------------
def _reference_forward(x, params):
    H = params["hidden_dim"]
    B = x.shape[0]
    h_seq = x.astype(jnp.float32)
    for p in params["lstm"]:
        h = jnp.zeros((B, H), jnp.float32)
        c = jnp.zeros((B, H), jnp.float32)
        outs = []
        for t in range(h_seq.shape[1]):
            g = (h_seq[:, t, :] @ p["weight_ih"].T + p["bias_ih"]
                 + h @ p["weight_hh"].T + p["bias_hh"])
            i_g = jax.nn.sigmoid(g[:, 0 * H:1 * H])
            f_g = jax.nn.sigmoid(g[:, 1 * H:2 * H])
            g_g = jnp.tanh(g[:, 2 * H:3 * H])
            o_g = jax.nn.sigmoid(g[:, 3 * H:4 * H])
            c = f_g * c + i_g * g_g
            h = o_g * jnp.tanh(c)
            outs.append(h)
        h_seq = jnp.stack(outs, axis=1)
    return h_seq[:, -1, :] @ params["linear_w"].T + params["linear_b"]


if __name__ == "__main__":
    # Small shapes consistent with the module's forward.
    batch, seq_len = 2, 8
    input_dim, hidden_dim, num_layers, output_dim = 4, 32, 2, 1

    key = jax.random.PRNGKey(0)
    key, xk = jax.random.split(key)
    x = jax.random.normal(xk, (batch, seq_len, input_dim), jnp.float32)

    params = init_params(key, input_dim, hidden_dim, num_layers, output_dim)
    packed = pack_params(params, input_dim)

    out = lstm_model_forward(x, packed)
    jax.block_until_ready(out)
    assert out.shape == (batch, output_dim)

    # Loose tolerance: bf16 input projections / gate storage (recurrent matmul
    # is f32); the module's float64 h0/c0 cast is not reproduced on TPU.
    ref = _reference_forward(x, params)
    max_err = float(jnp.max(jnp.abs(out - ref)))
    assert max_err < 5e-2, f"max abs error {max_err}"
    print("KERNEL_OK")
</pallas_src>

<mosaic_0001>
module attributes {stable_mosaic.version = 11 : i64} {
  func.func @_fused_lstm_kernel(%arg0: i32, %arg1: i32, %arg2: memref<8x8x4xf32, #tpu.memory_space<vmem>>, %arg3: memref<4x512xbf16, #tpu.memory_space<vmem>>, %arg4: memref<32x512xf32, #tpu.memory_space<vmem>>, %arg5: memref<1x512xf32, #tpu.memory_space<vmem>>, %arg6: memref<32x512xbf16, #tpu.memory_space<vmem>>, %arg7: memref<32x512xf32, #tpu.memory_space<vmem>>, %arg8: memref<1x512xf32, #tpu.memory_space<vmem>>, %arg9: memref<32x128xbf16, #tpu.memory_space<vmem>>, %arg10: memref<1x128xf32, #tpu.memory_space<vmem>>, %arg11: memref<8x128xf32, #tpu.memory_space<vmem>>, %arg12: memref<8x8x512xbf16, #tpu.memory_space<vmem>>, %arg13: memref<8x8x32xf32, #tpu.memory_space<vmem>>, %arg14: memref<2x8x32xf32, #tpu.memory_space<vmem>>, %arg15: memref<2x8x32xf32, #tpu.memory_space<vmem>>) attributes {dimension_semantics = [#tpu.dimension_semantics<parallel>, #tpu.dimension_semantics<arbitrary>], iteration_bounds = array<i64: 1, 1>, scalar_prefetch = 0 : i64, scratch_operands = 4 : i64, tpu.core_type = #tpu.core_type<tc>, window_params = [{transform_indices = @transform_0, window_bounds = array<i64: 8, 8, 4>}, {pipeline_mode = #tpu.pipeline_mode<synchronous>, transform_indices = @transform_1, window_bounds = array<i64: 4, 512>}, {pipeline_mode = #tpu.pipeline_mode<synchronous>, transform_indices = @transform_2, window_bounds = array<i64: 32, 512>}, {pipeline_mode = #tpu.pipeline_mode<synchronous>, transform_indices = @transform_3, window_bounds = array<i64: 1, 512>}, {pipeline_mode = #tpu.pipeline_mode<synchronous>, transform_indices = @transform_4, window_bounds = array<i64: 32, 512>}, {pipeline_mode = #tpu.pipeline_mode<synchronous>, transform_indices = @transform_5, window_bounds = array<i64: 32, 512>}, {pipeline_mode = #tpu.pipeline_mode<synchronous>, transform_indices = @transform_6, window_bounds = array<i64: 1, 512>}, {pipeline_mode = #tpu.pipeline_mode<synchronous>, transform_indices = @transform_7, window_bounds = array<i64: 32, 128>}, {pipeline_mode = #tpu.pipeline_mode<synchronous>, transform_indices = @transform_8, window_bounds = array<i64: 1, 128>}, {transform_indices = @transform_9, window_bounds = array<i64: 8, 128>}]} {
    %c0_i32 = arith.constant 0 : i32
    %0 = arith.cmpi eq, %arg1, %c0_i32 : i32
    %1 = arith.extui %0 : i1 to i32
    %c0_i32_0 = arith.constant 0 : i32
    %2 = arith.cmpi ne, %1, %c0_i32_0 : i32
    scf.if %2 {
      %cst_215 = arith.constant 0.000000e+00 : f32
      %649 = vector.broadcast %cst_215 : f32 to vector<2x8x32xf32>
      %c0_216 = arith.constant 0 : index
      %c0_217 = arith.constant 0 : index
      %c0_218 = arith.constant 0 : index
      %650 = vector.load %arg14[%c0_216, %c0_217, %c0_218] : memref<2x8x32xf32, #tpu.memory_space<vmem>>, vector<2x8x32xf32>
      tpu.vector_store %arg14[%c0_216, %c0_217, %c0_218], %649 {strides = array<i32>} : memref<2x8x32xf32, #tpu.memory_space<vmem>>, vector<2x8x32xf32>,
      %cst_219 = arith.constant 0.000000e+00 : f32
      %651 = vector.broadcast %cst_219 : f32 to vector<2x8x32xf32>
      %c0_220 = arith.constant 0 : index
      %c0_221 = arith.constant 0 : index
      %c0_222 = arith.constant 0 : index
      %652 = vector.load %arg15[%c0_220, %c0_221, %c0_222] : memref<2x8x32xf32, #tpu.memory_space<vmem>>, vector<2x8x32xf32>
      tpu.vector_store %arg15[%c0_220, %c0_221, %c0_222], %651 {strides = array<i32>} : memref<2x8x32xf32, #tpu.memory_space<vmem>>, vector<2x8x32xf32>,
    } else {
    }
    %c0 = arith.constant 0 : index
    %c0_1 = arith.constant 0 : index
    %3 = vector.load %arg3[%c0, %c0_1] : memref<4x512xbf16, #tpu.memory_space<vmem>>, vector<4x512xbf16>
    %c0_2 = arith.constant 0 : index
    %c0_3 = arith.constant 0 : index
    %4 = vector.load %arg5[%c0_2, %c0_3] : memref<1x512xf32, #tpu.memory_space<vmem>>, vector<1x512xf32>
    %c0_4 = arith.constant 0 : index
    %c0_5 = arith.constant 0 : index
    %c0_6 = arith.constant 0 : index
    %5 = vector.load %arg2[%c0_4, %c0_5, %c0_6] : memref<8x8x4xf32, #tpu.memory_space<vmem>>, vector<8x1x4xf32>
    %6 = vector.shape_cast %5 : vector<8x1x4xf32> to vector<8x4xf32>
    %7 = arith.truncf %6 : vector<8x4xf32> to vector<8x4xbf16>
    %cst = arith.constant dense<0.000000e+00> : vector<8x512xf32>
    %8 = tpu.matmul %7, %3, %cst {dimension_numbers = #tpu.dot_dimension_numbers<[1], [0], [0], [1], [0, 0, 1, 1], [], []>} : vector<8x4xbf16>, vector<4x512xbf16>, vector<8x512xf32> -> vector<8x512xf32>
    %9 = vector.broadcast %4 : vector<1x512xf32> to vector<8x512xf32>
    %10 = arith.addf %8, %9 : vector<8x512xf32>
    %11 = arith.truncf %10 : vector<8x512xf32> to vector<8x512xbf16>
    %c0_7 = arith.constant 0 : index
    %c0_8 = arith.constant 0 : index
    %c0_9 = arith.constant 0 : index
    %12 = vector.load %arg12[%c0_7, %c0_8, %c0_9] : memref<8x8x512xbf16, #tpu.memory_space<vmem>>, vector<1x8x512xbf16>
    %13 = vector.shape_cast %12 : vector<1x8x512xbf16> to vector<8x512xbf16>
    %14 = vector.shape_cast %11 : vector<8x512xbf16> to vector<1x8x512xbf16>
    tpu.vector_store %arg12[%c0_7, %c0_8, %c0_9], %14 {strides = array<i32>} : memref<8x8x512xbf16, #tpu.memory_space<vmem>>, vector<1x8x512xbf16>,
    %c0_10 = arith.constant 0 : index
    %c1 = arith.constant 1 : index
    %c0_11 = arith.constant 0 : index
    %15 = vector.load %arg2[%c0_10, %c1, %c0_11] : memref<8x8x4xf32, #tpu.memory_space<vmem>>, vector<8x1x4xf32>
    %16 = vector.shape_cast %15 : vector<8x1x4xf32> to vector<8x4xf32>
    %17 = arith.truncf %16 : vector<8x4xf32> to vector<8x4xbf16>
    %cst_12 = arith.constant dense<0.000000e+00> : vector<8x512xf32>
    %18 = tpu.matmul %17, %3, %cst_12 {dimension_numbers = #tpu.dot_dimension_numbers<[1], [0], [0], [1], [0, 0, 1, 1], [], []>} : vector<8x4xbf16>, vector<4x512xbf16>, vector<8x512xf32> -> vector<8x512xf32>
    %19 = vector.broadcast %4 : vector<1x512xf32> to vector<8x512xf32>
    %20 = arith.addf %18, %19 : vector<8x512xf32>
    %21 = arith.truncf %20 : vector<8x512xf32> to vector<8x512xbf16>
    %c1_13 = arith.constant 1 : index
    %c0_14 = arith.constant 0 : index
    %c0_15 = arith.constant 0 : index
    %22 = vector.load %arg12[%c1_13, %c0_14, %c0_15] : memref<8x8x512xbf16, #tpu.memory_space<vmem>>, vector<1x8x512xbf16>
    %23 = vector.shape_cast %22 : vector<1x8x512xbf16> to vector<8x512xbf16>
    %24 = vector.shape_cast %21 : vector<8x512xbf16> to vector<1x8x512xbf16>
    tpu.vector_store %arg12[%c1_13, %c0_14, %c0_15], %24 {strides = array<i32>} : memref<8x8x512xbf16, #tpu.memory_space<vmem>>, vector<1x8x512xbf16>,
    %c0_16 = arith.constant 0 : index
    %c2 = arith.constant 2 : index
    %c0_17 = arith.constant 0 : index
    %25 = vector.load %arg2[%c0_16, %c2, %c0_17] : memref<8x8x4xf32, #tpu.memory_space<vmem>>, vector<8x1x4xf32>
    %26 = vector.shape_cast %25 : vector<8x1x4xf32> to vector<8x4xf32>
    %27 = arith.truncf %26 : vector<8x4xf32> to vector<8x4xbf16>
    %cst_18 = arith.constant dense<0.000000e+00> : vector<8x512xf32>
    %28 = tpu.matmul %27, %3, %cst_18 {dimension_numbers = #tpu.dot_dimension_numbers<[1], [0], [0], [1], [0, 0, 1, 1], [], []>} : vector<8x4xbf16>, vector<4x512xbf16>, vector<8x512xf32> -> vector<8x512xf32>
    %29 = vector.broadcast %4 : vector<1x512xf32> to vector<8x512xf32>
    %30 = arith.addf %28, %29 : vector<8x512xf32>
    %31 = arith.truncf %30 : vector<8x512xf32> to vector<8x512xbf16>
    %c2_19 = arith.constant 2 : index
    %c0_20 = arith.constant 0 : index
    %c0_21 = arith.constant 0 : index
    %32 = vector.load %arg12[%c2_19, %c0_20, %c0_21] : memref<8x8x512xbf16, #tpu.memory_space<vmem>>, vector<1x8x512xbf16>
    %33 = vector.shape_cast %32 : vector<1x8x512xbf16> to vector<8x512xbf16>
    %34 = vector.shape_cast %31 : vector<8x512xbf16> to vector<1x8x512xbf16>
    tpu.vector_store %arg12[%c2_19, %c0_20, %c0_21], %34 {strides = array<i32>} : memref<8x8x512xbf16, #tpu.memory_space<vmem>>, vector<1x8x512xbf16>,
    %c0_22 = arith.constant 0 : index
    %c3 = arith.constant 3 : index
    %c0_23 = arith.constant 0 : index
    %35 = vector.load %arg2[%c0_22, %c3, %c0_23] : memref<8x8x4xf32, #tpu.memory_space<vmem>>, vector<8x1x4xf32>
    %36 = vector.shape_cast %35 : vector<8x1x4xf32> to vector<8x4xf32>
    %37 = arith.truncf %36 : vector<8x4xf32> to vector<8x4xbf16>
    %cst_24 = arith.constant dense<0.000000e+00> : vector<8x512xf32>
    %38 = tpu.matmul %37, %3, %cst_24 {dimension_numbers = #tpu.dot_dimension_numbers<[1], [0], [0], [1], [0, 0, 1, 1], [], []>} : vector<8x4xbf16>, vector<4x512xbf16>, vector<8x512xf32> -> vector<8x512xf32>
    %39 = vector.broadcast %4 : vector<1x512xf32> to vector<8x512xf32>
    %40 = arith.addf %38, %39 : vector<8x512xf32>
    %41 = arith.truncf %40 : vector<8x512xf32> to vector<8x512xbf16>
    %c3_25 = arith.constant 3 : index
    %c0_26 = arith.constant 0 : index
    %c0_27 = arith.constant 0 : index
    %42 = vector.load %arg12[%c3_25, %c0_26, %c0_27] : memref<8x8x512xbf16, #tpu.memory_space<vmem>>, vector<1x8x512xbf16>
    %43 = vector.shape_cast %42 : vector<1x8x512xbf16> to vector<8x512xbf16>
    %44 = vector.shape_cast %41 : vector<8x512xbf16> to vector<1x8x512xbf16>
    tpu.vector_store %arg12[%c3_25, %c0_26, %c0_27], %44 {strides = array<i32>} : memref<8x8x512xbf16, #tpu.memory_space<vmem>>, vector<1x8x512xbf16>,
    %c0_28 = arith.constant 0 : index
    %c4 = arith.constant 4 : index
    %c0_29 = arith.constant 0 : index
    %45 = vector.load %arg2[%c0_28, %c4, %c0_29] : memref<8x8x4xf32, #tpu.memory_space<vmem>>, vector<8x1x4xf32>
    %46 = vector.shape_cast %45 : vector<8x1x4xf32> to vector<8x4xf32>
    %47 = arith.truncf %46 : vector<8x4xf32> to vector<8x4xbf16>
    %cst_30 = arith.constant dense<0.000000e+00> : vector<8x512xf32>
    %48 = tpu.matmul %47, %3, %cst_30 {dimension_numbers = #tpu.dot_dimension_numbers<[1], [0], [0], [1], [0, 0, 1, 1], [], []>} : vector<8x4xbf16>, vector<4x512xbf16>, vector<8x512xf32> -> vector<8x512xf32>
    %49 = vector.broadcast %4 : vector<1x512xf32> to vector<8x512xf32>
    %50 = arith.addf %48, %49 : vector<8x512xf32>
    %51 = arith.truncf %50 : vector<8x512xf32> to vector<8x512xbf16>
    %c4_31 = arith.constant 4 : index
    %c0_32 = arith.constant 0 : index
    %c0_33 = arith.constant 0 : index
    %52 = vector.load %arg12[%c4_31, %c0_32, %c0_33] : memref<8x8x512xbf16, #tpu.memory_space<vmem>>, vector<1x8x512xbf16>
    %53 = vector.shape_cast %52 : vector<1x8x512xbf16> to vector<8x512xbf16>
    %54 = vector.shape_cast %51 : vector<8x512xbf16> to vector<1x8x512xbf16>
    tpu.vector_store %arg12[%c4_31, %c0_32, %c0_33], %54 {strides = array<i32>} : memref<8x8x512xbf16, #tpu.memory_space<vmem>>, vector<1x8x512xbf16>,
    %c0_34 = arith.constant 0 : index
    %c5 = arith.constant 5 : index
    %c0_35 = arith.constant 0 : index
    %55 = vector.load %arg2[%c0_34, %c5, %c0_35] : memref<8x8x4xf32, #tpu.memory_space<vmem>>, vector<8x1x4xf32>
    %56 = vector.shape_cast %55 : vector<8x1x4xf32> to vector<8x4xf32>
    %57 = arith.truncf %56 : vector<8x4xf32> to vector<8x4xbf16>
    %cst_36 = arith.constant dense<0.000000e+00> : vector<8x512xf32>
    %58 = tpu.matmul %57, %3, %cst_36 {dimension_numbers = #tpu.dot_dimension_numbers<[1], [0], [0], [1], [0, 0, 1, 1], [], []>} : vector<8x4xbf16>, vector<4x512xbf16>, vector<8x512xf32> -> vector<8x512xf32>
    %59 = vector.broadcast %4 : vector<1x512xf32> to vector<8x512xf32>
    %60 = arith.addf %58, %59 : vector<8x512xf32>
    %61 = arith.truncf %60 : vector<8x512xf32> to vector<8x512xbf16>
    %c5_37 = arith.constant 5 : index
    %c0_38 = arith.constant 0 : index
    %c0_39 = arith.constant 0 : index
    %62 = vector.load %arg12[%c5_37, %c0_38, %c0_39] : memref<8x8x512xbf16, #tpu.memory_space<vmem>>, vector<1x8x512xbf16>
    %63 = vector.shape_cast %62 : vector<1x8x512xbf16> to vector<8x512xbf16>
    %64 = vector.shape_cast %61 : vector<8x512xbf16> to vector<1x8x512xbf16>
    tpu.vector_store %arg12[%c5_37, %c0_38, %c0_39], %64 {strides = array<i32>} : memref<8x8x512xbf16, #tpu.memory_space<vmem>>, vector<1x8x512xbf16>,
    %c0_40 = arith.constant 0 : index
    %c6 = arith.constant 6 : index
    %c0_41 = arith.constant 0 : index
    %65 = vector.load %arg2[%c0_40, %c6, %c0_41] : memref<8x8x4xf32, #tpu.memory_space<vmem>>, vector<8x1x4xf32>
    %66 = vector.shape_cast %65 : vector<8x1x4xf32> to vector<8x4xf32>
    %67 = arith.truncf %66 : vector<8x4xf32> to vector<8x4xbf16>
    %cst_42 = arith.constant dense<0.000000e+00> : vector<8x512xf32>
    %68 = tpu.matmul %67, %3, %cst_42 {dimension_numbers = #tpu.dot_dimension_numbers<[1], [0], [0], [1], [0, 0, 1, 1], [], []>} : vector<8x4xbf16>, vector<4x512xbf16>, vector<8x512xf32> -> vector<8x512xf32>
    %69 = vector.broadcast %4 : vector<1x512xf32> to vector<8x512xf32>
    %70 = arith.addf %68, %69 : vector<8x512xf32>
    %71 = arith.truncf %70 : vector<8x512xf32> to vector<8x512xbf16>
    %c6_43 = arith.constant 6 : index
    %c0_44 = arith.constant 0 : index
    %c0_45 = arith.constant 0 : index
    %72 = vector.load %arg12[%c6_43, %c0_44, %c0_45] : memref<8x8x512xbf16, #tpu.memory_space<vmem>>, vector<1x8x512xbf16>
    %73 = vector.shape_cast %72 : vector<1x8x512xbf16> to vector<8x512xbf16>
    %74 = vector.shape_cast %71 : vector<8x512xbf16> to vector<1x8x512xbf16>
    tpu.vector_store %arg12[%c6_43, %c0_44, %c0_45], %74 {strides = array<i32>} : memref<8x8x512xbf16, #tpu.memory_space<vmem>>, vector<1x8x512xbf16>,
    %c0_46 = arith.constant 0 : index
    %c7 = arith.constant 7 : index
    %c0_47 = arith.constant 0 : index
    %75 = vector.load %arg2[%c0_46, %c7, %c0_47] : memref<8x8x4xf32, #tpu.memory_space<vmem>>, vector<8x1x4xf32>
    %76 = vector.shape_cast %75 : vector<8x1x4xf32> to vector<8x4xf32>
    %77 = arith.truncf %76 : vector<8x4xf32> to vector<8x4xbf16>
    %cst_48 = arith.constant dense<0.000000e+00> : vector<8x512xf32>
    %78 = tpu.matmul %77, %3, %cst_48 {dimension_numbers = #tpu.dot_dimension_numbers<[1], [0], [0], [1], [0, 0, 1, 1], [], []>} : vector<8x4xbf16>, vector<4x512xbf16>, vector<8x512xf32> -> vector<8x512xf32>
    %79 = vector.broadcast %4 : vector<1x512xf32> to vector<8x512xf32>
    %80 = arith.addf %78, %79 : vector<8x512xf32>
    %81 = arith.truncf %80 : vector<8x512xf32> to vector<8x512xbf16>
    %c7_49 = arith.constant 7 : index
    %c0_50 = arith.constant 0 : index
    %c0_51 = arith.constant 0 : index
    %82 = vector.load %arg12[%c7_49, %c0_50, %c0_51] : memref<8x8x512xbf16, #tpu.memory_space<vmem>>, vector<1x8x512xbf16>
    %83 = vector.shape_cast %82 : vector<1x8x512xbf16> to vector<8x512xbf16>
    %84 = vector.shape_cast %81 : vector<8x512xbf16> to vector<1x8x512xbf16>
    tpu.vector_store %arg12[%c7_49, %c0_50, %c0_51], %84 {strides = array<i32>} : memref<8x8x512xbf16, #tpu.memory_space<vmem>>, vector<1x8x512xbf16>,
    %c0_52 = arith.constant 0 : index
    %c0_53 = arith.constant 0 : index
    %85 = vector.load %arg4[%c0_52, %c0_53] : memref<32x512xf32, #tpu.memory_space<vmem>>, vector<32x512xf32>
    %c0_54 = arith.constant 0 : index
    %c0_55 = arith.constant 0 : index
    %c0_56 = arith.constant 0 : index
    %86 = vector.load %arg14[%c0_54, %c0_55, %c0_56] : memref<2x8x32xf32, #tpu.memory_space<vmem>>, vector<1x8x32xf32>
    %87 = vector.shape_cast %86 : vector<1x8x32xf32> to vector<8x32xf32>
    %c0_57 = arith.constant 0 : index
    %c0_58 = arith.constant 0 : index
    %c0_59 = arith.constant 0 : index
    %88 = vector.load %arg15[%c0_57, %c0_58, %c0_59] : memref<2x8x32xf32, #tpu.memory_space<vmem>>, vector<1x8x32xf32>
    %89 = vector.shape_cast %88 : vector<1x8x32xf32> to vector<8x32xf32>
    %c0_i32_60 = arith.constant 0 : i32
    %90 = arith.index_cast %c0_i32_60 : i32 to index
    %c0_61 = arith.constant 0 : index
    %c0_62 = arith.constant 0 : index
    %91 = vector.load %arg12[%90, %c0_61, %c0_62] : memref<8x8x512xbf16, #tpu.memory_space<vmem>>, vector<1x8x512xbf16>
    %92 = vector.shape_cast %91 : vector<1x8x512xbf16> to vector<8x512xbf16>
    %93 = arith.extf %92 : vector<8x512xbf16> to vector<8x512xf32>
    %cst_63 = arith.constant dense<0.000000e+00> : vector<8x512xf32>
    %94 = tpu.matmul %87, %85, %cst_63 {dimension_numbers = #tpu.dot_dimension_numbers<[1], [0], [0], [1], [0, 0, 1, 1], [], []>} : vector<8x32xf32>, vector<32x512xf32>, vector<8x512xf32> -> vector<8x512xf32>
    %95 = arith.addf %93, %94 : vector<8x512xf32>
    %96 = vector.extract_strided_slice %95 {offsets = [0, 0], sizes = [8, 32], strides = [1, 1]} : vector<8x512xf32> to vector<8x32xf32>
    %97 = arith.negf %96 : vector<8x32xf32>
    %98 = math.exp %97 : vector<8x32xf32>
    %cst_64 = arith.constant 1.000000e+00 : f32
    %99 = vector.broadcast %cst_64 : f32 to vector<8x32xf32>
    %100 = arith.addf %99, %98 : vector<8x32xf32>
    %101 = arith.divf %99, %100 : vector<8x32xf32>
    %102 = vector.extract_strided_slice %95 {offsets = [0, 128], sizes = [8, 32], strides = [1, 1]} : vector<8x512xf32> to vector<8x32xf32>
    %103 = arith.negf %102 : vector<8x32xf32>
    %104 = math.exp %103 : vector<8x32xf32>
    %cst_65 = arith.constant 1.000000e+00 : f32
    %105 = vector.broadcast %cst_65 : f32 to vector<8x32xf32>
    %106 = arith.addf %105, %104 : vector<8x32xf32>
    %107 = arith.divf %105, %106 : vector<8x32xf32>
    %108 = vector.extract_strided_slice %95 {offsets = [0, 256], sizes = [8, 32], strides = [1, 1]} : vector<8x512xf32> to vector<8x32xf32>
    %109 = math.tanh %108 : vector<8x32xf32>
    %110 = vector.extract_strided_slice %95 {offsets = [0, 384], sizes = [8, 32], strides = [1, 1]} : vector<8x512xf32> to vector<8x32xf32>
    %111 = arith.negf %110 : vector<8x32xf32>
    %112 = math.exp %111 : vector<8x32xf32>
    %cst_66 = arith.constant 1.000000e+00 : f32
    %113 = vector.broadcast %cst_66 : f32 to vector<8x32xf32>
    %114 = arith.addf %113, %112 : vector<8x32xf32>
    %115 = arith.divf %113, %114 : vector<8x32xf32>
    %116 = arith.mulf %107, %89 : vector<8x32xf32>
    %117 = arith.mulf %101, %109 : vector<8x32xf32>
    %118 = arith.addf %116, %117 : vector<8x32xf32>
    %119 = math.tanh %118 : vector<8x32xf32>
    %120 = arith.mulf %115, %119 : vector<8x32xf32>
    %121 = arith.index_cast %c0_i32_60 : i32 to index
    %c0_67 = arith.constant 0 : index
    %c0_68 = arith.constant 0 : index
    %122 = vector.load %arg13[%121, %c0_67, %c0_68] : memref<8x8x32xf32, #tpu.memory_space<vmem>>, vector<1x8x32xf32>
    %123 = vector.shape_cast %122 : vector<1x8x32xf32> to vector<8x32xf32>
    %124 = vector.shape_cast %120 : vector<8x32xf32> to vector<1x8x32xf32>
    tpu.vector_store %arg13[%121, %c0_67, %c0_68], %124 {strides = array<i32>} : memref<8x8x32xf32, #tpu.memory_space<vmem>>, vector<1x8x32xf32>,
    %c1_i32 = arith.constant 1 : i32
    %125 = arith.index_cast %c1_i32 : i32 to index
    %c0_69 = arith.constant 0 : index
    %c0_70 = arith.constant 0 : index
    %126 = vector.load %arg12[%125, %c0_69, %c0_70] : memref<8x8x512xbf16, #tpu.memory_space<vmem>>, vector<1x8x512xbf16>
    %127 = vector.shape_cast %126 : vector<1x8x512xbf16> to vector<8x512xbf16>
    %128 = arith.extf %127 : vector<8x512xbf16> to vector<8x512xf32>
    %cst_71 = arith.constant dense<0.000000e+00> : vector<8x512xf32>
    %129 = tpu.matmul %120, %85, %cst_71 {dimension_numbers = #tpu.dot_dimension_numbers<[1], [0], [0], [1], [0, 0, 1, 1], [], []>} : vector<8x32xf32>, vector<32x512xf32>, vector<8x512xf32> -> vector<8x512xf32>
    %130 = arith.addf %128, %129 : vector<8x512xf32>
    %131 = vector.extract_strided_slice %130 {offsets = [0, 0], sizes = [8, 32], strides = [1, 1]} : vector<8x512xf32> to vector<8x32xf32>
    %132 = arith.negf %131 : vector<8x32xf32>
    %133 = math.exp %132 : vector<8x32xf32>
    %cst_72 = arith.constant 1.000000e+00 : f32
    %134 = vector.broadcast %cst_72 : f32 to vector<8x32xf32>
    %135 = arith.addf %134, %133 : vector<8x32xf32>
    %136 = arith.divf %134, %135 : vector<8x32xf32>
    %137 = vector.extract_strided_slice %130 {offsets = [0, 128], sizes = [8, 32], strides = [1, 1]} : vector<8x512xf32> to vector<8x32xf32>
    %138 = arith.negf %137 : vector<8x32xf32>
    %139 = math.exp %138 : vector<8x32xf32>
    %cst_73 = arith.constant 1.000000e+00 : f32
    %140 = vector.broadcast %cst_73 : f32 to vector<8x32xf32>
    %141 = arith.addf %140, %139 : vector<8x32xf32>
    %142 = arith.divf %140, %141 : vector<8x32xf32>
    %143 = vector.extract_strided_slice %130 {offsets = [0, 256], sizes = [8, 32], strides = [1, 1]} : vector<8x512xf32> to vector<8x32xf32>
    %144 = math.tanh %143 : vector<8x32xf32>
    %145 = vector.extract_strided_slice %130 {offsets = [0, 384], sizes = [8, 32], strides = [1, 1]} : vector<8x512xf32> to vector<8x32xf32>
    %146 = arith.negf %145 : vector<8x32xf32>
    %147 = math.exp %146 : vector<8x32xf32>
    %cst_74 = arith.constant 1.000000e+00 : f32
    %148 = vector.broadcast %cst_74 : f32 to vector<8x32xf32>
    %149 = arith.addf %148, %147 : vector<8x32xf32>
    %150 = arith.divf %148, %149 : vector<8x32xf32>
    %151 = arith.mulf %142, %118 : vector<8x32xf32>
    %152 = arith.mulf %136, %144 : vector<8x32xf32>
    %153 = arith.addf %151, %152 : vector<8x32xf32>
    %154 = math.tanh %153 : vector<8x32xf32>
    %155 = arith.mulf %150, %154 : vector<8x32xf32>
    %156 = arith.index_cast %c1_i32 : i32 to index
    %c0_75 = arith.constant 0 : index
    %c0_76 = arith.constant 0 : index
    %157 = vector.load %arg13[%156, %c0_75, %c0_76] : memref<8x8x32xf32, #tpu.memory_space<vmem>>, vector<1x8x32xf32>
    %158 = vector.shape_cast %157 : vector<1x8x32xf32> to vector<8x32xf32>
    %159 = vector.shape_cast %155 : vector<8x32xf32> to vector<1x8x32xf32>
    tpu.vector_store %arg13[%156, %c0_75, %c0_76], %159 {strides = array<i32>} : memref<8x8x32xf32, #tpu.memory_space<vmem>>, vector<1x8x32xf32>,
    %c2_i32 = arith.constant 2 : i32
    %160 = arith.index_cast %c2_i32 : i32 to index
    %c0_77 = arith.constant 0 : index
    %c0_78 = arith.constant 0 : index
    %161 = vector.load %arg12[%160, %c0_77, %c0_78] : memref<8x8x512xbf16, #tpu.memory_space<vmem>>, vector<1x8x512xbf16>
    %162 = vector.shape_cast %161 : vector<1x8x512xbf16> to vector<8x512xbf16>
    %163 = arith.extf %162 : vector<8x512xbf16> to vector<8x512xf32>
    %cst_79 = arith.constant dense<0.000000e+00> : vector<8x512xf32>
    %164 = tpu.matmul %155, %85, %cst_79 {dimension_numbers = #tpu.dot_dimension_numbers<[1], [0], [0], [1], [0, 0, 1, 1], [], []>} : vector<8x32xf32>, vector<32x512xf32>, vector<8x512xf32> -> vector<8x512xf32>
    %165 = arith.addf %163, %164 : vector<8x512xf32>
    %166 = vector.extract_strided_slice %165 {offsets = [0, 0], sizes = [8, 32], strides = [1, 1]} : vector<8x512xf32> to vector<8x32xf32>
    %167 = arith.negf %166 : vector<8x32xf32>
    %168 = math.exp %167 : vector<8x32xf32>
    %cst_80 = arith.constant 1.000000e+00 : f32
    %169 = vector.broadcast %cst_80 : f32 to vector<8x32xf32>
    %170 = arith.addf %169, %168 : vector<8x32xf32>
    %171 = arith.divf %169, %170 : vector<8x32xf32>
    %172 = vector.extract_strided_slice %165 {offsets = [0, 128], sizes = [8, 32], strides = [1, 1]} : vector<8x512xf32> to vector<8x32xf32>
    %173 = arith.negf %172 : vector<8x32xf32>
    %174 = math.exp %173 : vector<8x32xf32>
    %cst_81 = arith.constant 1.000000e+00 : f32
    %175 = vector.broadcast %cst_81 : f32 to vector<8x32xf32>
    %176 = arith.addf %175, %174 : vector<8x32xf32>
    %177 = arith.divf %175, %176 : vector<8x32xf32>
    %178 = vector.extract_strided_slice %165 {offsets = [0, 256], sizes = [8, 32], strides = [1, 1]} : vector<8x512xf32> to vector<8x32xf32>
    %179 = math.tanh %178 : vector<8x32xf32>
    %180 = vector.extract_strided_slice %165 {offsets = [0, 384], sizes = [8, 32], strides = [1, 1]} : vector<8x512xf32> to vector<8x32xf32>
    %181 = arith.negf %180 : vector<8x32xf32>
    %182 = math.exp %181 : vector<8x32xf32>
    %cst_82 = arith.constant 1.000000e+00 : f32
    %183 = vector.broadcast %cst_82 : f32 to vector<8x32xf32>
    %184 = arith.addf %183, %182 : vector<8x32xf32>
    %185 = arith.divf %183, %184 : vector<8x32xf32>
    %186 = arith.mulf %177, %153 : vector<8x32xf32>
    %187 = arith.mulf %171, %179 : vector<8x32xf32>
    %188 = arith.addf %186, %187 : vector<8x32xf32>
    %189 = math.tanh %188 : vector<8x32xf32>
    %190 = arith.mulf %185, %189 : vector<8x32xf32>
    %191 = arith.index_cast %c2_i32 : i32 to index
    %c0_83 = arith.constant 0 : index
    %c0_84 = arith.constant 0 : index
    %192 = vector.load %arg13[%191, %c0_83, %c0_84] : memref<8x8x32xf32, #tpu.memory_space<vmem>>, vector<1x8x32xf32>
    %193 = vector.shape_cast %192 : vector<1x8x32xf32> to vector<8x32xf32>
    %194 = vector.shape_cast %190 : vector<8x32xf32> to vector<1x8x32xf32>
    tpu.vector_store %arg13[%191, %c0_83, %c0_84], %194 {strides = array<i32>} : memref<8x8x32xf32, #tpu.memory_space<vmem>>, vector<1x8x32xf32>,
    %c3_i32 = arith.constant 3 : i32
    %195 = arith.index_cast %c3_i32 : i32 to index
    %c0_85 = arith.constant 0 : index
    %c0_86 = arith.constant 0 : index
    %196 = vector.load %arg12[%195, %c0_85, %c0_86] : memref<8x8x512xbf16, #tpu.memory_space<vmem>>, vector<1x8x512xbf16>
    %197 = vector.shape_cast %196 : vector<1x8x512xbf16> to vector<8x512xbf16>
    %198 = arith.extf %197 : vector<8x512xbf16> to vector<8x512xf32>
    %cst_87 = arith.constant dense<0.000000e+00> : vector<8x512xf32>
    %199 = tpu.matmul %190, %85, %cst_87 {dimension_numbers = #tpu.dot_dimension_numbers<[1], [0], [0], [1], [0, 0, 1, 1], [], []>} : vector<8x32xf32>, vector<32x512xf32>, vector<8x512xf32> -> vector<8x512xf32>
    %200 = arith.addf %198, %199 : vector<8x512xf32>
    %201 = vector.extract_strided_slice %200 {offsets = [0, 0], sizes = [8, 32], strides = [1, 1]} : vector<8x512xf32> to vector<8x32xf32>
    %202 = arith.negf %201 : vector<8x32xf32>
    %203 = math.exp %202 : vector<8x32xf32>
    %cst_88 = arith.constant 1.000000e+00 : f32
    %204 = vector.broadcast %cst_88 : f32 to vector<8x32xf32>
    %205 = arith.addf %204, %203 : vector<8x32xf32>
    %206 = arith.divf %204, %205 : vector<8x32xf32>
    %207 = vector.extract_strided_slice %200 {offsets = [0, 128], sizes = [8, 32], strides = [1, 1]} : vector<8x512xf32> to vector<8x32xf32>
    %208 = arith.negf %207 : vector<8x32xf32>
    %209 = math.exp %208 : vector<8x32xf32>
    %cst_89 = arith.constant 1.000000e+00 : f32
    %210 = vector.broadcast %cst_89 : f32 to vector<8x32xf32>
    %211 = arith.addf %210, %209 : vector<8x32xf32>
    %212 = arith.divf %210, %211 : vector<8x32xf32>
    %213 = vector.extract_strided_slice %200 {offsets = [0, 256], sizes = [8, 32], strides = [1, 1]} : vector<8x512xf32> to vector<8x32xf32>
    %214 = math.tanh %213 : vector<8x32xf32>
    %215 = vector.extract_strided_slice %200 {offsets = [0, 384], sizes = [8, 32], strides = [1, 1]} : vector<8x512xf32> to vector<8x32xf32>
    %216 = arith.negf %215 : vector<8x32xf32>
    %217 = math.exp %216 : vector<8x32xf32>
    %cst_90 = arith.constant 1.000000e+00 : f32
    %218 = vector.broadcast %cst_90 : f32 to vector<8x32xf32>
    %219 = arith.addf %218, %217 : vector<8x32xf32>
    %220 = arith.divf %218, %219 : vector<8x32xf32>
    %221 = arith.mulf %212, %188 : vector<8x32xf32>
    %222 = arith.mulf %206, %214 : vector<8x32xf32>
    %223 = arith.addf %221, %222 : vector<8x32xf32>
    %224 = math.tanh %223 : vector<8x32xf32>
    %225 = arith.mulf %220, %224 : vector<8x32xf32>
    %226 = arith.index_cast %c3_i32 : i32 to index
    %c0_91 = arith.constant 0 : index
    %c0_92 = arith.constant 0 : index
    %227 = vector.load %arg13[%226, %c0_91, %c0_92] : memref<8x8x32xf32, #tpu.memory_space<vmem>>, vector<1x8x32xf32>
    %228 = vector.shape_cast %227 : vector<1x8x32xf32> to vector<8x32xf32>
    %229 = vector.shape_cast %225 : vector<8x32xf32> to vector<1x8x32xf32>
    tpu.vector_store %arg13[%226, %c0_91, %c0_92], %229 {strides = array<i32>} : memref<8x8x32xf32, #tpu.memory_space<vmem>>, vector<1x8x32xf32>,
    %c4_i32 = arith.constant 4 : i32
    %230 = arith.index_cast %c4_i32 : i32 to index
    %c0_93 = arith.constant 0 : index
    %c0_94 = arith.constant 0 : index
    %231 = vector.load %arg12[%230, %c0_93, %c0_94] : memref<8x8x512xbf16, #tpu.memory_space<vmem>>, vector<1x8x512xbf16>
    %232 = vector.shape_cast %231 : vector<1x8x512xbf16> to vector<8x512xbf16>
    %233 = arith.extf %232 : vector<8x512xbf16> to vector<8x512xf32>
    %cst_95 = arith.constant dense<0.000000e+00> : vector<8x512xf32>
    %234 = tpu.matmul %225, %85, %cst_95 {dimension_numbers = #tpu.dot_dimension_numbers<[1], [0], [0], [1], [0, 0, 1, 1], [], []>} : vector<8x32xf32>, vector<32x512xf32>, vector<8x512xf32> -> vector<8x512xf32>
    %235 = arith.addf %233, %234 : vector<8x512xf32>
    %236 = vector.extract_strided_slice %235 {offsets = [0, 0], sizes = [8, 32], strides = [1, 1]} : vector<8x512xf32> to vector<8x32xf32>
    %237 = arith.negf %236 : vector<8x32xf32>
    %238 = math.exp %237 : vector<8x32xf32>
    %cst_96 = arith.constant 1.000000e+00 : f32
    %239 = vector.broadcast %cst_96 : f32 to vector<8x32xf32>
    %240 = arith.addf %239, %238 : vector<8x32xf32>
    %241 = arith.divf %239, %240 : vector<8x32xf32>
    %242 = vector.extract_strided_slice %235 {offsets = [0, 128], sizes = [8, 32], strides = [1, 1]} : vector<8x512xf32> to vector<8x32xf32>
    %243 = arith.negf %242 : vector<8x32xf32>
    %244 = math.exp %243 : vector<8x32xf32>
    %cst_97 = arith.constant 1.000000e+00 : f32
    %245 = vector.broadcast %cst_97 : f32 to vector<8x32xf32>
    %246 = arith.addf %245, %244 : vector<8x32xf32>
    %247 = arith.divf %245, %246 : vector<8x32xf32>
    %248 = vector.extract_strided_slice %235 {offsets = [0, 256], sizes = [8, 32], strides = [1, 1]} : vector<8x512xf32> to vector<8x32xf32>
    %249 = math.tanh %248 : vector<8x32xf32>
    %250 = vector.extract_strided_slice %235 {offsets = [0, 384], sizes = [8, 32], strides = [1, 1]} : vector<8x512xf32> to vector<8x32xf32>
    %251 = arith.negf %250 : vector<8x32xf32>
    %252 = math.exp %251 : vector<8x32xf32>
    %cst_98 = arith.constant 1.000000e+00 : f32
    %253 = vector.broadcast %cst_98 : f32 to vector<8x32xf32>
    %254 = arith.addf %253, %252 : vector<8x32xf32>
    %255 = arith.divf %253, %254 : vector<8x32xf32>
    %256 = arith.mulf %247, %223 : vector<8x32xf32>
    %257 = arith.mulf %241, %249 : vector<8x32xf32>
    %258 = arith.addf %256, %257 : vector<8x32xf32>
    %259 = math.tanh %258 : vector<8x32xf32>
    %260 = arith.mulf %255, %259 : vector<8x32xf32>
    %261 = arith.index_cast %c4_i32 : i32 to index
    %c0_99 = arith.constant 0 : index
    %c0_100 = arith.constant 0 : index
    %262 = vector.load %arg13[%261, %c0_99, %c0_100] : memref<8x8x32xf32, #tpu.memory_space<vmem>>, vector<1x8x32xf32>
    %263 = vector.shape_cast %262 : vector<1x8x32xf32> to vector<8x32xf32>
    %264 = vector.shape_cast %260 : vector<8x32xf32> to vector<1x8x32xf32>
    tpu.vector_store %arg13[%261, %c0_99, %c0_100], %264 {strides = array<i32>} : memref<8x8x32xf32, #tpu.memory_space<vmem>>, vector<1x8x32xf32>,
    %c5_i32 = arith.constant 5 : i32
    %265 = arith.index_cast %c5_i32 : i32 to index
    %c0_101 = arith.constant 0 : index
    %c0_102 = arith.constant 0 : index
    %266 = vector.load %arg12[%265, %c0_101, %c0_102] : memref<8x8x512xbf16, #tpu.memory_space<vmem>>, vector<1x8x512xbf16>
    %267 = vector.shape_cast %266 : vector<1x8x512xbf16> to vector<8x512xbf16>
    %268 = arith.extf %267 : vector<8x512xbf16> to vector<8x512xf32>
    %cst_103 = arith.constant dense<0.000000e+00> : vector<8x512xf32>
    %269 = tpu.matmul %260, %85, %cst_103 {dimension_numbers = #tpu.dot_dimension_numbers<[1], [0], [0], [1], [0, 0, 1, 1], [], []>} : vector<8x32xf32>, vector<32x512xf32>, vector<8x512xf32> -> vector<8x512xf32>
    %270 = arith.addf %268, %269 : vector<8x512xf32>
    %271 = vector.extract_strided_slice %270 {offsets = [0, 0], sizes = [8, 32], strides = [1, 1]} : vector<8x512xf32> to vector<8x32xf32>
    %272 = arith.negf %271 : vector<8x32xf32>
    %273 = math.exp %272 : vector<8x32xf32>
    %cst_104 = arith.constant 1.000000e+00 : f32
    %274 = vector.broadcast %cst_104 : f32 to vector<8x32xf32>
    %275 = arith.addf %274, %273 : vector<8x32xf32>
    %276 = arith.divf %274, %275 : vector<8x32xf32>
    %277 = vector.extract_strided_slice %270 {offsets = [0, 128], sizes = [8, 32], strides = [1, 1]} : vector<8x512xf32> to vector<8x32xf32>
    %278 = arith.negf %277 : vector<8x32xf32>
    %279 = math.exp %278 : vector<8x32xf32>
    %cst_105 = arith.constant 1.000000e+00 : f32
    %280 = vector.broadcast %cst_105 : f32 to vector<8x32xf32>
    %281 = arith.addf %280, %279 : vector<8x32xf32>
    %282 = arith.divf %280, %281 : vector<8x32xf32>
    %283 = vector.extract_strided_slice %270 {offsets = [0, 256], sizes = [8, 32], strides = [1, 1]} : vector<8x512xf32> to vector<8x32xf32>
    %284 = math.tanh %283 : vector<8x32xf32>
    %285 = vector.extract_strided_slice %270 {offsets = [0, 384], sizes = [8, 32], strides = [1, 1]} : vector<8x512xf32> to vector<8x32xf32>
    %286 = arith.negf %285 : vector<8x32xf32>
    %287 = math.exp %286 : vector<8x32xf32>
    %cst_106 = arith.constant 1.000000e+00 : f32
    %288 = vector.broadcast %cst_106 : f32 to vector<8x32xf32>
    %289 = arith.addf %288, %287 : vector<8x32xf32>
    %290 = arith.divf %288, %289 : vector<8x32xf32>
    %291 = arith.mulf %282, %258 : vector<8x32xf32>
    %292 = arith.mulf %276, %284 : vector<8x32xf32>
    %293 = arith.addf %291, %292 : vector<8x32xf32>
    %294 = math.tanh %293 : vector<8x32xf32>
    %295 = arith.mulf %290, %294 : vector<8x32xf32>
    %296 = arith.index_cast %c5_i32 : i32 to index
    %c0_107 = arith.constant 0 : index
    %c0_108 = arith.constant 0 : index
    %297 = vector.load %arg13[%296, %c0_107, %c0_108] : memref<8x8x32xf32, #tpu.memory_space<vmem>>, vector<1x8x32xf32>
    %298 = vector.shape_cast %297 : vector<1x8x32xf32> to vector<8x32xf32>
    %299 = vector.shape_cast %295 : vector<8x32xf32> to vector<1x8x32xf32>
    tpu.vector_store %arg13[%296, %c0_107, %c0_108], %299 {strides = array<i32>} : memref<8x8x32xf32, #tpu.memory_space<vmem>>, vector<1x8x32xf32>,
    %c6_i32 = arith.constant 6 : i32
    %300 = arith.index_cast %c6_i32 : i32 to index
    %c0_109 = arith.constant 0 : index
    %c0_110 = arith.constant 0 : index
    %301 = vector.load %arg12[%300, %c0_109, %c0_110] : memref<8x8x512xbf16, #tpu.memory_space<vmem>>, vector<1x8x512xbf16>
    %302 = vector.shape_cast %301 : vector<1x8x512xbf16> to vector<8x512xbf16>
    %303 = arith.extf %302 : vector<8x512xbf16> to vector<8x512xf32>
    %cst_111 = arith.constant dense<0.000000e+00> : vector<8x512xf32>
    %304 = tpu.matmul %295, %85, %cst_111 {dimension_numbers = #tpu.dot_dimension_numbers<[1], [0], [0], [1], [0, 0, 1, 1], [], []>} : vector<8x32xf32>, vector<32x512xf32>, vector<8x512xf32> -> vector<8x512xf32>
    %305 = arith.addf %303, %304 : vector<8x512xf32>
    %306 = vector.extract_strided_slice %305 {offsets = [0, 0], sizes = [8, 32], strides = [1, 1]} : vector<8x512xf32> to vector<8x32xf32>
    %307 = arith.negf %306 : vector<8x32xf32>
    %308 = math.exp %307 : vector<8x32xf32>
    %cst_112 = arith.constant 1.000000e+00 : f32
    %309 = vector.broadcast %cst_112 : f32 to vector<8x32xf32>
    %310 = arith.addf %309, %308 : vector<8x32xf32>
    %311 = arith.divf %309, %310 : vector<8x32xf32>
    %312 = vector.extract_strided_slice %305 {offsets = [0, 128], sizes = [8, 32], strides = [1, 1]} : vector<8x512xf32> to vector<8x32xf32>
    %313 = arith.negf %312 : vector<8x32xf32>
    %314 = math.exp %313 : vector<8x32xf32>
    %cst_113 = arith.constant 1.000000e+00 : f32
    %315 = vector.broadcast %cst_113 : f32 to vector<8x32xf32>
    %316 = arith.addf %315, %314 : vector<8x32xf32>
    %317 = arith.divf %315, %316 : vector<8x32xf32>
    %318 = vector.extract_strided_slice %305 {offsets = [0, 256], sizes = [8, 32], strides = [1, 1]} : vector<8x512xf32> to vector<8x32xf32>
    %319 = math.tanh %318 : vector<8x32xf32>
    %320 = vector.extract_strided_slice %305 {offsets = [0, 384], sizes = [8, 32], strides = [1, 1]} : vector<8x512xf32> to vector<8x32xf32>
    %321 = arith.negf %320 : vector<8x32xf32>
    %322 = math.exp %321 : vector<8x32xf32>
    %cst_114 = arith.constant 1.000000e+00 : f32
    %323 = vector.broadcast %cst_114 : f32 to vector<8x32xf32>
    %324 = arith.addf %323, %322 : vector<8x32xf32>
    %325 = arith.divf %323, %324 : vector<8x32xf32>
    %326 = arith.mulf %317, %293 : vector<8x32xf32>
    %327 = arith.mulf %311, %319 : vector<8x32xf32>
    %328 = arith.addf %326, %327 : vector<8x32xf32>
    %329 = math.tanh %328 : vector<8x32xf32>
    %330 = arith.mulf %325, %329 : vector<8x32xf32>
    %331 = arith.index_cast %c6_i32 : i32 to index
    %c0_115 = arith.constant 0 : index
    %c0_116 = arith.constant 0 : index
    %332 = vector.load %arg13[%331, %c0_115, %c0_116] : memref<8x8x32xf32, #tpu.memory_space<vmem>>, vector<1x8x32xf32>
    %333 = vector.shape_cast %332 : vector<1x8x32xf32> to vector<8x32xf32>
    %334 = vector.shape_cast %330 : vector<8x32xf32> to vector<1x8x32xf32>
    tpu.vector_store %arg13[%331, %c0_115, %c0_116], %334 {strides = array<i32>} : memref<8x8x32xf32, #tpu.memory_space<vmem>>, vector<1x8x32xf32>,
    %c7_i32 = arith.constant 7 : i32
    %335 = arith.index_cast %c7_i32 : i32 to index
    %c0_117 = arith.constant 0 : index
    %c0_118 = arith.constant 0 : index
    %336 = vector.load %arg12[%335, %c0_117, %c0_118] : memref<8x8x512xbf16, #tpu.memory_space<vmem>>, vector<1x8x512xbf16>
    %337 = vector.shape_cast %336 : vector<1x8x512xbf16> to vector<8x512xbf16>
    %338 = arith.extf %337 : vector<8x512xbf16> to vector<8x512xf32>
    %cst_119 = arith.constant dense<0.000000e+00> : vector<8x512xf32>
    %339 = tpu.matmul %330, %85, %cst_119 {dimension_numbers = #tpu.dot_dimension_numbers<[1], [0], [0], [1], [0, 0, 1, 1], [], []>} : vector<8x32xf32>, vector<32x512xf32>, vector<8x512xf32> -> vector<8x512xf32>
    %340 = arith.addf %338, %339 : vector<8x512xf32>
    %341 = vector.extract_strided_slice %340 {offsets = [0, 0], sizes = [8, 32], strides = [1, 1]} : vector<8x512xf32> to vector<8x32xf32>
    %342 = arith.negf %341 : vector<8x32xf32>
    %343 = math.exp %342 : vector<8x32xf32>
    %cst_120 = arith.constant 1.000000e+00 : f32
    %344 = vector.broadcast %cst_120 : f32 to vector<8x32xf32>
    %345 = arith.addf %344, %343 : vector<8x32xf32>
    %346 = arith.divf %344, %345 : vector<8x32xf32>
    %347 = vector.extract_strided_slice %340 {offsets = [0, 128], sizes = [8, 32], strides = [1, 1]} : vector<8x512xf32> to vector<8x32xf32>
    %348 = arith.negf %347 : vector<8x32xf32>
    %349 = math.exp %348 : vector<8x32xf32>
    %cst_121 = arith.constant 1.000000e+00 : f32
    %350 = vector.broadcast %cst_121 : f32 to vector<8x32xf32>
    %351 = arith.addf %350, %349 : vector<8x32xf32>
    %352 = arith.divf %350, %351 : vector<8x32xf32>
    %353 = vector.extract_strided_slice %340 {offsets = [0, 256], sizes = [8, 32], strides = [1, 1]} : vector<8x512xf32> to vector<8x32xf32>
    %354 = math.tanh %353 : vector<8x32xf32>
    %355 = vector.extract_strided_slice %340 {offsets = [0, 384], sizes = [8, 32], strides = [1, 1]} : vector<8x512xf32> to vector<8x32xf32>
    %356 = arith.negf %355 : vector<8x32xf32>
    %357 = math.exp %356 : vector<8x32xf32>
    %cst_122 = arith.constant 1.000000e+00 : f32
    %358 = vector.broadcast %cst_122 : f32 to vector<8x32xf32>
    %359 = arith.addf %358, %357 : vector<8x32xf32>
    %360 = arith.divf %358, %359 : vector<8x32xf32>
    %361 = arith.mulf %352, %328 : vector<8x32xf32>
    %362 = arith.mulf %346, %354 : vector<8x32xf32>
    %363 = arith.addf %361, %362 : vector<8x32xf32>
    %364 = math.tanh %363 : vector<8x32xf32>
    %365 = arith.mulf %360, %364 : vector<8x32xf32>
    %366 = arith.index_cast %c7_i32 : i32 to index
    %c0_123 = arith.constant 0 : index
    %c0_124 = arith.constant 0 : index
    %367 = vector.load %arg13[%366, %c0_123, %c0_124] : memref<8x8x32xf32, #tpu.memory_space<vmem>>, vector<1x8x32xf32>
    %368 = vector.shape_cast %367 : vector<1x8x32xf32> to vector<8x32xf32>
    %369 = vector.shape_cast %365 : vector<8x32xf32> to vector<1x8x32xf32>
    tpu.vector_store %arg13[%366, %c0_123, %c0_124], %369 {strides = array<i32>} : memref<8x8x32xf32, #tpu.memory_space<vmem>>, vector<1x8x32xf32>,
    %c8_i32 = arith.constant 8 : i32
    %c0_125 = arith.constant 0 : index
    %c0_126 = arith.constant 0 : index
    %c0_127 = arith.constant 0 : index
    %370 = vector.load %arg14[%c0_125, %c0_126, %c0_127] : memref<2x8x32xf32, #tpu.memory_space<vmem>>, vector<1x8x32xf32>
    %371 = vector.shape_cast %370 : vector<1x8x32xf32> to vector<8x32xf32>
    %372 = vector.shape_cast %365 : vector<8x32xf32> to vector<1x8x32xf32>
    tpu.vector_store %arg14[%c0_125, %c0_126, %c0_127], %372 {strides = array<i32>} : memref<2x8x32xf32, #tpu.memory_space<vmem>>, vector<1x8x32xf32>,
    %c0_128 = arith.constant 0 : index
    %c0_129 = arith.constant 0 : index
    %c0_130 = arith.constant 0 : index
    %373 = vector.load %arg15[%c0_128, %c0_129, %c0_130] : memref<2x8x32xf32, #tpu.memory_space<vmem>>, vector<1x8x32xf32>
    %374 = vector.shape_cast %373 : vector<1x8x32xf32> to vector<8x32xf32>
    %375 = vector.shape_cast %363 : vector<8x32xf32> to vector<1x8x32xf32>
    tpu.vector_store %arg15[%c0_128, %c0_129, %c0_130], %375 {strides = array<i32>} : memref<2x8x32xf32, #tpu.memory_space<vmem>>, vector<1x8x32xf32>,
    %c0_131 = arith.constant 0 : index
    %c0_132 = arith.constant 0 : index
    %376 = vector.load %arg6[%c0_131, %c0_132] : memref<32x512xbf16, #tpu.memory_space<vmem>>, vector<32x512xbf16>
    %c0_133 = arith.constant 0 : index
    %c0_134 = arith.constant 0 : index
    %377 = vector.load %arg8[%c0_133, %c0_134] : memref<1x512xf32, #tpu.memory_space<vmem>>, vector<1x512xf32>
    %c0_135 = arith.constant 0 : index
    %c0_136 = arith.constant 0 : index
    %c0_137 = arith.constant 0 : index
    %378 = vector.load %arg13[%c0_135, %c0_136, %c0_137] : memref<8x8x32xf32, #tpu.memory_space<vmem>>, vector<8x8x32xf32>
    %379 = vector.shape_cast %378 : vector<8x8x32xf32> to vector<64x32xf32>
    %380 = arith.truncf %379 : vector<64x32xf32> to vector<64x32xbf16>
    %cst_138 = arith.constant dense<0.000000e+00> : vector<64x512xf32>
    %381 = tpu.matmul %380, %376, %cst_138 {dimension_numbers = #tpu.dot_dimension_numbers<[1], [0], [0], [1], [0, 0, 1, 1], [], []>} : vector<64x32xbf16>, vector<32x512xbf16>, vector<64x512xf32> -> vector<64x512xf32>
    %382 = vector.broadcast %377 : vector<1x512xf32> to vector<64x512xf32>
    %383 = arith.addf %381, %382 : vector<64x512xf32>
    %384 = vector.shape_cast %383 : vector<64x512xf32> to vector<8x8x512xf32>
    %385 = arith.truncf %384 : vector<8x8x512xf32> to vector<8x8x512xbf16>
    %c0_139 = arith.constant 0 : index
    %c0_140 = arith.constant 0 : index
    %c0_141 = arith.constant 0 : index
    %386 = vector.load %arg12[%c0_139, %c0_140, %c0_141] : memref<8x8x512xbf16, #tpu.memory_space<vmem>>, vector<8x8x512xbf16>
    tpu.vector_store %arg12[%c0_139, %c0_140, %c0_141], %385 {strides = array<i32>} : memref<8x8x512xbf16, #tpu.memory_space<vmem>>, vector<8x8x512xbf16>,
    %c0_142 = arith.constant 0 : index
    %c0_143 = arith.constant 0 : index
    %387 = vector.load %arg7[%c0_142, %c0_143] : memref<32x512xf32, #tpu.memory_space<vmem>>, vector<32x512xf32>
    %c1_144 = arith.constant 1 : index
    %c0_145 = arith.constant 0 : index
    %c0_146 = arith.constant 0 : index
    %388 = vector.load %arg14[%c1_144, %c0_145, %c0_146] : memref<2x8x32xf32, #tpu.memory_space<vmem>>, vector<1x8x32xf32>
    %389 = vector.shape_cast %388 : vector<1x8x32xf32> to vector<8x32xf32>
    %c1_147 = arith.constant 1 : index
    %c0_148 = arith.constant 0 : index
    %c0_149 = arith.constant 0 : index
    %390 = vector.load %arg15[%c1_147, %c0_148, %c0_149] : memref<2x8x32xf32, #tpu.memory_space<vmem>>, vector<1x8x32xf32>
    %391 = vector.shape_cast %390 : vector<1x8x32xf32> to vector<8x32xf32>
    %c0_i32_150 = arith.constant 0 : i32
    %392 = arith.index_cast %c0_i32_150 : i32 to index
    %c0_151 = arith.constant 0 : index
    %c0_152 = arith.constant 0 : index
    %393 = vector.load %arg12[%392, %c0_151, %c0_152] : memref<8x8x512xbf16, #tpu.memory_space<vmem>>, vector<1x8x512xbf16>
    %394 = vector.shape_cast %393 : vector<1x8x512xbf16> to vector<8x512xbf16>
    %395 = arith.extf %394 : vector<8x512xbf16> to vector<8x512xf32>
    %cst_153 = arith.constant dense<0.000000e+00> : vector<8x512xf32>
    %396 = tpu.matmul %389, %387, %cst_153 {dimension_numbers = #tpu.dot_dimension_numbers<[1], [0], [0], [1], [0, 0, 1, 1], [], []>} : vector<8x32xf32>, vector<32x512xf32>, vector<8x512xf32> -> vector<8x512xf32>
    %397 = arith.addf %395, %396 : vector<8x512xf32>
    %398 = vector.extract_strided_slice %397 {offsets = [0, 0], sizes = [8, 32], strides = [1, 1]} : vector<8x512xf32> to vector<8x32xf32>
    %399 = arith.negf %398 : vector<8x32xf32>
    %400 = math.exp %399 : vector<8x32xf32>
    %cst_154 = arith.constant 1.000000e+00 : f32
    %401 = vector.broadcast %cst_154 : f32 to vector<8x32xf32>
    %402 = arith.addf %401, %400 : vector<8x32xf32>
    %403 = arith.divf %401, %402 : vector<8x32xf32>
    %404 = vector.extract_strided_slice %397 {offsets = [0, 128], sizes = [8, 32], strides = [1, 1]} : vector<8x512xf32> to vector<8x32xf32>
    %405 = arith.negf %404 : vector<8x32xf32>
    %406 = math.exp %405 : vector<8x32xf32>
    %cst_155 = arith.constant 1.000000e+00 : f32
    %407 = vector.broadcast %cst_155 : f32 to vector<8x32xf32>
    %408 = arith.addf %407, %406 : vector<8x32xf32>
    %409 = arith.divf %407, %408 : vector<8x32xf32>
    %410 = vector.extract_strided_slice %397 {offsets = [0, 256], sizes = [8, 32], strides = [1, 1]} : vector<8x512xf32> to vector<8x32xf32>
    %411 = math.tanh %410 : vector<8x32xf32>
    %412 = vector.extract_strided_slice %397 {offsets = [0, 384], sizes = [8, 32], strides = [1, 1]} : vector<8x512xf32> to vector<8x32xf32>
    %413 = arith.negf %412 : vector<8x32xf32>
    %414 = math.exp %413 : vector<8x32xf32>
    %cst_156 = arith.constant 1.000000e+00 : f32
    %415 = vector.broadcast %cst_156 : f32 to vector<8x32xf32>
    %416 = arith.addf %415, %414 : vector<8x32xf32>
    %417 = arith.divf %415, %416 : vector<8x32xf32>
    %418 = arith.mulf %409, %391 : vector<8x32xf32>
    %419 = arith.mulf %403, %411 : vector<8x32xf32>
    %420 = arith.addf %418, %419 : vector<8x32xf32>
    %421 = math.tanh %420 : vector<8x32xf32>
    %422 = arith.mulf %417, %421 : vector<8x32xf32>
    %c1_i32_157 = arith.constant 1 : i32
    %423 = arith.index_cast %c1_i32_157 : i32 to index
    %c0_158 = arith.constant 0 : index
    %c0_159 = arith.constant 0 : index
    %424 = vector.load %arg12[%423, %c0_158, %c0_159] : memref<8x8x512xbf16, #tpu.memory_space<vmem>>, vector<1x8x512xbf16>
    %425 = vector.shape_cast %424 : vector<1x8x512xbf16> to vector<8x512xbf16>
    %426 = arith.extf %425 : vector<8x512xbf16> to vector<8x512xf32>
    %cst_160 = arith.constant dense<0.000000e+00> : vector<8x512xf32>
    %427 = tpu.matmul %422, %387, %cst_160 {dimension_numbers = #tpu.dot_dimension_numbers<[1], [0], [0], [1], [0, 0, 1, 1], [], []>} : vector<8x32xf32>, vector<32x512xf32>, vector<8x512xf32> -> vector<8x512xf32>
    %428 = arith.addf %426, %427 : vector<8x512xf32>
    %429 = vector.extract_strided_slice %428 {offsets = [0, 0], sizes = [8, 32], strides = [1, 1]} : vector<8x512xf32> to vector<8x32xf32>
    %430 = arith.negf %429 : vector<8x32xf32>
    %431 = math.exp %430 : vector<8x32xf32>
    %cst_161 = arith.constant 1.000000e+00 : f32
    %432 = vector.broadcast %cst_161 : f32 to vector<8x32xf32>
    %433 = arith.addf %432, %431 : vector<8x32xf32>
    %434 = arith.divf %432, %433 : vector<8x32xf32>
    %435 = vector.extract_strided_slice %428 {offsets = [0, 128], sizes = [8, 32], strides = [1, 1]} : vector<8x512xf32> to vector<8x32xf32>
    %436 = arith.negf %435 : vector<8x32xf32>
    %437 = math.exp %436 : vector<8x32xf32>
    %cst_162 = arith.constant 1.000000e+00 : f32
    %438 = vector.broadcast %cst_162 : f32 to vector<8x32xf32>
    %439 = arith.addf %438, %437 : vector<8x32xf32>
    %440 = arith.divf %438, %439 : vector<8x32xf32>
    %441 = vector.extract_strided_slice %428 {offsets = [0, 256], sizes = [8, 32], strides = [1, 1]} : vector<8x512xf32> to vector<8x32xf32>
    %442 = math.tanh %441 : vector<8x32xf32>
    %443 = vector.extract_strided_slice %428 {offsets = [0, 384], sizes = [8, 32], strides = [1, 1]} : vector<8x512xf32> to vector<8x32xf32>
    %444 = arith.negf %443 : vector<8x32xf32>
    %445 = math.exp %444 : vector<8x32xf32>
    %cst_163 = arith.constant 1.000000e+00 : f32
    %446 = vector.broadcast %cst_163 : f32 to vector<8x32xf32>
    %447 = arith.addf %446, %445 : vector<8x32xf32>
    %448 = arith.divf %446, %447 : vector<8x32xf32>
    %449 = arith.mulf %440, %420 : vector<8x32xf32>
    %450 = arith.mulf %434, %442 : vector<8x32xf32>
    %451 = arith.addf %449, %450 : vector<8x32xf32>
    %452 = math.tanh %451 : vector<8x32xf32>
    %453 = arith.mulf %448, %452 : vector<8x32xf32>
    %c2_i32_164 = arith.constant 2 : i32
    %454 = arith.index_cast %c2_i32_164 : i32 to index
    %c0_165 = arith.constant 0 : index
    %c0_166 = arith.constant 0 : index
    %455 = vector.load %arg12[%454, %c0_165, %c0_166] : memref<8x8x512xbf16, #tpu.memory_space<vmem>>, vector<1x8x512xbf16>
    %456 = vector.shape_cast %455 : vector<1x8x512xbf16> to vector<8x512xbf16>
    %457 = arith.extf %456 : vector<8x512xbf16> to vector<8x512xf32>
    %cst_167 = arith.constant dense<0.000000e+00> : vector<8x512xf32>
    %458 = tpu.matmul %453, %387, %cst_167 {dimension_numbers = #tpu.dot_dimension_numbers<[1], [0], [0], [1], [0, 0, 1, 1], [], []>} : vector<8x32xf32>, vector<32x512xf32>, vector<8x512xf32> -> vector<8x512xf32>
    %459 = arith.addf %457, %458 : vector<8x512xf32>
    %460 = vector.extract_strided_slice %459 {offsets = [0, 0], sizes = [8, 32], strides = [1, 1]} : vector<8x512xf32> to vector<8x32xf32>
    %461 = arith.negf %460 : vector<8x32xf32>
    %462 = math.exp %461 : vector<8x32xf32>
    %cst_168 = arith.constant 1.000000e+00 : f32
    %463 = vector.broadcast %cst_168 : f32 to vector<8x32xf32>
    %464 = arith.addf %463, %462 : vector<8x32xf32>
    %465 = arith.divf %463, %464 : vector<8x32xf32>
    %466 = vector.extract_strided_slice %459 {offsets = [0, 128], sizes = [8, 32], strides = [1, 1]} : vector<8x512xf32> to vector<8x32xf32>
    %467 = arith.negf %466 : vector<8x32xf32>
    %468 = math.exp %467 : vector<8x32xf32>
    %cst_169 = arith.constant 1.000000e+00 : f32
    %469 = vector.broadcast %cst_169 : f32 to vector<8x32xf32>
    %470 = arith.addf %469, %468 : vector<8x32xf32>
    %471 = arith.divf %469, %470 : vector<8x32xf32>
    %472 = vector.extract_strided_slice %459 {offsets = [0, 256], sizes = [8, 32], strides = [1, 1]} : vector<8x512xf32> to vector<8x32xf32>
    %473 = math.tanh %472 : vector<8x32xf32>
    %474 = vector.extract_strided_slice %459 {offsets = [0, 384], sizes = [8, 32], strides = [1, 1]} : vector<8x512xf32> to vector<8x32xf32>
    %475 = arith.negf %474 : vector<8x32xf32>
    %476 = math.exp %475 : vector<8x32xf32>
    %cst_170 = arith.constant 1.000000e+00 : f32
    %477 = vector.broadcast %cst_170 : f32 to vector<8x32xf32>
    %478 = arith.addf %477, %476 : vector<8x32xf32>
    %479 = arith.divf %477, %478 : vector<8x32xf32>
    %480 = arith.mulf %471, %451 : vector<8x32xf32>
    %481 = arith.mulf %465, %473 : vector<8x32xf32>
    %482 = arith.addf %480, %481 : vector<8x32xf32>
    %483 = math.tanh %482 : vector<8x32xf32>
    %484 = arith.mulf %479, %483 : vector<8x32xf32>
    %c3_i32_171 = arith.constant 3 : i32
    %485 = arith.index_cast %c3_i32_171 : i32 to index
    %c0_172 = arith.constant 0 : index
    %c0_173 = arith.constant 0 : index
    %486 = vector.load %arg12[%485, %c0_172, %c0_173] : memref<8x8x512xbf16, #tpu.memory_space<vmem>>, vector<1x8x512xbf16>
    %487 = vector.shape_cast %486 : vector<1x8x512xbf16> to vector<8x512xbf16>
    %488 = arith.extf %487 : vector<8x512xbf16> to vector<8x512xf32>
    %cst_174 = arith.constant dense<0.000000e+00> : vector<8x512xf32>
    %489 = tpu.matmul %484, %387, %cst_174 {dimension_numbers = #tpu.dot_dimension_numbers<[1], [0], [0], [1], [0, 0, 1, 1], [], []>} : vector<8x32xf32>, vector<32x512xf32>, vector<8x512xf32> -> vector<8x512xf32>
    %490 = arith.addf %488, %489 : vector<8x512xf32>
    %491 = vector.extract_strided_slice %490 {offsets = [0, 0], sizes = [8, 32], strides = [1, 1]} : vector<8x512xf32> to vector<8x32xf32>
    %492 = arith.negf %491 : vector<8x32xf32>
    %493 = math.exp %492 : vector<8x32xf32>
    %cst_175 = arith.constant 1.000000e+00 : f32
    %494 = vector.broadcast %cst_175 : f32 to vector<8x32xf32>
    %495 = arith.addf %494, %493 : vector<8x32xf32>
    %496 = arith.divf %494, %495 : vector<8x32xf32>
    %497 = vector.extract_strided_slice %490 {offsets = [0, 128], sizes = [8, 32], strides = [1, 1]} : vector<8x512xf32> to vector<8x32xf32>
    %498 = arith.negf %497 : vector<8x32xf32>
    %499 = math.exp %498 : vector<8x32xf32>
    %cst_176 = arith.constant 1.000000e+00 : f32
    %500 = vector.broadcast %cst_176 : f32 to vector<8x32xf32>
    %501 = arith.addf %500, %499 : vector<8x32xf32>
    %502 = arith.divf %500, %501 : vector<8x32xf32>
    %503 = vector.extract_strided_slice %490 {offsets = [0, 256], sizes = [8, 32], strides = [1, 1]} : vector<8x512xf32> to vector<8x32xf32>
    %504 = math.tanh %503 : vector<8x32xf32>
    %505 = vector.extract_strided_slice %490 {offsets = [0, 384], sizes = [8, 32], strides = [1, 1]} : vector<8x512xf32> to vector<8x32xf32>
    %506 = arith.negf %505 : vector<8x32xf32>
    %507 = math.exp %506 : vector<8x32xf32>
    %cst_177 = arith.constant 1.000000e+00 : f32
    %508 = vector.broadcast %cst_177 : f32 to vector<8x32xf32>
    %509 = arith.addf %508, %507 : vector<8x32xf32>
    %510 = arith.divf %508, %509 : vector<8x32xf32>
    %511 = arith.mulf %502, %482 : vector<8x32xf32>
    %512 = arith.mulf %496, %504 : vector<8x32xf32>
    %513 = arith.addf %511, %512 : vector<8x32xf32>
    %514 = math.tanh %513 : vector<8x32xf32>
    %515 = arith.mulf %510, %514 : vector<8x32xf32>
    %c4_i32_178 = arith.constant 4 : i32
    %516 = arith.index_cast %c4_i32_178 : i32 to index
    %c0_179 = arith.constant 0 : index
    %c0_180 = arith.constant 0 : index
    %517 = vector.load %arg12[%516, %c0_179, %c0_180] : memref<8x8x512xbf16, #tpu.memory_space<vmem>>, vector<1x8x512xbf16>
    %518 = vector.shape_cast %517 : vector<1x8x512xbf16> to vector<8x512xbf16>
    %519 = arith.extf %518 : vector<8x512xbf16> to vector<8x512xf32>
    %cst_181 = arith.constant dense<0.000000e+00> : vector<8x512xf32>
    %520 = tpu.matmul %515, %387, %cst_181 {dimension_numbers = #tpu.dot_dimension_numbers<[1], [0], [0], [1], [0, 0, 1, 1], [], []>} : vector<8x32xf32>, vector<32x512xf32>, vector<8x512xf32> -> vector<8x512xf32>
    %521 = arith.addf %519, %520 : vector<8x512xf32>
    %522 = vector.extract_strided_slice %521 {offsets = [0, 0], sizes = [8, 32], strides = [1, 1]} : vector<8x512xf32> to vector<8x32xf32>
    %523 = arith.negf %522 : vector<8x32xf32>
    %524 = math.exp %523 : vector<8x32xf32>
    %cst_182 = arith.constant 1.000000e+00 : f32
    %525 = vector.broadcast %cst_182 : f32 to vector<8x32xf32>
    %526 = arith.addf %525, %524 : vector<8x32xf32>
    %527 = arith.divf %525, %526 : vector<8x32xf32>
    %528 = vector.extract_strided_slice %521 {offsets = [0, 128], sizes = [8, 32], strides = [1, 1]} : vector<8x512xf32> to vector<8x32xf32>
    %529 = arith.negf %528 : vector<8x32xf32>
    %530 = math.exp %529 : vector<8x32xf32>
    %cst_183 = arith.constant 1.000000e+00 : f32
    %531 = vector.broadcast %cst_183 : f32 to vector<8x32xf32>
    %532 = arith.addf %531, %530 : vector<8x32xf32>
    %533 = arith.divf %531, %532 : vector<8x32xf32>
    %534 = vector.extract_strided_slice %521 {offsets = [0, 256], sizes = [8, 32], strides = [1, 1]} : vector<8x512xf32> to vector<8x32xf32>
    %535 = math.tanh %534 : vector<8x32xf32>
    %536 = vector.extract_strided_slice %521 {offsets = [0, 384], sizes = [8, 32], strides = [1, 1]} : vector<8x512xf32> to vector<8x32xf32>
    %537 = arith.negf %536 : vector<8x32xf32>
    %538 = math.exp %537 : vector<8x32xf32>
    %cst_184 = arith.constant 1.000000e+00 : f32
    %539 = vector.broadcast %cst_184 : f32 to vector<8x32xf32>
    %540 = arith.addf %539, %538 : vector<8x32xf32>
    %541 = arith.divf %539, %540 : vector<8x32xf32>
    %542 = arith.mulf %533, %513 : vector<8x32xf32>
    %543 = arith.mulf %527, %535 : vector<8x32xf32>
    %544 = arith.addf %542, %543 : vector<8x32xf32>
    %545 = math.tanh %544 : vector<8x32xf32>
    %546 = arith.mulf %541, %545 : vector<8x32xf32>
    %c5_i32_185 = arith.constant 5 : i32
    %547 = arith.index_cast %c5_i32_185 : i32 to index
    %c0_186 = arith.constant 0 : index
    %c0_187 = arith.constant 0 : index
    %548 = vector.load %arg12[%547, %c0_186, %c0_187] : memref<8x8x512xbf16, #tpu.memory_space<vmem>>, vector<1x8x512xbf16>
    %549 = vector.shape_cast %548 : vector<1x8x512xbf16> to vector<8x512xbf16>
    %550 = arith.extf %549 : vector<8x512xbf16> to vector<8x512xf32>
    %cst_188 = arith.constant dense<0.000000e+00> : vector<8x512xf32>
    %551 = tpu.matmul %546, %387, %cst_188 {dimension_numbers = #tpu.dot_dimension_numbers<[1], [0], [0], [1], [0, 0, 1, 1], [], []>} : vector<8x32xf32>, vector<32x512xf32>, vector<8x512xf32> -> vector<8x512xf32>
    %552 = arith.addf %550, %551 : vector<8x512xf32>
    %553 = vector.extract_strided_slice %552 {offsets = [0, 0], sizes = [8, 32], strides = [1, 1]} : vector<8x512xf32> to vector<8x32xf32>
    %554 = arith.negf %553 : vector<8x32xf32>
    %555 = math.exp %554 : vector<8x32xf32>
    %cst_189 = arith.constant 1.000000e+00 : f32
    %556 = vector.broadcast %cst_189 : f32 to vector<8x32xf32>
    %557 = arith.addf %556, %555 : vector<8x32xf32>
    %558 = arith.divf %556, %557 : vector<8x32xf32>
    %559 = vector.extract_strided_slice %552 {offsets = [0, 128], sizes = [8, 32], strides = [1, 1]} : vector<8x512xf32> to vector<8x32xf32>
    %560 = arith.negf %559 : vector<8x32xf32>
    %561 = math.exp %560 : vector<8x32xf32>
    %cst_190 = arith.constant 1.000000e+00 : f32
    %562 = vector.broadcast %cst_190 : f32 to vector<8x32xf32>
    %563 = arith.addf %562, %561 : vector<8x32xf32>
    %564 = arith.divf %562, %563 : vector<8x32xf32>
    %565 = vector.extract_strided_slice %552 {offsets = [0, 256], sizes = [8, 32], strides = [1, 1]} : vector<8x512xf32> to vector<8x32xf32>
    %566 = math.tanh %565 : vector<8x32xf32>
    %567 = vector.extract_strided_slice %552 {offsets = [0, 384], sizes = [8, 32], strides = [1, 1]} : vector<8x512xf32> to vector<8x32xf32>
    %568 = arith.negf %567 : vector<8x32xf32>
    %569 = math.exp %568 : vector<8x32xf32>
    %cst_191 = arith.constant 1.000000e+00 : f32
    %570 = vector.broadcast %cst_191 : f32 to vector<8x32xf32>
    %571 = arith.addf %570, %569 : vector<8x32xf32>
    %572 = arith.divf %570, %571 : vector<8x32xf32>
    %573 = arith.mulf %564, %544 : vector<8x32xf32>
    %574 = arith.mulf %558, %566 : vector<8x32xf32>
    %575 = arith.addf %573, %574 : vector<8x32xf32>
    %576 = math.tanh %575 : vector<8x32xf32>
    %577 = arith.mulf %572, %576 : vector<8x32xf32>
    %c6_i32_192 = arith.constant 6 : i32
    %578 = arith.index_cast %c6_i32_192 : i32 to index
    %c0_193 = arith.constant 0 : index
    %c0_194 = arith.constant 0 : index
    %579 = vector.load %arg12[%578, %c0_193, %c0_194] : memref<8x8x512xbf16, #tpu.memory_space<vmem>>, vector<1x8x512xbf16>
    %580 = vector.shape_cast %579 : vector<1x8x512xbf16> to vector<8x512xbf16>
    %581 = arith.extf %580 : vector<8x512xbf16> to vector<8x512xf32>
    %cst_195 = arith.constant dense<0.000000e+00> : vector<8x512xf32>
    %582 = tpu.matmul %577, %387, %cst_195 {dimension_numbers = #tpu.dot_dimension_numbers<[1], [0], [0], [1], [0, 0, 1, 1], [], []>} : vector<8x32xf32>, vector<32x512xf32>, vector<8x512xf32> -> vector<8x512xf32>
    %583 = arith.addf %581, %582 : vector<8x512xf32>
    %584 = vector.extract_strided_slice %583 {offsets = [0, 0], sizes = [8, 32], strides = [1, 1]} : vector<8x512xf32> to vector<8x32xf32>
    %585 = arith.negf %584 : vector<8x32xf32>
    %586 = math.exp %585 : vector<8x32xf32>
    %cst_196 = arith.constant 1.000000e+00 : f32
    %587 = vector.broadcast %cst_196 : f32 to vector<8x32xf32>
    %588 = arith.addf %587, %586 : vector<8x32xf32>
    %589 = arith.divf %587, %588 : vector<8x32xf32>
    %590 = vector.extract_strided_slice %583 {offsets = [0, 128], sizes = [8, 32], strides = [1, 1]} : vector<8x512xf32> to vector<8x32xf32>
    %591 = arith.negf %590 : vector<8x32xf32>
    %592 = math.exp %591 : vector<8x32xf32>
    %cst_197 = arith.constant 1.000000e+00 : f32
    %593 = vector.broadcast %cst_197 : f32 to vector<8x32xf32>
    %594 = arith.addf %593, %592 : vector<8x32xf32>
    %595 = arith.divf %593, %594 : vector<8x32xf32>
    %596 = vector.extract_strided_slice %583 {offsets = [0, 256], sizes = [8, 32], strides = [1, 1]} : vector<8x512xf32> to vector<8x32xf32>
    %597 = math.tanh %596 : vector<8x32xf32>
    %598 = vector.extract_strided_slice %583 {offsets = [0, 384], sizes = [8, 32], strides = [1, 1]} : vector<8x512xf32> to vector<8x32xf32>
    %599 = arith.negf %598 : vector<8x32xf32>
    %600 = math.exp %599 : vector<8x32xf32>
    %cst_198 = arith.constant 1.000000e+00 : f32
    %601 = vector.broadcast %cst_198 : f32 to vector<8x32xf32>
    %602 = arith.addf %601, %600 : vector<8x32xf32>
    %603 = arith.divf %601, %602 : vector<8x32xf32>
    %604 = arith.mulf %595, %575 : vector<8x32xf32>
    %605 = arith.mulf %589, %597 : vector<8x32xf32>
    %606 = arith.addf %604, %605 : vector<8x32xf32>
    %607 = math.tanh %606 : vector<8x32xf32>
    %608 = arith.mulf %603, %607 : vector<8x32xf32>
    %c7_i32_199 = arith.constant 7 : i32
    %609 = arith.index_cast %c7_i32_199 : i32 to index
    %c0_200 = arith.constant 0 : index
    %c0_201 = arith.constant 0 : index
    %610 = vector.load %arg12[%609, %c0_200, %c0_201] : memref<8x8x512xbf16, #tpu.memory_space<vmem>>, vector<1x8x512xbf16>
    %611 = vector.shape_cast %610 : vector<1x8x512xbf16> to vector<8x512xbf16>
    %612 = arith.extf %611 : vector<8x512xbf16> to vector<8x512xf32>
    %cst_202 = arith.constant dense<0.000000e+00> : vector<8x512xf32>
    %613 = tpu.matmul %608, %387, %cst_202 {dimension_numbers = #tpu.dot_dimension_numbers<[1], [0], [0], [1], [0, 0, 1, 1], [], []>} : vector<8x32xf32>, vector<32x512xf32>, vector<8x512xf32> -> vector<8x512xf32>
    %614 = arith.addf %612, %613 : vector<8x512xf32>
    %615 = vector.extract_strided_slice %614 {offsets = [0, 0], sizes = [8, 32], strides = [1, 1]} : vector<8x512xf32> to vector<8x32xf32>
    %616 = arith.negf %615 : vector<8x32xf32>
    %617 = math.exp %616 : vector<8x32xf32>
    %cst_203 = arith.constant 1.000000e+00 : f32
    %618 = vector.broadcast %cst_203 : f32 to vector<8x32xf32>
    %619 = arith.addf %618, %617 : vector<8x32xf32>
    %620 = arith.divf %618, %619 : vector<8x32xf32>
    %621 = vector.extract_strided_slice %614 {offsets = [0, 128], sizes = [8, 32], strides = [1, 1]} : vector<8x512xf32> to vector<8x32xf32>
    %622 = arith.negf %621 : vector<8x32xf32>
    %623 = math.exp %622 : vector<8x32xf32>
    %cst_204 = arith.constant 1.000000e+00 : f32
    %624 = vector.broadcast %cst_204 : f32 to vector<8x32xf32>
    %625 = arith.addf %624, %623 : vector<8x32xf32>
    %626 = arith.divf %624, %625 : vector<8x32xf32>
    %627 = vector.extract_strided_slice %614 {offsets = [0, 256], sizes = [8, 32], strides = [1, 1]} : vector<8x512xf32> to vector<8x32xf32>
    %628 = math.tanh %627 : vector<8x32xf32>
    %629 = vector.extract_strided_slice %614 {offsets = [0, 384], sizes = [8, 32], strides = [1, 1]} : vector<8x512xf32> to vector<8x32xf32>
    %630 = arith.negf %629 : vector<8x32xf32>
    %631 = math.exp %630 : vector<8x32xf32>
    %cst_205 = arith.constant 1.000000e+00 : f32
    %632 = vector.broadcast %cst_205 : f32 to vector<8x32xf32>
    %633 = arith.addf %632, %631 : vector<8x32xf32>
    %634 = arith.divf %632, %633 : vector<8x32xf32>
    %635 = arith.mulf %626, %606 : vector<8x32xf32>
    %636 = arith.mulf %620, %628 : vector<8x32xf32>
    %637 = arith.addf %635, %636 : vector<8x32xf32>
    %638 = math.tanh %637 : vector<8x32xf32>
    %639 = arith.mulf %634, %638 : vector<8x32xf32>
    %c8_i32_206 = arith.constant 8 : i32
    %c1_207 = arith.constant 1 : index
    %c0_208 = arith.constant 0 : index
    %c0_209 = arith.constant 0 : index
    %640 = vector.load %arg14[%c1_207, %c0_208, %c0_209] : memref<2x8x32xf32, #tpu.memory_space<vmem>>, vector<1x8x32xf32>
    %641 = vector.shape_cast %640 : vector<1x8x32xf32> to vector<8x32xf32>
    %642 = vector.shape_cast %639 : vector<8x32xf32> to vector<1x8x32xf32>
    tpu.vector_store %arg14[%c1_207, %c0_208, %c0_209], %642 {strides = array<i32>} : memref<2x8x32xf32, #tpu.memory_space<vmem>>, vector<1x8x32xf32>,
    %c1_210 = arith.constant 1 : index
    %c0_211 = arith.constant 0 : index
    %c0_212 = arith.constant 0 : index
    %643 = vector.load %arg15[%c1_210, %c0_211, %c0_212] : memref<2x8x32xf32, #tpu.memory_space<vmem>>, vector<1x8x32xf32>
    %644 = vector.shape_cast %643 : vector<1x8x32xf32> to vector<8x32xf32>
    %645 = vector.shape_cast %637 : vector<8x32xf32> to vector<1x8x32xf32>
    tpu.vector_store %arg15[%c1_210, %c0_211, %c0_212], %645 {strides = array<i32>} : memref<2x8x32xf32, #tpu.memory_space<vmem>>, vector<1x8x32xf32>,
    %c0_i32_213 = arith.constant 0 : i32
    %646 = arith.cmpi eq, %arg1, %c0_i32_213 : i32
    %647 = arith.extui %646 : i1 to i32
    %c0_i32_214 = arith.constant 0 : i32
    %648 = arith.cmpi ne, %647, %c0_i32_214 : i32
    scf.if %648 {
      %649 = arith.truncf %639 : vector<8x32xf32> to vector<8x32xbf16>
      %c0_215 = arith.constant 0 : index
      %c0_216 = arith.constant 0 : index
      %650 = vector.load %arg9[%c0_215, %c0_216] : memref<32x128xbf16, #tpu.memory_space<vmem>>, vector<32x128xbf16>
      %cst_217 = arith.constant dense<0.000000e+00> : vector<8x128xf32>
      %651 = tpu.matmul %649, %650, %cst_217 {dimension_numbers = #tpu.dot_dimension_numbers<[1], [0], [0], [1], [0, 0, 1, 1], [], []>} : vector<8x32xbf16>, vector<32x128xbf16>, vector<8x128xf32> -> vector<8x128xf32>
      %c0_218 = arith.constant 0 : index
      %c0_219 = arith.constant 0 : index
      %652 = vector.load %arg10[%c0_218, %c0_219] : memref<1x128xf32, #tpu.memory_space<vmem>>, vector<1x128xf32>
      %653 = vector.broadcast %652 : vector<1x128xf32> to vector<8x128xf32>
      %654 = arith.addf %651, %653 : vector<8x128xf32>
      %c0_220 = arith.constant 0 : index
      %c0_221 = arith.constant 0 : index
      %655 = vector.load %arg11[%c0_220, %c0_221] : memref<8x128xf32, #tpu.memory_space<vmem>>, vector<8x128xf32>
      tpu.vector_store %arg11[%c0_220, %c0_221], %654 {strides = array<i32>} : memref<8x128xf32, #tpu.memory_space<vmem>>, vector<8x128xf32>,
    } else {
    }
    return
  }
  func.func @transform_0(%arg0: i32, %arg1: i32) -> (i32, i32, i32) {
    %c0_i32 = arith.constant 0 : i32
    %c0_i32_0 = arith.constant 0 : i32
    return %arg0, %arg1, %c0_i32 : i32, i32, i32
  }
  func.func @transform_1(%arg0: i32, %arg1: i32) -> (i32, i32) {
    %c0_i32 = arith.constant 0 : i32
    %c0_i32_0 = arith.constant 0 : i32
    %c0_i32_1 = arith.constant 0 : i32
    return %c0_i32, %c0_i32_0 : i32, i32
  }
  func.func @transform_2(%arg0: i32, %arg1: i32) -> (i32, i32) {
    %c0_i32 = arith.constant 0 : i32
    %c0_i32_0 = arith.constant 0 : i32
    %c0_i32_1 = arith.constant 0 : i32
    return %c0_i32, %c0_i32_0 : i32, i32
  }
  func.func @transform_3(%arg0: i32, %arg1: i32) -> (i32, i32) {
    %c0_i32 = arith.constant 0 : i32
    %c0_i32_0 = arith.constant 0 : i32
    %c0_i32_1 = arith.constant 0 : i32
    return %c0_i32, %c0_i32_0 : i32, i32
  }
  func.func @transform_4(%arg0: i32, %arg1: i32) -> (i32, i32) {
    %c0_i32 = arith.constant 0 : i32
    %c0_i32_0 = arith.constant 0 : i32
    %c0_i32_1 = arith.constant 0 : i32
    return %c0_i32, %c0_i32_0 : i32, i32
  }
  func.func @transform_5(%arg0: i32, %arg1: i32) -> (i32, i32) {
    %c0_i32 = arith.constant 0 : i32
    %c0_i32_0 = arith.constant 0 : i32
    %c0_i32_1 = arith.constant 0 : i32
    return %c0_i32, %c0_i32_0 : i32, i32
  }
  func.func @transform_6(%arg0: i32, %arg1: i32) -> (i32, i32) {
    %c0_i32 = arith.constant 0 : i32
    %c0_i32_0 = arith.constant 0 : i32
    %c0_i32_1 = arith.constant 0 : i32
    return %c0_i32, %c0_i32_0 : i32, i32
  }
  func.func @transform_7(%arg0: i32, %arg1: i32) -> (i32, i32) {
    %c0_i32 = arith.constant 0 : i32
    %c0_i32_0 = arith.constant 0 : i32
    %c0_i32_1 = arith.constant 0 : i32
    return %c0_i32, %c0_i32_0 : i32, i32
  }
  func.func @transform_8(%arg0: i32, %arg1: i32) -> (i32, i32) {
    %c0_i32 = arith.constant 0 : i32
    %c0_i32_0 = arith.constant 0 : i32
    %c0_i32_1 = arith.constant 0 : i32
    return %c0_i32, %c0_i32_0 : i32, i32
  }
  func.func @transform_9(%arg0: i32, %arg1: i32) -> (i32, i32) {
    %c0_i32 = arith.constant 0 : i32
    %c0_i32_0 = arith.constant 0 : i32
    return %arg0, %c0_i32 : i32, i32
  }
}

</mosaic_0001>

<bundles_post_ra>
// kernel: tpu_custom_call.1
= control target key start
LH: loop header
LB: loop body
LE: loop exit
PB: predicated region body
PF: predicated region fallthrough
CT: control target
= control target key end

     0   :  { %14 = vsyncpa [#allocation7], 0  ;;  %s6447_s0 = inlined_call_operand.vmem [shape: f32[8,8,4], index: 0, kind: input, shape index: {}]   ;;  %s6448_s1 = inlined_call_operand.vmem [shape: bf16[4,512], index: 1, kind: input, shape index: {}]   ;;  %s6449_s2 = inlined_call_operand.hbm [shape: f32[32,512], index: 2, kind: input, shape index: {}]   ;;  %s6450_s3 = inlined_call_operand.vmem [shape: f32[1,512], index: 3, kind: input, shape index: {}]   ;;  %s6451_s4 = inlined_call_operand.vmem [shape: bf16[32,512], index: 4, kind: input, shape index: {}]   ;;  %s6452_s5 = inlined_call_operand.hbm [shape: f32[32,512], index: 5, kind: input, shape index: {}]   ;;  %s6453_s6 = inlined_call_operand.vmem [shape: f32[1,512], index: 6, kind: input, shape index: {}]   ;;  %s6454_s7 = inlined_call_operand.vmem [shape: bf16[32,128], index: 7, kind: input, shape index: {}]   ;;  %s6455_s8 = inlined_call_operand.vmem [shape: f32[1,128], index: 8, kind: input, shape index: {}]   ;;  %s6456_s9 = inlined_call_operand.hbm [shape: f32[8,128], index: 9, kind: output, shape index: {}]  }
   0x1   :  { %15 = vsyncpa [#allocation10], 0 }
   0x2   :  { %16 = vsyncpa [#allocation8], 0  ;;  %s5301_s30 = smov [#allocation6]  }
   0x3   :  { %s26_s10 = sshll.u32 %s5301_s30, 4  ;;  %s27_s10 = int_to_ptr.vmem [resolvable:$true] %s26_s10 }
   0x4   :  { %s5243_s11 = scalar_lea.vmem %s27_s10, 2048  ;;  %p5248_p1 = scmp.lt.s32.totalorder %s27_s10, %s27_s10 }
   0x5   :  { %p5244_p0 = scmp.ne.s32.totalorder %s27_s10, %s5243_s11  ;;  %p5249_p2 = scmp.lt.s32.totalorder %s5243_s11, %s5243_s11 }
   0x7   :  { %p5250_p3 = por %p5249_p2, %p5248_p1 }
   0x9   :  { %p5251_p4 = pnand %p5250_p3, %p5244_p0 }
   0xb   :  { %5254 = shalt.err (!%p5251_p4)
}
   0xc   :  { %s5302_s12 = smov 512   ;;  %s5303_s13 = smov 32  }
   0xd   :  { %32 = dma.hbm_to_vmem [thread:$0]  %s6449_s2, 2048, %s27_s10, [#allocation7], %s5302_s12, %s5302_s12, %s5303_s13  }
   0xe   :  { %s5304_s16 = smov [#allocation9]  }
   0xf   :  { %s42_s17 = sshll.u32 %s5304_s16, 4  ;;  %s43_s17 = int_to_ptr.vmem [resolvable:$true] %s42_s17 }
  0x10   :  { %s5263_s18 = scalar_lea.vmem %s43_s17, 2048  ;;  %p5268_p6 = scmp.lt.s32.totalorder %s43_s17, %s43_s17 }
  0x11   :  { %p5264_p5 = scmp.ne.s32.totalorder %s43_s17, %s5263_s18  ;;  %p5269_p7 = scmp.lt.s32.totalorder %s5263_s18, %s5263_s18 }
  0x13   :  { %p5270_p8 = por %p5269_p7, %p5268_p6 }
  0x15   :  { %p5271_p9 = pnand %p5270_p8, %p5264_p5 }
  0x17   :  { %5274 = shalt.err (!%p5271_p9)
}
  0x18   :  { %48 = dma.hbm_to_vmem [thread:$0]  %s6452_s5, 2048, %s43_s17, [#allocation10], %s5302_s12, %s5302_s12, %s5303_s13  }
  0x19   :  { %5295 = dma.done.wait [#allocation7], 2048  }
  0x1a   :  { %5296 = vsyncadd [#allocation7], 4294965248 }
  0x1b   :  { %5297 = dma.done.wait [#allocation10], 2048  }
  0x1c   :  { %5298 = vsyncadd [#allocation10], 4294965248  ;;  %v90_v0 = vlaneseq  ;;  %v5305_v1 = vmov 1983009808   ;;  %v5306_v3 = vmov 0   ;;  %vm66_vm0 = vcmask 261120  }
  0x1d   :  { %v151_v2 = vunpack.c.l.s4 %v5305_v1  ;;  %215 = vmatprep.mubr.bf16.mxu1 %v5306_v3  ;;  %365 = vmatprep.mubr.bf16.mxu0 %v5306_v3  ;;  %v5307_v7 = vmov 0.0   ;;  %vm170_vm1 = vcmask 1041408   ;;  %vm127_vm2 = vcmask 1041409   ;;  %v5384_v8 = vld [vmem:[%s6448_s1] sm:$0xff]  ;;  %v74_v10 = vld [vmem:[%s6447_s0 + $0x8] sm:$0x1] }
  0x1e   :  { %v5368_v4 = vshrl.u32 %v90_v0, 7  ;;  %67 = vst.msk [vmem:[#allocation4] sm:$0xff] %vm66_vm0, %v5307_v7  ;;  %68 = vst.msk [vmem:[#allocation4 + $0x8] sm:$0xff] %vm66_vm0, %v5307_v7  ;;  %vm130_vm3 = vcmask 1042434   ;;  %vm133_vm4 = vcmask 1043459   ;;  %vm136_vm5 = vcmask 1044484  }
  0x1f   :  { %v152_v5 = vunpack.c.0.s8 %v151_v2  ;;  %69 = vst.msk [vmem:[#allocation5] sm:$0xff] %vm66_vm0, %v5307_v7  ;;  %70 = vst.msk [vmem:[#allocation5 + $0x8] sm:$0xff] %vm66_vm0, %v5307_v7  ;;  %v73_v9 = vld [vmem:[%s6447_s0] sm:$0x1]  ;;  %v75_v12 = vld [vmem:[%s6447_s0 + $0x10] sm:$0x1]  ;;  %v82_v16 = vpack.c.bf16 %v74_v10, %v74_v10  ;;  %v149_v23 = vcombine.high %v5384_v8, %v5384_v8 }
  0x20   :  { %v76_v13 = vld [vmem:[%s6447_s0 + $0x18] sm:$0x1]  ;;  %v77_v14 = vld [vmem:[%s6447_s0 + $0x20] sm:$0x1]  ;;  %v81_v15 = vpack.c.bf16 %v73_v9, %v73_v9  ;;  %vm139_vm6 = vcmask 1045509   ;;  %v83_v20 = vpack.c.bf16 %v75_v12, %v75_v12  ;;  %vm142_vm7 = vcmask 1046534  }
  0x21   :  { %v5371_v6 = vsub.s32 %v152_v5, %v5368_v4  ;;  %v78_v17 = vld [vmem:[%s6447_s0 + $0x28] sm:$0x1]  ;;  %v79_v18 = vld [vmem:[%s6447_s0 + $0x30] sm:$0x1]  ;;  %v80_v19 = vld [vmem:[%s6447_s0 + $0x38] sm:$0x1]  ;;  %v84_v21 = vpack.c.bf16 %v76_v13, %v76_v13  ;;  %v85_v22 = vpack.c.bf16 %v77_v14, %v77_v14  ;;  %v119_v31 = vunpack.c.l.b16 %v82_v16 }
  0x22   :  { %v86_v26 = vpack.c.bf16 %v78_v17, %v78_v17  ;;  %v87_v27 = vpack.c.bf16 %v79_v18, %v79_v18  ;;  %vm145_vm8 = vcmask 1047559   ;;  %v283_v28 = vld [vmem:[%s6447_s0 + $0x1] sm:$0x1]  ;;  %v88_v29 = vpack.c.bf16 %v80_v19, %v80_v19  ;;  %v284_v33 = vld [vmem:[%s6447_s0 + $0x9] sm:$0x1]  ;;  %s5309_s26 = smov [#allocation11]  }
  0x23   :  { %v156_v11 = vrot.slane %v5384_v8, %v5371_v6  ;;  %v118_v30 = vunpack.c.l.b16 %v81_v15  ;;  %v120_v32 = vunpack.c.l.b16 %v83_v20  ;;  %v121_v34 = vunpack.c.l.b16 %v84_v21  ;;  %v285_v38 = vld [vmem:[%s6447_s0 + $0x11] sm:$0x1]  ;;  %v286_v39 = vld [vmem:[%s6447_s0 + $0x19] sm:$0x1]  ;;  %v287_v40 = vld [vmem:[%s6447_s0 + $0x21] sm:$0x1] }
  0x24   :  { %v122_v35 = vunpack.c.l.b16 %v85_v22  ;;  %v123_v36 = vunpack.c.l.b16 %v86_v26  ;;  %v124_v37 = vunpack.c.l.b16 %v87_v27  ;;  %v125_v41 = vunpack.c.l.b16 %v88_v29  ;;  %v288_v44 = vld [vmem:[%s6447_s0 + $0x29] sm:$0x1]  ;;  %v289_v45 = vld [vmem:[%s6447_s0 + $0x31] sm:$0x1]  ;;  %v290_v51 = vld [vmem:[%s6447_s0 + $0x39] sm:$0x1] }
  0x25   :  { %v5414_v24 = vcombine.high %v156_v11, %v156_v11  ;;  %v5417_v25 = vsel %vm170_vm1, %v156_v11, 0  ;;  %v126_v42 = vrot.slane %v119_v31, 7  ;;  %v129_v43 = vrot.slane %v120_v32, 6  ;;  %v434_v13 = vld [vmem:[%s6447_s0 + $0x2] sm:$0x1]  ;;  %s4723_s27 = sshll.u32 %s5309_s26, 4  ;;  %s4724_s27 = int_to_ptr.vmem [resolvable:$true] %s4723_s27 }
  0x26   :  { %vm166_vm9 = vcmask 31744   ;;  %v291_v46 = vpack.c.bf16 %v283_v28, %v283_v28  ;;  %v132_v47 = vrot.slane %v121_v34, 5  ;;  %v135_v48 = vrot.slane %v122_v35, 4  ;;  %v435_v14 = vld [vmem:[%s6447_s0 + $0xa] sm:$0x1]  ;;  %s5275_s28 = scalar_lea.vmem %s4724_s27, 128  ;;  %p5280_p11 = scmp.lt.s32.totalorder %s4724_s27, %s4724_s27 }
  0x27   :  { %4739 = vmatprep.subr.msk.bf16.mxu0 %vm170_vm1, %v5414_v24  ;;  %4733 = vmatprep.subr.msk.bf16.mxu1 %vm170_vm1, %v5414_v24  ;;  %v138_v49 = vrot.slane %v123_v36, 3  ;;  %v141_v50 = vrot.slane %v124_v37, 2  ;;  %v128_v52 = vsel %vm127_vm2, %v126_v42, %v118_v30  ;;  %v144_v53 = vrot.slane %v125_v41, 1  ;;  %v436_v19 = vld [vmem:[%s6447_s0 + $0x12] sm:$0x1]  ;;  %p5276_p10 = scmp.ne.s32.totalorder %s4724_s27, %s5275_s28  ;;  %p5281_p12 = scmp.lt.s32.totalorder %s5275_s28, %s5275_s28 }
  0x28   :  { %348 = vmatpush1.bf16.msra.mxu0 %v5417_v25  ;;  %198 = vmatpush1.bf16.msra.mxu1 %v5417_v25  ;;  %v292_v54 = vpack.c.bf16 %v284_v33, %v284_v33  ;;  %v293_v55 = vpack.c.bf16 %v285_v38, %v285_v38  ;;  %v131_v56 = vsel %vm130_vm3, %v129_v43, %v128_v52  ;;  %v307_v63 = vunpack.c.l.b16 %v291_v46  ;;  %v437_v20 = vld [vmem:[%s6447_s0 + $0x1a] sm:$0x1]  ;;  %v438_v28 = vld [vmem:[%s6447_s0 + $0x22] sm:$0x1]  ;;  %v439_v33 = vld [vmem:[%s6447_s0 + $0x2a] sm:$0x1] }
  0x29   :  { %4745 = vmatprep.subr.msk.bf16.mxu0 %vm170_vm1, %v5414_v24  ;;  %v294_v57 = vpack.c.bf16 %v286_v39, %v286_v39  ;;  %v295_v58 = vpack.c.bf16 %v287_v40, %v287_v40  ;;  %v296_v59 = vpack.c.bf16 %v288_v44, %v288_v44  ;;  %v134_v60 = vsel %vm133_vm4, %v132_v47, %v131_v56  ;;  %v440_v36 = vld [vmem:[%s6447_s0 + $0x32] sm:$0x1]  ;;  %v441_v37 = vld [vmem:[%s6447_s0 + $0x3a] sm:$0x1]  ;;  %p5282_p13 = por %p5281_p12, %p5280_p11 }
  0x2a   :  { %v297_v61 = vpack.c.bf16 %v289_v45, %v289_v45  ;;  %v298_v62 = vpack.c.bf16 %v290_v51, %v290_v51  ;;  %v137_v0 = vsel %vm136_vm5, %v135_v48, %v134_v60  ;;  %v308_v1 = vunpack.c.l.b16 %v292_v54 }
  0x2b   :  { %v309_v2 = vunpack.c.l.b16 %v293_v55  ;;  %v310_v5 = vunpack.c.l.b16 %v294_v57  ;;  %v140_v9 = vsel %vm139_vm6, %v138_v49, %v137_v0  ;;  %v311_v10 = vunpack.c.l.b16 %v295_v58  ;;  %v585_v57 = vld [vmem:[%s6447_s0 + $0x3] sm:$0x1]  ;;  %v586_v58 = vld [vmem:[%s6447_s0 + $0xb] sm:$0x1]  ;;  %v588_v0 = vld [vmem:[%s6447_s0 + $0x1b] sm:$0x1]  ;;  %p5283_p0 = pnand %p5282_p13, %p5276_p10 }
  0x2c   :  { %v312_v11 = vunpack.c.l.b16 %v296_v59  ;;  %v313_v12 = vunpack.c.l.b16 %v297_v61  ;;  %v143_v15 = vsel %vm142_vm7, %v141_v50, %v140_v9  ;;  %v314_v16 = vunpack.c.l.b16 %v298_v62  ;;  %v587_v59 = vld [vmem:[%s6447_s0 + $0x13] sm:$0x1] }
  0x2d   :  { %v315_v17 = vrot.slane %v308_v1, 7  ;;  %v317_v18 = vrot.slane %v309_v2, 6  ;;  %v146_v21 = vsel %vm145_vm8, %v144_v53, %v143_v15  ;;  %v319_v22 = vrot.slane %v310_v5, 5  ;;  %v589_v1 = vld [vmem:[%s6447_s0 + $0x23] sm:$0x1] }
  0x2e   :  { %v321_v26 = vrot.slane %v311_v10, 4  ;;  %v323_v27 = vrot.slane %v312_v11, 3  ;;  %v5473_v29 = vpack.c.b16 %v146_v21, %v146_v21  ;;  %v325_v31 = vrot.slane %v313_v12, 2  ;;  %v590_v10 = vld [vmem:[%s6447_s0 + $0x2b] sm:$0x1] }
  0x2f   :  { %v316_v30 = vsel %vm127_vm2, %v315_v17, %v307_v63  ;;  %v327_v32 = vrot.slane %v314_v16, 1  ;;  %v163_v35 = vrot.slane %v149_v23, %v5371_v6  ;;  %v442_v38 = vpack.c.bf16 %v434_v13, %v434_v13  ;;  %v591_v13 = vld [vmem:[%s6447_s0 + $0x33] sm:$0x1] }
  0x30   :  { %v318_v34 = vsel %vm130_vm3, %v317_v18, %v316_v30  ;;  %v443_v39 = vpack.c.bf16 %v435_v14, %v435_v14  ;;  %4734 = vmatmul.mubr.msk.bf16.vlgmr.msra.gmra.mxu1 %vm166_vm9, %v5473_v29  ;;  %v444_v41 = vpack.c.bf16 %v436_v19, %v436_v19  ;;  %v445_v42 = vpack.c.bf16 %v437_v20, %v437_v20  ;;  %v592_v14 = vld [vmem:[%s6447_s0 + $0x3b] sm:$0x1] }
  0x31   :  { %v320_v40 = vsel %vm133_vm4, %v319_v22, %v318_v34  ;;  %v446_v43 = vpack.c.bf16 %v438_v28, %v438_v28  ;;  %v5494_v8 = vcombine.high %v163_v35, %v163_v35  ;;  %v5497_v23 = vsel %vm170_vm1, %v163_v35, 0  ;;  %256 = vmatprep.mubr.bf16.mxu1 %v5306_v3 }
  0x32   :  { %v322_v6 = vsel %vm136_vm5, %v321_v26, %v320_v40  ;;  %v447_v44 = vpack.c.bf16 %v439_v33, %v439_v33  ;;  %v448_v46 = vpack.c.bf16 %v440_v36, %v440_v36  ;;  %v449_v47 = vpack.c.bf16 %v441_v37, %v441_v37  ;;  %v736_v33 = vld [vmem:[%s6447_s0 + $0x4] sm:$0x1]  ;;  %v737_v37 = vld [vmem:[%s6447_s0 + $0xc] sm:$0x1] }
  0x33   :  { %v324_v45 = vsel %vm139_vm6, %v323_v27, %v322_v6  ;;  %v458_v48 = vunpack.c.l.b16 %v442_v38  ;;  %4735 = vmatprep.subr.msk.bf16.mxu1 %vm170_vm1, %v5494_v8  ;;  %v459_v50 = vunpack.c.l.b16 %v443_v39  ;;  %v460_v51 = vunpack.c.l.b16 %v444_v41  ;;  %v738_v38 = vld [vmem:[%s6447_s0 + $0x14] sm:$0x1]  ;;  %v739_v39 = vld [vmem:[%s6447_s0 + $0x1c] sm:$0x1]  ;;  %v740_v6 = vld [vmem:[%s6447_s0 + $0x24] sm:$0x1] }
  0x34   :  { %v326_v49 = vsel %vm142_vm7, %v325_v31, %v324_v45  ;;  %v461_v52 = vunpack.c.l.b16 %v445_v42  ;;  %239 = vmatpush1.bf16.msra.mxu1 %v5497_v23  ;;  %v462_v54 = vunpack.c.l.b16 %v446_v43  ;;  %v463_v55 = vunpack.c.l.b16 %v447_v44  ;;  %v741_v44 = vld [vmem:[%s6447_s0 + $0x2c] sm:$0x1]  ;;  %v742_v45 = vld [vmem:[%s6447_s0 + $0x34] sm:$0x1] }
  0x35   :  { %v328_v53 = vsel %vm145_vm8, %v327_v32, %v326_v49  ;;  %v464_v56 = vunpack.c.l.b16 %v448_v46  ;;  %v465_v61 = vunpack.c.l.b16 %v449_v47  ;;  %v466_v62 = vrot.slane %v459_v50, 7  ;;  %4741 = vmatprep.subr.msk.bf16.mxu1 %vm170_vm1, %v5494_v8  ;;  %v743_v50 = vld [vmem:[%s6447_s0 + $0x3c] sm:$0x1] }
  0x36   :  { %v5515_v60 = vpack.c.b16 %v328_v53, %v328_v53  ;;  %v468_v63 = vrot.slane %v460_v51, 6  ;;  %v470_v2 = vrot.slane %v461_v52, 5  ;;  %v472_v5 = vrot.slane %v462_v54, 4 }
  0x37   :  { %v474_v9 = vrot.slane %v463_v55, 3  ;;  %v467_v11 = vsel %vm127_vm2, %v466_v62, %v458_v48  ;;  %v476_v12 = vrot.slane %v464_v56, 2  ;;  %v593_v15 = vpack.c.bf16 %v585_v57, %v585_v57 }
  0x38   :  { %4740 = vmatmul.mubr.msk.bf16.vlgmr.msra.gmra.mxu0 %vm166_vm9, %v5515_v60  ;;  %v594_v16 = vpack.c.bf16 %v586_v58, %v586_v58  ;;  %v469_v17 = vsel %vm130_vm3, %v468_v63, %v467_v11  ;;  %v478_v18 = vrot.slane %v465_v61, 1  ;;  %v595_v19 = vpack.c.bf16 %v587_v59, %v587_v59  ;;  %4736 = vmatmul.mubr.msk.bf16.vlgmr.msra.gmra.mxu1 %vm166_vm9, %v5473_v29 }
  0x39   :  { %499 = vmatpush1.bf16.msra.mxu0 %v5417_v25  ;;  %516 = vmatprep.mubr.bf16.mxu0 %v5306_v3  ;;  %v596_v20 = vpack.c.bf16 %v588_v0, %v588_v0  ;;  %v471_v21 = vsel %vm133_vm4, %v470_v2, %v469_v17  ;;  %v597_v22 = vpack.c.bf16 %v589_v1, %v589_v1  ;;  %v609_v27 = vunpack.c.l.b16 %v593_v15  ;;  %v887_v17 = vld [vmem:[%s6447_s0 + $0x5] sm:$0x1] }
  0x3a   :  { %4751 = vmatprep.subr.msk.bf16.mxu0 %vm170_vm1, %v5414_v24  ;;  %v598_v26 = vpack.c.bf16 %v590_v10, %v590_v10  ;;  %v473_v28 = vsel %vm136_vm5, %v472_v5, %v471_v21  ;;  %389 = vmatpush1.bf16.msra.mxu1 %v5497_v23  ;;  %v599_v30 = vpack.c.bf16 %v591_v13, %v591_v13  ;;  %v610_v32 = vunpack.c.l.b16 %v594_v16 }
  0x3b   :  { %406 = vmatprep.mubr.bf16.mxu1 %v5306_v3  ;;  %v600_v31 = vpack.c.bf16 %v592_v14, %v592_v14  ;;  %v475_v29 = vsel %vm139_vm6, %v474_v9, %v473_v28  ;;  %v611_v34 = vunpack.c.l.b16 %v595_v19  ;;  %v612_v35 = vunpack.c.l.b16 %v596_v20  ;;  %4747 = vmatprep.subr.msk.bf16.mxu1 %vm170_vm1, %v5494_v8 }
  0x3c   :  { %v613_v36 = vunpack.c.l.b16 %v597_v22  ;;  %v477_v40 = vsel %vm142_vm7, %v476_v12, %v475_v29  ;;  %v614_v41 = vunpack.c.l.b16 %v598_v26  ;;  %v615_v42 = vunpack.c.l.b16 %v599_v30  ;;  %v889_v22 = vld [vmem:[%s6447_s0 + $0x15] sm:$0x1]  ;;  %v890_v26 = vld [vmem:[%s6447_s0 + $0x1d] sm:$0x1] }
  0x3d   :  { %v616_v43 = vunpack.c.l.b16 %v600_v31  ;;  %v479_v46 = vsel %vm145_vm8, %v478_v18, %v477_v40  ;;  %v617_v47 = vrot.slane %v610_v32, 7  ;;  %v619_v48 = vrot.slane %v611_v34, 6  ;;  %v891_v32 = vld [vmem:[%s6447_s0 + $0x25] sm:$0x1]  ;;  %v894_v40 = vld [vmem:[%s6447_s0 + $0x3d] sm:$0x1] }
  0x3e   :  { %v621_v49 = vrot.slane %v612_v35, 5  ;;  %v5577_v51 = vpack.c.b16 %v479_v46, %v479_v46  ;;  %v623_v52 = vrot.slane %v613_v36, 4  ;;  %v625_v53 = vrot.slane %v614_v41, 3  ;;  %v892_v36 = vld [vmem:[%s6447_s0 + $0x2d] sm:$0x1] }
  0x3f   :  { %v627_v54 = vrot.slane %v615_v42, 2  ;;  %v618_v55 = vsel %vm127_vm2, %v617_v47, %v609_v27  ;;  %v629_v56 = vrot.slane %v616_v43, 1  ;;  %v744_v57 = vpack.c.bf16 %v736_v33, %v736_v33 }
  0x40   :  { %v745_v58 = vpack.c.bf16 %v737_v37, %v737_v37  ;;  %4746 = vmatmul.mubr.msk.bf16.vlgmr.msra.gmra.mxu0 %vm166_vm9, %v5577_v51  ;;  %v620_v59 = vsel %vm130_vm3, %v619_v48, %v618_v55  ;;  %v746_v61 = vpack.c.bf16 %v738_v38, %v738_v38  ;;  %v747_v62 = vpack.c.bf16 %v739_v39, %v739_v39  ;;  %v893_v37 = vld [vmem:[%s6447_s0 + $0x35] sm:$0x1]  ;;  %v1038_v55 = vld [vmem:[%s6447_s0 + $0x6] sm:$0x1] }
  0x41   :  { %v748_v63 = vpack.c.bf16 %v740_v6, %v740_v6  ;;  %650 = vmatpush1.bf16.msra.mxu0 %v5417_v25  ;;  %667 = vmatprep.mubr.bf16.mxu0 %v5306_v3  ;;  %v622_v0 = vsel %vm133_vm4, %v621_v49, %v620_v59  ;;  %v749_v1 = vpack.c.bf16 %v741_v44, %v741_v44  ;;  %v760_v5 = vunpack.c.l.b16 %v744_v57 }
  0x42   :  { %v750_v2 = vpack.c.bf16 %v742_v45, %v742_v45  ;;  %4757 = vmatprep.subr.msk.bf16.mxu0 %vm170_vm1, %v5414_v24  ;;  %4742 = vmatmul.mubr.msk.bf16.vlgmr.msra.gmra.mxu1 %vm166_vm9, %v5515_v60  ;;  %v624_v9 = vsel %vm136_vm5, %v623_v52, %v622_v0  ;;  %v751_v10 = vpack.c.bf16 %v743_v50, %v743_v50  ;;  %v761_v11 = vunpack.c.l.b16 %v745_v58  ;;  %v888_v60 = vld [vmem:[%s6447_s0 + $0xd] sm:$0x1] }
  0x43   :  { %v762_v12 = vunpack.c.l.b16 %v746_v61  ;;  %v626_v13 = vsel %vm139_vm6, %v625_v53, %v624_v9  ;;  %540 = vmatpush1.bf16.msra.mxu1 %v5497_v23  ;;  %557 = vmatprep.mubr.bf16.mxu1 %v5306_v3  ;;  %v763_v14 = vunpack.c.l.b16 %v747_v62  ;;  %v764_v15 = vunpack.c.l.b16 %v748_v63  ;;  %v1040_v61 = vld [vmem:[%s6447_s0 + $0x16] sm:$0x1]  ;;  %v1041_v62 = vld [vmem:[%s6447_s0 + $0x1e] sm:$0x1]  ;;  %v1043_v9 = vld [vmem:[%s6447_s0 + $0x2e] sm:$0x1] }
  0x44   :  { %v765_v16 = vunpack.c.l.b16 %v749_v1  ;;  %v628_v18 = vsel %vm142_vm7, %v627_v54, %v626_v13  ;;  %v766_v19 = vunpack.c.l.b16 %v750_v2  ;;  %v767_v20 = vunpack.c.l.b16 %v751_v10  ;;  %4753 = vmatprep.subr.msk.bf16.mxu1 %vm170_vm1, %v5494_v8 }
  0x45   :  { %v768_v21 = vrot.slane %v761_v11, 7  ;;  %v630_v27 = vsel %vm145_vm8, %v629_v56, %v628_v18  ;;  %v770_v28 = vrot.slane %v762_v12, 6  ;;  %v772_v30 = vrot.slane %v763_v14, 5  ;;  %v1044_v14 = vld [vmem:[%s6447_s0 + $0x36] sm:$0x1] }
  0x46   :  { %v774_v31 = vrot.slane %v764_v15, 4  ;;  %v5613_v33 = vpack.c.b16 %v630_v27, %v630_v27  ;;  %v776_v34 = vrot.slane %v765_v16, 3  ;;  %v778_v35 = vrot.slane %v766_v19, 2  ;;  %v1045_v18 = vld [vmem:[%s6447_s0 + $0x3e] sm:$0x1] }
  0x47   :  { %v769_v29 = vsel %vm127_vm2, %v768_v21, %v760_v5  ;;  %v780_v39 = vrot.slane %v767_v20, 1  ;;  %v895_v41 = vpack.c.bf16 %v887_v17, %v887_v17  ;;  %v896_v42 = vpack.c.bf16 %v888_v60, %v888_v60  ;;  %v1042_v5 = vld [vmem:[%s6447_s0 + $0x26] sm:$0x1] }
  0x48   :  { %v771_v38 = vsel %vm130_vm3, %v770_v28, %v769_v29  ;;  %4752 = vmatmul.mubr.msk.bf16.vlgmr.msra.gmra.mxu0 %vm166_vm9, %v5613_v33  ;;  %v897_v6 = vpack.c.bf16 %v889_v22, %v889_v22  ;;  %v898_v44 = vpack.c.bf16 %v890_v26, %v890_v26  ;;  %v899_v45 = vpack.c.bf16 %v891_v32, %v891_v32 }
  0x49   :  { %v773_v43 = vsel %vm133_vm4, %v772_v30, %v771_v38  ;;  %801 = vmatpush1.bf16.msra.mxu0 %v5417_v25  ;;  %818 = vmatprep.mubr.bf16.mxu0 %v5306_v3  ;;  %v900_v47 = vpack.c.bf16 %v892_v36, %v892_v36  ;;  %v901_v48 = vpack.c.bf16 %v893_v37, %v893_v37  ;;  %v911_v49 = vunpack.c.l.b16 %v895_v41 }
  0x4a   :  { %v775_v46 = vsel %vm136_vm5, %v774_v31, %v773_v43  ;;  %4763 = vmatprep.subr.msk.bf16.mxu0 %vm170_vm1, %v5414_v24  ;;  %4748 = vmatmul.mubr.msk.bf16.vlgmr.msra.gmra.mxu1 %vm166_vm9, %v5577_v51  ;;  %v902_v52 = vpack.c.bf16 %v894_v40, %v894_v40  ;;  %v912_v53 = vunpack.c.l.b16 %v896_v42  ;;  %v913_v54 = vunpack.c.l.b16 %v897_v6  ;;  %v1039_v51 = vld [vmem:[%s6447_s0 + $0xe] sm:$0x1]  ;;  %v1191_v6 = vld [vmem:[%s6447_s0 + $0x17] sm:$0x1] }
  0x4b   :  { %v777_v50 = vsel %vm139_vm6, %v776_v34, %v775_v46  ;;  %691 = vmatpush1.bf16.msra.mxu1 %v5497_v23  ;;  %708 = vmatprep.mubr.bf16.mxu1 %v5306_v3  ;;  %v914_v57 = vunpack.c.l.b16 %v898_v44  ;;  %v915_v58 = vunpack.c.l.b16 %v899_v45  ;;  %v916_v59 = vunpack.c.l.b16 %v900_v47  ;;  %v1192_v44 = vld [vmem:[%s6447_s0 + $0x1f] sm:$0x1] }
  0x4c   :  { %v779_v56 = vsel %vm142_vm7, %v778_v35, %v777_v50  ;;  %v917_v0 = vunpack.c.l.b16 %v901_v48  ;;  %v918_v1 = vunpack.c.l.b16 %v902_v52  ;;  %v919_v2 = vrot.slane %v912_v53, 7  ;;  %4759 = vmatprep.subr.msk.bf16.mxu1 %vm170_vm1, %v5494_v8  ;;  %v1194_v50 = vld [vmem:[%s6447_s0 + $0x2f] sm:$0x1] }
  0x4d   :  { %v781_v63 = vsel %vm145_vm8, %v780_v39, %v779_v56  ;;  %v921_v11 = vrot.slane %v913_v54, 6  ;;  %v923_v12 = vrot.slane %v914_v57, 5  ;;  %v925_v13 = vrot.slane %v915_v58, 4  ;;  %v1189_v39 = vld [vmem:[%s6447_s0 + $0x7] sm:$0x1] }
  0x4e   :  { %v5661_v10 = vpack.c.b16 %v781_v63, %v781_v63  ;;  %v920_v15 = vsel %vm127_vm2, %v919_v2, %v911_v49  ;;  %v927_v16 = vrot.slane %v916_v59, 3  ;;  %v929_v17 = vrot.slane %v917_v0, 2  ;;  %v1193_v49 = vld [vmem:[%s6447_s0 + $0x27] sm:$0x1]  ;;  %v1195_v56 = vld [vmem:[%s6447_s0 + $0x37] sm:$0x1] }
  0x4f   :  { %v931_v60 = vrot.slane %v918_v1, 1  ;;  %v922_v19 = vsel %vm130_vm3, %v921_v11, %v920_v15  ;;  %v1046_v20 = vpack.c.bf16 %v1038_v55, %v1038_v55  ;;  %v1047_v21 = vpack.c.bf16 %v1039_v51, %v1039_v51  ;;  %v1196_v51 = vld [vmem:[%s6447_s0 + $0x3f] sm:$0x1] }
  0x50   :  { %v1048_v22 = vpack.c.bf16 %v1040_v61, %v1040_v61  ;;  %4758 = vmatmul.mubr.msk.bf16.vlgmr.msra.gmra.mxu0 %vm166_vm9, %v5661_v10  ;;  %v924_v26 = vsel %vm133_vm4, %v923_v12, %v922_v19  ;;  %v1049_v27 = vpack.c.bf16 %v1041_v62, %v1041_v62  ;;  %v1050_v28 = vpack.c.bf16 %v1042_v5, %v1042_v5 }
  0x51   :  { %v1051_v30 = vpack.c.bf16 %v1043_v9, %v1043_v9  ;;  %952 = vmatpush1.bf16.msra.mxu0 %v5417_v25  ;;  %969 = vmatprep.mubr.bf16.mxu0 %v5306_v3  ;;  %v926_v31 = vsel %vm136_vm5, %v925_v13, %v924_v26  ;;  %v1052_v32 = vpack.c.bf16 %v1044_v14, %v1044_v14  ;;  %v1062_v34 = vunpack.c.l.b16 %v1046_v20 }
  0x52   :  { %v1053_v29 = vpack.c.bf16 %v1045_v18, %v1045_v18  ;;  %4769 = vmatprep.subr.msk.bf16.mxu0 %vm170_vm1, %v5414_v24  ;;  %4754 = vmatmul.mubr.msk.bf16.vlgmr.msra.gmra.mxu1 %vm166_vm9, %v5613_v33  ;;  %v928_v35 = vsel %vm139_vm6, %v927_v16, %v926_v31  ;;  %v1063_v36 = vunpack.c.l.b16 %v1047_v21  ;;  %v1064_v37 = vunpack.c.l.b16 %v1048_v22  ;;  %v1190_v33 = vld [vmem:[%s6447_s0 + $0xf] sm:$0x1] }
  0x53   :  { %v1065_v38 = vunpack.c.l.b16 %v1049_v27  ;;  %v930_v40 = vsel %vm142_vm7, %v929_v17, %v928_v35  ;;  %842 = vmatpush1.bf16.msra.mxu1 %v5497_v23  ;;  %859 = vmatprep.mubr.bf16.mxu1 %v5306_v3  ;;  %v1066_v41 = vunpack.c.l.b16 %v1050_v28  ;;  %v1067_v42 = vunpack.c.l.b16 %v1051_v30 }
  0x54   :  { %v1068_v43 = vunpack.c.l.b16 %v1052_v32  ;;  %v932_v45 = vsel %vm145_vm8, %v931_v60, %v930_v40  ;;  %v1069_v46 = vunpack.c.l.b16 %v1053_v29  ;;  %v1070_v47 = vrot.slane %v1063_v36, 7  ;;  %4765 = vmatprep.subr.msk.bf16.mxu1 %vm170_vm1, %v5494_v8  ;;  %v5731_v29 = vld [vmem:[#allocation6 + $0x68] sm:$0xff] }
  0x55   :  { %v1072_v48 = vrot.slane %v1064_v37, 6  ;;  %v933_v52 = vpack.c.b16 %v932_v45, %v932_v45  ;;  %v1074_v53 = vrot.slane %v1065_v38, 5  ;;  %v1076_v54 = vrot.slane %v1066_v41, 4  ;;  %v5766_v45 = vld [vmem:[#allocation6 + $0x8] sm:$0xff] }
  0x56   :  { %v1078_v55 = vrot.slane %v1067_v42, 3  ;;  %v1071_v57 = vsel %vm127_vm2, %v1070_v47, %v1062_v34  ;;  %v1080_v58 = vrot.slane %v1068_v43, 2  ;;  %v1082_v59 = vrot.slane %v1069_v46, 1  ;;  %v5748_v42 = vld [vmem:[#allocation6 + $0x60] sm:$0xff]  ;;  %v5750_v43 = vld [vmem:[#allocation6 + $0x48] sm:$0xff] }
  0x57   :  { %v1197_v61 = vpack.c.bf16 %v1189_v39, %v1189_v39  ;;  %v1073_v62 = vsel %vm130_vm3, %v1072_v48, %v1071_v57  ;;  %v1198_v63 = vpack.c.bf16 %v1190_v33, %v1190_v33  ;;  %v1199_v0 = vpack.c.bf16 %v1191_v6, %v1191_v6  ;;  %v5753_v33 = vld [vmem:[#allocation6 + $0x40] sm:$0xff]  ;;  %v5756_v6 = vld [vmem:[#allocation6 + $0x28] sm:$0xff]  ;;  %v5778_v48 = vld [vmem:[#allocation6 + $0x70] sm:$0xff] }
  0x58   :  { %v1200_v1 = vpack.c.bf16 %v1192_v44, %v1192_v44  ;;  %4764 = vmatmul.mubr.msk.bf16.vlgmr.msra.gmra.mxu0 %vm166_vm9, %v933_v52  ;;  %v1075_v2 = vsel %vm133_vm4, %v1074_v53, %v1073_v62  ;;  %v1201_v5 = vpack.c.bf16 %v1193_v49, %v1193_v49  ;;  %v1202_v9 = vpack.c.bf16 %v1194_v50, %v1194_v50  ;;  %v5760_v44 = vld [vmem:[#allocation6 + $0x20] sm:$0xff]  ;;  %v5786_v49 = vld [vmem:[#allocation6 + $0x50] sm:$0xff]  ;;  %v5790_v50 = vld [vmem:[#allocation6 + $0x38] sm:$0xff] }
  0x59   :  { %v1203_v11 = vpack.c.bf16 %v1195_v56, %v1195_v56  ;;  %1103 = vmatpush1.bf16.msra.mxu0 %v5417_v25  ;;  %1120 = vmatprep.mubr.bf16.mxu0 %v5306_v3  ;;  %v1077_v12 = vsel %vm136_vm5, %v1076_v54, %v1075_v2  ;;  %v1204_v13 = vpack.c.bf16 %v1196_v51, %v1196_v51  ;;  %v1213_v14 = vunpack.c.l.b16 %v1197_v61  ;;  %v5770_v46 = vld [vmem:[#allocation6] sm:$0xff]  ;;  %v5798_v53 = vld [vmem:[#allocation6 + $0x18] sm:$0xff]  ;;  %v5802_v54 = vld [vmem:[#allocation6 + $0x10] sm:$0xff] }
  0x5a   :  { %v1214_v15 = vunpack.c.l.b16 %v1198_v63  ;;  %4775 = vmatprep.subr.msk.bf16.mxu0 %vm170_vm1, %v5414_v24  ;;  %4760 = vmatmul.mubr.msk.bf16.vlgmr.msra.gmra.mxu1 %vm166_vm9, %v5661_v10  ;;  %v1079_v16 = vsel %vm139_vm6, %v1078_v55, %v1077_v12  ;;  %v1215_v17 = vunpack.c.l.b16 %v1199_v0  ;;  %v1216_v60 = vunpack.c.l.b16 %v1200_v1  ;;  %v1356_v47 = vld [vmem:[#allocation4] sm:$0xff] }
  0x5b   :  { %v1217_v18 = vunpack.c.l.b16 %v1201_v5  ;;  %v1081_v19 = vsel %vm142_vm7, %v1080_v58, %v1079_v16  ;;  %993 = vmatpush1.bf16.msra.mxu1 %v5497_v23  ;;  %1010 = vmatprep.mubr.bf16.mxu1 %v5306_v3  ;;  %v1218_v20 = vunpack.c.l.b16 %v1202_v9  ;;  %v1219_v21 = vunpack.c.l.b16 %v1203_v11  ;;  %v72_v57 = vld [vmem:[%s6450_s3] sm:$0xf] }
  0x5c   :  { %v1220_v22 = vunpack.c.l.b16 %v1204_v13  ;;  %v1083_v26 = vsel %vm145_vm8, %v1082_v59, %v1081_v19  ;;  %v1221_v24 = vrot.slane %v1214_v15, 7  ;;  %v1223_v27 = vrot.slane %v1215_v17, 6  ;;  %4771 = vmatprep.subr.msk.bf16.mxu1 %vm170_vm1, %v5494_v8 }
  0x5d   :  { %v1225_v28 = vrot.slane %v1216_v60, 5  ;;  %v1084_v10 = vpack.c.b16 %v1083_v26, %v1083_v26  ;;  %v1227_v30 = vrot.slane %v1217_v18, 4  ;;  %v1229_v32 = vrot.slane %v1218_v20, 3 }
  0x5e   :  { %v1222_v31 = vsel %vm127_vm2, %v1221_v24, %v1213_v14  ;;  %v1231_v35 = vrot.slane %v1219_v21, 2  ;;  %v1233_v37 = vrot.slane %v1220_v22, 1  ;;  %v92_v55 = vsub.s32 0, %v5368_v4 }
  0x5f   :  { %v1224_v34 = vsel %vm130_vm3, %v1223_v27, %v1222_v31  ;;  %v96_v58 = vsub.s32 1, %v5368_v4  ;;  %v100_v51 = vsub.s32 2, %v5368_v4  ;;  %v104_v63 = vsub.s32 3, %v5368_v4 }
  0x60   :  { %4770 = vmatmul.mubr.msk.bf16.vlgmr.msra.gmra.mxu0 %vm166_vm9, %v1084_v10  ;;  %v1226_v36 = vsel %vm133_vm4, %v1225_v28, %v1224_v34  ;;  %v5834_v61 = vrot.slane %v72_v57, %v92_v55  ;;  %vm5308_vm10 = vmmov 0  }
  0x61   :  { %1254 = vmatpush1.bf16.msra.mxu0 %v5417_v25  ;;  %1271 = vmatprep.mubr.bf16.mxu0 %v5306_v3  ;;  %v1228_v38 = vsel %vm136_vm5, %v1227_v30, %v1226_v36  ;;  %v5839_v0 = vrot.slane %v72_v57, %v96_v58  ;;  %v5843_v2 = vrot.slane %v72_v57, %v100_v51 }
  0x62   :  { %1392 = vmatprep.subr.mxu0 %v5731_v29  ;;  %4766 = vmatmul.mubr.msk.bf16.vlgmr.msra.gmra.mxu1 %vm166_vm9, %v933_v52  ;;  %v1230_v39 = vsel %vm139_vm6, %v1229_v32, %v1228_v38  ;;  %v5794_v52 = vld [vmem:[#allocation6 + $0x30] sm:$0xff]  ;;  %v5848_v11 = vrot.slane %v72_v57, %v104_v63 }
  0x63   :  { %v1232_v40 = vsel %vm142_vm7, %v1231_v35, %v1230_v39  ;;  %1144 = vmatpush1.bf16.msra.mxu1 %v5497_v23  ;;  %1161 = vmatprep.mubr.bf16.mxu1 %v5306_v3 }
  0x64   :  { %v1234_v41 = vsel %vm145_vm8, %v1233_v37, %v1232_v40  ;;  %4777 = vmatprep.subr.msk.bf16.mxu1 %vm170_vm1, %v5494_v8  ;;  %v5763_v8 = vld [vmem:[#allocation6 + $0x78] sm:$0xff] }
  0x65   :  { %v1235_v25 = vpack.c.b16 %v1234_v41, %v1234_v41 }
  0x68   :  { %4776 = vmatmul.mubr.msk.bf16.vlgmr.msra.gmra.mxu0 %vm166_vm9, %v1235_v25 }
  0x69   :  { %1393 = vmatpush1.msra.mxu0 %v5748_v42  ;;  %1432 = vmatprep.mubr.f32.mxu0 %v5307_v7 }
  0x6a   :  { %1394 = vmatprep.subr.mxu0 %v5750_v43  ;;  %4772 = vmatmul.mubr.msk.bf16.vlgmr.msra.gmra.mxu1 %vm166_vm9, %v1084_v10 }
  0x6b   :  { %1395 = vmatpush1.msra.mxu0 %v5753_v33  ;;  %1295 = vmatpush1.bf16.msra.mxu1 %v5497_v23  ;;  %v5781_v23 = vld [vmem:[#allocation6 + $0x58] sm:$0xff] }
  0x6c   :  { %1396 = vmatprep.subr.mxu0 %v5756_v6  ;;  %1312 = vmatprep.mubr.bf16.mxu1 %v5306_v3 }
  0x6d   :  { %1397 = vmatpush1.msra.mxu0 %v5760_v44  ;;  %1463 = vmatprep.subr.mxu1 %v5763_v8 }
  0x6e   :  { %1398 = vmatprep.subr.mxu0 %v5766_v45 }
  0x6f   :  { %1399 = vmatpush1.msra.mxu0 %v5770_v46 }
  0x70   :  { %4781 = vmatmul.mubr.msk.f32.vlgmr.msra.gmra.mxu0 %vm66_vm0, %v1356_v47  ;;  %1572 = vmatprep.subr.mxu0 %v5731_v29 }
  0x71   :  { %1573 = vmatpush1.msra.mxu0 %v5748_v42  ;;  %1612 = vmatprep.mubr.f32.mxu0 %v5307_v7 }
  0x72   :  { %4778 = vmatmul.mubr.msk.bf16.vlgmr.msra.gmra.mxu1 %vm166_vm9, %v1235_v25  ;;  %1574 = vmatprep.subr.mxu0 %v5750_v43 }
  0x73   :  { %1464 = vmatpush1.msra.mxu1 %v5778_v48  ;;  %1503 = vmatprep.mubr.f32.mxu1 %v5307_v7 }
  0x74   :  { %1465 = vmatprep.subr.mxu1 %v5781_v23  ;;  %1575 = vmatpush1.msra.mxu0 %v5753_v33 }
  0x75   :  { %1466 = vmatpush1.msra.mxu1 %v5786_v49  ;;  %1576 = vmatprep.subr.mxu0 %v5756_v6 }
  0x76   :  { %1467 = vmatprep.subr.mxu1 %v5790_v50  ;;  %1577 = vmatpush1.msra.mxu0 %v5760_v44 }
  0x77   :  { %1468 = vmatpush1.msra.mxu1 %v5794_v52  ;;  %1578 = vmatprep.subr.mxu0 %v5766_v45 }
  0x78   :  { %1469 = vmatprep.subr.mxu1 %v5798_v53  ;;  %1579 = vmatpush1.msra.mxu0 %v5770_v46 }
  0x79   :  { %1470 = vmatpush1.msra.mxu1 %v5802_v54  ;;  %1753 = vmatprep.subr.mxu0 %v5731_v29 }
  0x7a   :  { %4782 = vmatmul.mubr.msk.f32.vlgmr.msra.gmra.mxu1 %vm66_vm0, %v1356_v47  ;;  %1643 = vmatprep.subr.mxu1 %v5763_v8 }
  0x7b   :  { %1644 = vmatpush1.msra.mxu1 %v5778_v48  ;;  %1683 = vmatprep.mubr.f32.mxu1 %v5307_v7 }
  0x7c   :  { %1645 = vmatprep.subr.mxu1 %v5781_v23 }
  0x7d   :  { %1646 = vmatpush1.msra.mxu1 %v5786_v49 }
  0x7e   :  { %1647 = vmatprep.subr.mxu1 %v5790_v50 }
  0x7f   :  { %1648 = vmatpush1.msra.mxu1 %v5794_v52 }
  0x80   :  { %1649 = vmatprep.subr.mxu1 %v5798_v53 }
  0x81   :  { %1650 = vmatpush1.msra.mxu1 %v5802_v54 }
  0x82   :  { %1824 = vmatprep.subr.mxu1 %v5763_v8 }
  0xf0   :  { %v5823_v56 = vpop.f32.mrf.mxu1 }
  0xf2   :  { %v5829_v59 = vpop.f32.mrf.mxu1 }
  0xf4   :  { %v221_v62 = vpop.f32.mrf.mxu1 }
  0xf6   :  { %v222_v1 = vpop.f32.mrf.mxu1 }
  0xf8   :  { %v367_v5 = vpop.f32.mrf.mxu0  ;;  %v258_v13 = vpop.f32.mrf.mxu1 }
  0xf9   :  { %v368_v9 = vadd.f32 %v367_v5, %v5834_v61  ;;  %v259_v15 = vadd.f32 %v258_v13, %v5843_v2 }
  0xfa   :  { %v369_v12 = vpop.f32.mrf.mxu0  ;;  %v260_v17 = vpop.f32.mrf.mxu1 }
  0xfb   :  { %v370_v14 = vadd.f32 %v369_v12, %v5839_v0  ;;  %v261_v18 = vadd.f32 %v260_v17, %v5848_v11 }
  0xfc   :  { %v371_v16 = vpop.f32.mrf.mxu0  ;;  %v262_v20 = vpop.f32.mrf.mxu1 }
  0xfd   :  { %v5852_v60 = vpack.c.bf16 %v370_v14, %v368_v9  ;;  %v5855_v21 = vpack.c.bf16 %v261_v18, %v259_v15 }
  0xfe   :  { %v372_v19 = vpop.f32.mrf.mxu0  ;;  %v263_v22 = vpop.f32.mrf.mxu1 }
 0x100   :  { %v518_v26 = vpop.f32.mrf.mxu0 }
 0x101   :  { %v519_v24 = vadd.f32 %v518_v26, %v5834_v61 }
 0x102   :  { %v520_v27 = vpop.f32.mrf.mxu0  ;;  %v408_v28 = vpop.f32.mrf.mxu1 }
 0x103   :  { %v521_v10 = vadd.f32 %v520_v27, %v5839_v0  ;;  %v409_v30 = vadd.f32 %v408_v28, %v5843_v2 }
 0x104   :  { %v522_v31 = vpop.f32.mrf.mxu0  ;;  %v410_v32 = vpop.f32.mrf.mxu1 }
 0x105   :  { %v5860_v34 = vpack.c.bf16 %v521_v10, %v519_v24  ;;  %v411_v35 = vadd.f32 %v410_v32, %v5848_v11 }
 0x106   :  { %v523_v36 = vpop.f32.mrf.mxu0  ;;  %v412_v37 = vpop.f32.mrf.mxu1 }
 0x107   :  { %v5863_v38 = vpack.c.bf16 %v411_v35, %v409_v30 }
 0x108   :  { %v669_v39 = vpop.f32.mrf.mxu0  ;;  %v413_v40 = vpop.f32.mrf.mxu1 }
 0x109   :  { %v670_v41 = vadd.f32 %v669_v39, %v5834_v61 }
 0x10a   :  { %v671_v25 = vpop.f32.mrf.mxu0  ;;  %v559_v47 = vpop.f32.mrf.mxu1 }
 0x10b   :  { %v672_v57 = vadd.f32 %v671_v25, %v5839_v0  ;;  %v560_v62 = vadd.f32 %v559_v47, %v5843_v2 }
 0x10c   :  { %v673_v1 = vpop.f32.mrf.mxu0  ;;  %v561_v5 = vpop.f32.mrf.mxu1 }
 0x10d   :  { %v5868_v9 = vpack.c.bf16 %v672_v57, %v670_v41  ;;  %v562_v12 = vadd.f32 %v561_v5, %v5848_v11 }
 0x10e   :  { %v674_v13 = vpop.f32.mrf.mxu0  ;;  %v563_v14 = vpop.f32.mrf.mxu1 }
 0x10f   :  { %v5871_v15 = vpack.c.bf16 %v562_v12, %v560_v62 }
 0x110   :  { %v820_v16 = vpop.f32.mrf.mxu0  ;;  %v564_v17 = vpop.f32.mrf.mxu1 }
 0x111   :  { %v821_v18 = vadd.f32 %v820_v16, %v5834_v61 }
 0x112   :  { %v822_v19 = vpop.f32.mrf.mxu0  ;;  %v710_v20 = vpop.f32.mrf.mxu1 }
 0x113   :  { %v823_v22 = vadd.f32 %v822_v19, %v5839_v0  ;;  %v711_v26 = vadd.f32 %v710_v20, %v5843_v2 }
 0x114   :  { %v824_v24 = vpop.f32.mrf.mxu0  ;;  %v712_v27 = vpop.f32.mrf.mxu1 }
 0x115   :  { %v5876_v28 = vpack.c.bf16 %v823_v22, %v821_v18  ;;  %v713_v10 = vadd.f32 %v712_v27, %v5848_v11 }
 0x116   :  { %v825_v30 = vpop.f32.mrf.mxu0  ;;  %v714_v31 = vpop.f32.mrf.mxu1 }
 0x117   :  { %v5879_v32 = vpack.c.bf16 %v713_v10, %v711_v26 }
 0x118   :  { %v971_v35 = vpop.f32.mrf.mxu0  ;;  %v715_v36 = vpop.f32.mrf.mxu1 }
 0x119   :  { %v972_v37 = vadd.f32 %v971_v35, %v5834_v61  ;;  %v218_v35 = vadd.f32 %v5823_v56, %v5834_v61  ;;  %v220_v36 = vadd.f32 %v5829_v59, %v5839_v0 }
 0x11a   :  { %v973_v39 = vpop.f32.mrf.mxu0  ;;  %v861_v40 = vpop.f32.mrf.mxu1 }
 0x11b   :  { %v974_v41 = vadd.f32 %v973_v39, %v5839_v0  ;;  %v862_v25 = vadd.f32 %v861_v40, %v5843_v2 }
 0x11c   :  { %v975_v47 = vpop.f32.mrf.mxu0  ;;  %v863_v57 = vpop.f32.mrf.mxu1 }
 0x11d   :  { %v5884_v62 = vpack.c.bf16 %v974_v41, %v972_v37  ;;  %v864_v1 = vadd.f32 %v863_v57, %v5848_v11  ;;  %v4897_v57 = vpack.c.bf16 %v220_v36, %v218_v35 }
 0x11e   :  { %v976_v5 = vpop.f32.mrf.mxu0  ;;  %v865_v12 = vpop.f32.mrf.mxu1 }
 0x11f   :  { %v5887_v13 = vpack.c.bf16 %v864_v1, %v862_v25 }
 0x120   :  { %v1122_v14 = vpop.f32.mrf.mxu0  ;;  %v866_v16 = vpop.f32.mrf.mxu1 }
 0x121   :  { %v1123_v17 = vadd.f32 %v1122_v14, %v5834_v61 }
 0x122   :  { %v1124_v18 = vpop.f32.mrf.mxu0  ;;  %v1012_v19 = vpop.f32.mrf.mxu1 }
 0x123   :  { %v1125_v20 = vadd.f32 %v1124_v18, %v5839_v0  ;;  %v1013_v22 = vadd.f32 %v1012_v19, %v5843_v2  ;;  %v1360_v18 = vunpack.c.l.bf16 %v4897_v57 }
 0x124   :  { %v1126_v26 = vpop.f32.mrf.mxu0  ;;  %v1014_v24 = vpop.f32.mrf.mxu1 }
 0x125   :  { %v5892_v27 = vpack.c.bf16 %v1125_v20, %v1123_v17  ;;  %v1015_v10 = vadd.f32 %v1014_v24, %v5848_v11  ;;  %v1361_v26 = vunpack.c.h.bf16 %v4897_v57 }
 0x126   :  { %v1127_v30 = vpop.f32.mrf.mxu0  ;;  %v1016_v31 = vpop.f32.mrf.mxu1 }
 0x127   :  { %v5899_v37 = vpack.c.bf16 %v1015_v10, %v1013_v22 }
 0x128   :  { %v1273_v39 = vpop.f32.mrf.mxu0  ;;  %v1017_v40 = vpop.f32.mrf.mxu1 }
 0x129   :  { %v1274_v41 = vadd.f32 %v1273_v39, %v5834_v61 }
 0x12a   :  { %v1275_v25 = vpop.f32.mrf.mxu0  ;;  %v1163_v47 = vpop.f32.mrf.mxu1 }
 0x12b   :  { %v1276_v1 = vadd.f32 %v1275_v25, %v5839_v0  ;;  %v1164_v5 = vadd.f32 %v1163_v47, %v5843_v2 }
 0x12c   :  { %v1277_v12 = vpop.f32.mrf.mxu0  ;;  %v1165_v14 = vpop.f32.mrf.mxu1 }
 0x12d   :  { %v5904_v16 = vpack.c.bf16 %v1276_v1, %v1274_v41  ;;  %v1166_v56 = vadd.f32 %v1165_v14, %v5848_v11  ;;  %v1363_v1 = vunpack.c.h.bf16 %v5855_v21  ;;  %v1362_v12 = vunpack.c.l.bf16 %v5855_v21 }
 0x12e   :  { %v1278_v59 = vpop.f32.mrf.mxu0  ;;  %v1167_v17 = vpop.f32.mrf.mxu1 }
 0x12f   :  { %v5907_v19 = vpack.c.bf16 %v1166_v56, %v1164_v5 }
 0x130   :  { %v1434_v20 = vpop.f32.mrf.mxu0  ;;  %v1168_v61 = vpop.f32.mrf.mxu1 }
 0x131   :  { %v1510_v22 = vadd.f32 %v1434_v20, %v1360_v18  ;;  %v1357_v61 = vld [vmem:[#allocation5] sm:$0xff] }
 0x132   :  { %v1436_v24 = vpop.f32.mrf.mxu0  ;;  %v1314_v10 = vpop.f32.mrf.mxu1 }
 0x133   :  { %v4783_v0 = vmul.f32 -1.442695, %v1510_v22  ;;  %v1511_v30 = vadd.f32 %v1436_v24, %v1361_v26  ;;  %v1315_v31 = vadd.f32 %v1314_v10, %v5843_v2 }
 0x134   :  { %v1316_v35 = vpop.f32.mrf.mxu1 }
 0x135   :  { %4964 = vpow2.f32 %v4783_v0  ;;  %v4784_v36 = vmul.f32 -1.442695, %v1511_v30  ;;  %v1317_v39 = vadd.f32 %v1316_v35, %v5848_v11 }
 0x136   :  { %v1318_v40 = vpop.f32.mrf.mxu1 }
 0x137   :  { %4966 = vpow2.f32 %v4784_v36  ;;  %v5911_v41 = vpack.c.bf16 %v1317_v39, %v1315_v31  ;;  %v1541_v36 = vunpack.c.l.bf16 %v5852_v60 }
 0x138   :  { %v1319_v25 = vpop.f32.mrf.mxu1 }
 0x139   :  { %v1542_v25 = vunpack.c.h.bf16 %v5852_v60 }
 0x13a   :  { %v1505_v47 = vpop.f32.mrf.mxu1 }
 0x13b   :  { %v1512_v2 = vadd.f32 %v1505_v47, %v1362_v12 }
 0x13c   :  { %v1507_v57 = vpop.f32.mrf.mxu1 }
 0x13d   :  { %v1513_v5 = vadd.f32 %v1507_v57, %v1363_v1 }
 0x13f   :  { %v4785_v14 = vmul.f32 -1.442695, %v1513_v5 }
 0x141   :  { %4968 = vpow2.f32 %v4785_v14 }
 0x142   :  { %v4965_v56 = vpop.eup %4964 }
 0x143   :  { %v1517_v59 = vadd.f32 1.0, %v4965_v56  ;;  %v1544_v56 = vunpack.c.h.bf16 %v5863_v38 }
 0x144   :  { %v4967_v17 = vpop.eup %4966 }
 0x145   :  { %4970 = vrcp.f32 %v1517_v59  ;;  %v1523_v11 = vadd.f32 1.0, %v4967_v17  ;;  %v1543_v59 = vunpack.c.l.bf16 %v5863_v38 }
 0x146   :  { %4972 = vtanh.f32 %v1512_v2 }
 0x147   :  { %4974 = vrcp.f32 %v1523_v11 }
 0x14e   :  { %v4969_v18 = vpop.eup %4968 }
 0x14f   :  { %v1530_v24 = vadd.f32 1.0, %v4969_v18 }
 0x151   :  { %4976 = vrcp.f32 %v1530_v24 }
 0x152   :  { %v4971_v20 = vpop.eup %4970 }
 0x153   :  { %v4973_v22 = vpop.eup %4972 }
 0x154   :  { %v4975_v26 = vpop.eup %4974  ;;  %v1534_v0 = vmul.f32 %v4973_v22, %v4971_v20 }
 0x155   :  { %v1533_v10 = vmul.f32 %v4975_v26, %v1357_v61 }
 0x157   :  { %v1535_v30 = vadd.f32 %v1534_v0, %v1533_v10 }
 0x159   :  { %4978 = vtanh.f32 %v1535_v30 }
 0x15e   :  { %v4977_v21 = vpop.eup %4976 }
 0x166   :  { %v4979_v31 = vpop.eup %4978 }
 0x167   :  { %v1537_v35 = vmul.f32 %v4979_v31, %v4977_v21 }
 0x169   :  { %1538 = vst.msk [vmem:[#allocation3] sm:$0xff] %vm66_vm0, %v1537_v35  ;;  %4786 = vmatmul.mubr.msk.f32.vlgmr.msra.gmra.mxu0 %vm66_vm0, %v1537_v35  ;;  %4787 = vmatmul.mubr.msk.f32.vlgmr.msra.gmra.mxu1 %vm66_vm0, %v1537_v35 }
 0x16a   :  { %1754 = vmatpush1.msra.mxu0 %v5748_v42  ;;  %1825 = vmatpush1.msra.mxu1 %v5778_v48 }
 0x16b   :  { %1755 = vmatprep.subr.mxu0 %v5750_v43  ;;  %1826 = vmatprep.subr.mxu1 %v5781_v23 }
 0x16c   :  { %1756 = vmatpush1.msra.mxu0 %v5753_v33  ;;  %1827 = vmatpush1.msra.mxu1 %v5786_v49 }
 0x16d   :  { %1757 = vmatprep.subr.mxu0 %v5756_v6  ;;  %1828 = vmatprep.subr.mxu1 %v5790_v50 }
 0x16e   :  { %1758 = vmatpush1.msra.mxu0 %v5760_v44  ;;  %1829 = vmatpush1.msra.mxu1 %v5794_v52 }
 0x16f   :  { %1759 = vmatprep.subr.mxu0 %v5766_v45  ;;  %1830 = vmatprep.subr.mxu1 %v5798_v53 }
 0x170   :  { %1760 = vmatpush1.msra.mxu0 %v5770_v46  ;;  %1793 = vmatprep.mubr.f32.mxu0 %v5307_v7 }
 0x171   :  { %1831 = vmatpush1.msra.mxu1 %v5802_v54  ;;  %1864 = vmatprep.mubr.f32.mxu1 %v5307_v7 }
 0x172   :  { %1934 = vmatprep.subr.mxu0 %v5731_v29  ;;  %2005 = vmatprep.subr.mxu1 %v5763_v8 }
 0x229   :  { %v1614_v39 = vpop.f32.mrf.mxu0  ;;  %v1685_v5 = vpop.f32.mrf.mxu1 }
 0x22a   :  { %v1690_v40 = vadd.f32 %v1614_v39, %v1541_v36  ;;  %v1692_v17 = vadd.f32 %v1685_v5, %v1543_v59 }
 0x22b   :  { %v1616_v47 = vpop.f32.mrf.mxu0  ;;  %v1687_v14 = vpop.f32.mrf.mxu1 }
 0x22c   :  { %v4788_v1 = vmul.f32 -1.442695, %v1690_v40  ;;  %v1691_v57 = vadd.f32 %v1616_v47, %v1542_v25  ;;  %v1693_v2 = vadd.f32 %v1687_v14, %v1544_v56  ;;  %v1723_v47 = vunpack.c.h.bf16 %v5860_v34 }
 0x22e   :  { %4980 = vpow2.f32 %v4788_v1  ;;  %v4789_v12 = vmul.f32 -1.442695, %v1691_v57  ;;  %v4790_v11 = vmul.f32 -1.442695, %v1693_v2  ;;  %v1725_v2 = vunpack.c.h.bf16 %v5871_v15 }
 0x230   :  { %4982 = vpow2.f32 %v4789_v12 }
 0x231   :  { %4984 = vtanh.f32 %v1692_v17  ;;  %v1724_v17 = vunpack.c.l.bf16 %v5871_v15 }
 0x232   :  { %4986 = vpow2.f32 %v4790_v11 }
 0x23b   :  { %v4981_v18 = vpop.eup %4980 }
 0x23c   :  { %v1697_v20 = vadd.f32 1.0, %v4981_v18 }
 0x23d   :  { %v4983_v61 = vpop.eup %4982 }
 0x23e   :  { %4988 = vrcp.f32 %v1697_v20  ;;  %v1703_v60 = vadd.f32 1.0, %v4983_v61  ;;  %v4985_v22 = vpop.eup %4984 }
 0x23f   :  { %v4987_v26 = vpop.eup %4986 }
 0x240   :  { %4990 = vrcp.f32 %v1703_v60  ;;  %v1710_v21 = vadd.f32 1.0, %v4987_v26 }
 0x242   :  { %4992 = vrcp.f32 %v1710_v21 }
 0x24b   :  { %v4989_v24 = vpop.eup %4988 }
 0x24c   :  { %v1714_v10 = vmul.f32 %v4989_v24, %v4985_v22 }
 0x24d   :  { %v4991_v0 = vpop.eup %4990 }
 0x24e   :  { %v1713_v31 = vmul.f32 %v4991_v0, %v1535_v30  ;;  %v1722_v30 = vunpack.c.l.bf16 %v5860_v34 }
 0x24f   :  { %v4993_v38 = vpop.eup %4992 }
 0x250   :  { %v1715_v35 = vadd.f32 %v1714_v10, %v1713_v31 }
 0x252   :  { %4994 = vtanh.f32 %v1715_v35 }
 0x25f   :  { %v4995_v36 = vpop.eup %4994 }
 0x260   :  { %v1717_v39 = vmul.f32 %v4995_v36, %v4993_v38 }
 0x262   :  { %1719 = vst.msk [vmem:[#allocation3 + $0x8] sm:$0xff] %vm66_vm0, %v1717_v39  ;;  %4791 = vmatmul.mubr.msk.f32.vlgmr.msra.gmra.mxu0 %vm66_vm0, %v1717_v39  ;;  %4792 = vmatmul.mubr.msk.f32.vlgmr.msra.gmra.mxu1 %vm66_vm0, %v1717_v39 }
 0x263   :  { %1935 = vmatpush1.msra.mxu0 %v5748_v42  ;;  %2006 = vmatpush1.msra.mxu1 %v5778_v48 }
 0x264   :  { %1936 = vmatprep.subr.mxu0 %v5750_v43  ;;  %2007 = vmatprep.subr.mxu1 %v5781_v23 }
 0x265   :  { %1937 = vmatpush1.msra.mxu0 %v5753_v33  ;;  %2008 = vmatpush1.msra.mxu1 %v5786_v49 }
 0x266   :  { %1938 = vmatprep.subr.mxu0 %v5756_v6  ;;  %2009 = vmatprep.subr.mxu1 %v5790_v50 }
 0x267   :  { %1939 = vmatpush1.msra.mxu0 %v5760_v44  ;;  %2010 = vmatpush1.msra.mxu1 %v5794_v52 }
 0x268   :  { %1940 = vmatprep.subr.mxu0 %v5766_v45  ;;  %2011 = vmatprep.subr.mxu1 %v5798_v53 }
 0x269   :  { %1941 = vmatpush1.msra.mxu0 %v5770_v46  ;;  %1974 = vmatprep.mubr.f32.mxu0 %v5307_v7 }
 0x26a   :  { %2012 = vmatpush1.msra.mxu1 %v5802_v54  ;;  %2045 = vmatprep.mubr.f32.mxu1 %v5307_v7 }
 0x26b   :  { %2115 = vmatprep.subr.mxu0 %v5731_v29  ;;  %2186 = vmatprep.subr.mxu1 %v5763_v8 }
 0x322   :  { %v1795_v40 = vpop.f32.mrf.mxu0  ;;  %v1866_v12 = vpop.f32.mrf.mxu1 }
 0x323   :  { %v1871_v25 = vadd.f32 %v1795_v40, %v1722_v30  ;;  %v1873_v11 = vadd.f32 %v1866_v12, %v1724_v17 }
 0x324   :  { %v1797_v1 = vpop.f32.mrf.mxu0  ;;  %v1868_v56 = vpop.f32.mrf.mxu1 }
 0x325   :  { %v4793_v57 = vmul.f32 -1.442695, %v1871_v25  ;;  %v1872_v5 = vadd.f32 %v1797_v1, %v1723_v47  ;;  %v1874_v59 = vadd.f32 %v1868_v56, %v1725_v2  ;;  %v1904_v25 = vunpack.c.h.bf16 %v5868_v9 }
 0x326   :  { %v1906_v56 = vunpack.c.h.bf16 %v5879_v32 }
 0x327   :  { %4996 = vpow2.f32 %v4793_v57  ;;  %v4794_v14 = vmul.f32 -1.442695, %v1872_v5  ;;  %v4795_v18 = vmul.f32 -1.442695, %v1874_v59  ;;  %v1905_v59 = vunpack.c.l.bf16 %v5879_v32 }
 0x329   :  { %4998 = vpow2.f32 %v4794_v14 }
 0x32a   :  { %5000 = vtanh.f32 %v1873_v11 }
 0x32b   :  { %5002 = vpow2.f32 %v4795_v18 }
 0x334   :  { %v4997_v20 = vpop.eup %4996 }
 0x335   :  { %v1878_v61 = vadd.f32 1.0, %v4997_v20 }
 0x336   :  { %v4999_v60 = vpop.eup %4998 }
 0x337   :  { %5004 = vrcp.f32 %v1878_v61  ;;  %v1884_v34 = vadd.f32 1.0, %v4999_v60  ;;  %v5001_v22 = vpop.eup %5000 }
 0x338   :  { %v5003_v26 = vpop.eup %5002 }
 0x339   :  { %5006 = vrcp.f32 %v1884_v34  ;;  %v1891_v21 = vadd.f32 1.0, %v5003_v26 }
 0x33b   :  { %5008 = vrcp.f32 %v1891_v21 }
 0x344   :  { %v5005_v24 = vpop.eup %5004 }
 0x345   :  { %v1895_v10 = vmul.f32 %v5005_v24, %v5001_v22 }
 0x346   :  { %v5007_v0 = vpop.eup %5006 }
 0x347   :  { %v1894_v31 = vmul.f32 %v5007_v0, %v1715_v35  ;;  %v1903_v35 = vunpack.c.l.bf16 %v5868_v9 }
 0x348   :  { %v5009_v15 = vpop.eup %5008 }
 0x349   :  { %v1896_v38 = vadd.f32 %v1895_v10, %v1894_v31 }
 0x34b   :  { %5010 = vtanh.f32 %v1896_v38 }
 0x358   :  { %v5011_v36 = vpop.eup %5010 }
 0x359   :  { %v1898_v39 = vmul.f32 %v5011_v36, %v5009_v15 }
 0x35b   :  { %1900 = vst.msk [vmem:[#allocation3 + $0x10] sm:$0xff] %vm66_vm0, %v1898_v39  ;;  %4796 = vmatmul.mubr.msk.f32.vlgmr.msra.gmra.mxu0 %vm66_vm0, %v1898_v39  ;;  %4797 = vmatmul.mubr.msk.f32.vlgmr.msra.gmra.mxu1 %vm66_vm0, %v1898_v39 }
 0x35c   :  { %2116 = vmatpush1.msra.mxu0 %v5748_v42  ;;  %2187 = vmatpush1.msra.mxu1 %v5778_v48 }
 0x35d   :  { %2117 = vmatprep.subr.mxu0 %v5750_v43  ;;  %2188 = vmatprep.subr.mxu1 %v5781_v23 }
 0x35e   :  { %2118 = vmatpush1.msra.mxu0 %v5753_v33  ;;  %2189 = vmatpush1.msra.mxu1 %v5786_v49 }
 0x35f   :  { %2119 = vmatprep.subr.mxu0 %v5756_v6  ;;  %2190 = vmatprep.subr.mxu1 %v5790_v50 }
 0x360   :  { %2120 = vmatpush1.msra.mxu0 %v5760_v44  ;;  %2191 = vmatpush1.msra.mxu1 %v5794_v52 }
 0x361   :  { %2121 = vmatprep.subr.mxu0 %v5766_v45  ;;  %2192 = vmatprep.subr.mxu1 %v5798_v53 }
 0x362   :  { %2122 = vmatpush1.msra.mxu0 %v5770_v46  ;;  %2155 = vmatprep.mubr.f32.mxu0 %v5307_v7 }
 0x363   :  { %2193 = vmatpush1.msra.mxu1 %v5802_v54  ;;  %2226 = vmatprep.mubr.f32.mxu1 %v5307_v7 }
 0x364   :  { %2296 = vmatprep.subr.mxu0 %v5731_v29  ;;  %2367 = vmatprep.subr.mxu1 %v5763_v8 }
 0x41b   :  { %v1976_v30 = vpop.f32.mrf.mxu0  ;;  %v2047_v5 = vpop.f32.mrf.mxu1 }
 0x41c   :  { %v2052_v40 = vadd.f32 %v1976_v30, %v1903_v35  ;;  %v2054_v17 = vadd.f32 %v2047_v5, %v1905_v59  ;;  %v2085_v35 = vunpack.c.h.bf16 %v5876_v28  ;;  %v2087_v5 = vunpack.c.h.bf16 %v5887_v13 }
 0x41d   :  { %v1978_v47 = vpop.f32.mrf.mxu0  ;;  %v2049_v14 = vpop.f32.mrf.mxu1 }
 0x41e   :  { %v4798_v1 = vmul.f32 -1.442695, %v2052_v40  ;;  %v2053_v57 = vadd.f32 %v1978_v47, %v1904_v25  ;;  %v2055_v2 = vadd.f32 %v2049_v14, %v1906_v56  ;;  %v2086_v14 = vunpack.c.l.bf16 %v5887_v13 }
 0x420   :  { %5012 = vpow2.f32 %v4798_v1  ;;  %v4799_v12 = vmul.f32 -1.442695, %v2053_v57  ;;  %v4800_v11 = vmul.f32 -1.442695, %v2055_v2 }
 0x422   :  { %5014 = vpow2.f32 %v4799_v12 }
 0x423   :  { %5016 = vtanh.f32 %v2054_v17 }
 0x424   :  { %5018 = vpow2.f32 %v4800_v11 }
 0x42d   :  { %v5013_v18 = vpop.eup %5012 }
 0x42e   :  { %v2059_v20 = vadd.f32 1.0, %v5013_v18 }
 0x42f   :  { %v5015_v61 = vpop.eup %5014 }
 0x430   :  { %5020 = vrcp.f32 %v2059_v20  ;;  %v2065_v9 = vadd.f32 1.0, %v5015_v61  ;;  %v5017_v60 = vpop.eup %5016 }
 0x431   :  { %v5019_v34 = vpop.eup %5018 }
 0x432   :  { %5022 = vrcp.f32 %v2065_v9  ;;  %v2072_v10 = vadd.f32 1.0, %v5019_v34 }
 0x434   :  { %5024 = vrcp.f32 %v2072_v10 }
 0x43d   :  { %v5021_v22 = vpop.eup %5020 }
 0x43e   :  { %v2076_v26 = vmul.f32 %v5021_v22, %v5017_v60 }
 0x43f   :  { %v5023_v24 = vpop.eup %5022 }
 0x440   :  { %v2075_v0 = vmul.f32 %v5023_v24, %v1896_v38  ;;  %v2084_v38 = vunpack.c.l.bf16 %v5876_v28 }
 0x441   :  { %v5025_v32 = vpop.eup %5024 }
 0x442   :  { %v2077_v21 = vadd.f32 %v2076_v26, %v2075_v0 }
 0x444   :  { %5026 = vtanh.f32 %v2077_v21 }
 0x451   :  { %v5027_v31 = vpop.eup %5026 }
 0x452   :  { %v2079_v15 = vmul.f32 %v5027_v31, %v5025_v32  ;;  %v2268_v31 = vunpack.c.h.bf16 %v5899_v37 }
 0x454   :  { %2081 = vst.msk [vmem:[#allocation3 + $0x18] sm:$0xff] %vm66_vm0, %v2079_v15  ;;  %4801 = vmatmul.mubr.msk.f32.vlgmr.msra.gmra.mxu0 %vm66_vm0, %v2079_v15  ;;  %4802 = vmatmul.mubr.msk.f32.vlgmr.msra.gmra.mxu1 %vm66_vm0, %v2079_v15 }
 0x455   :  { %2297 = vmatpush1.msra.mxu0 %v5748_v42  ;;  %2368 = vmatpush1.msra.mxu1 %v5778_v48 }
 0x456   :  { %2298 = vmatprep.subr.mxu0 %v5750_v43  ;;  %2369 = vmatprep.subr.mxu1 %v5781_v23 }
 0x457   :  { %2299 = vmatpush1.msra.mxu0 %v5753_v33  ;;  %2370 = vmatpush1.msra.mxu1 %v5786_v49 }
 0x458   :  { %2300 = vmatprep.subr.mxu0 %v5756_v6  ;;  %2371 = vmatprep.subr.mxu1 %v5790_v50 }
 0x459   :  { %2301 = vmatpush1.msra.mxu0 %v5760_v44  ;;  %2372 = vmatpush1.msra.mxu1 %v5794_v52 }
 0x45a   :  { %2302 = vmatprep.subr.mxu0 %v5766_v45  ;;  %2373 = vmatprep.subr.mxu1 %v5798_v53 }
 0x45b   :  { %2303 = vmatpush1.msra.mxu0 %v5770_v46  ;;  %2336 = vmatprep.mubr.f32.mxu0 %v5307_v7 }
 0x45c   :  { %2374 = vmatpush1.msra.mxu1 %v5802_v54  ;;  %2407 = vmatprep.mubr.f32.mxu1 %v5307_v7 }
 0x45d   :  { %2477 = vmatprep.subr.mxu0 %v5731_v29  ;;  %2548 = vmatprep.subr.mxu1 %v5763_v8 }
 0x514   :  { %v2157_v36 = vpop.f32.mrf.mxu0  ;;  %v2228_v47 = vpop.f32.mrf.mxu1 }
 0x515   :  { %v2233_v39 = vadd.f32 %v2157_v36, %v2084_v38  ;;  %v2235_v56 = vadd.f32 %v2228_v47, %v2086_v14 }
 0x516   :  { %v2159_v30 = vpop.f32.mrf.mxu0  ;;  %v2230_v57 = vpop.f32.mrf.mxu1 }
 0x517   :  { %v4803_v40 = vmul.f32 -1.442695, %v2233_v39  ;;  %v2234_v25 = vadd.f32 %v2159_v30, %v2085_v35  ;;  %v2236_v12 = vadd.f32 %v2230_v57, %v2087_v5 }
 0x519   :  { %5028 = vpow2.f32 %v4803_v40  ;;  %v4804_v1 = vmul.f32 -1.442695, %v2234_v25  ;;  %v4805_v2 = vmul.f32 -1.442695, %v2236_v12 }
 0x51b   :  { %5030 = vpow2.f32 %v4804_v1 }
 0x51c   :  { %5032 = vtanh.f32 %v2235_v56 }
 0x51d   :  { %5034 = vpow2.f32 %v4805_v2  ;;  %v5220_v2 = vld [vmem:[#allocation6 + $0x60] sm:$0xff] }
 0x526   :  { %v5029_v59 = vpop.eup %5028 }
 0x527   :  { %v2240_v17 = vadd.f32 1.0, %v5029_v59  ;;  %v5221_v59 = vld [vmem:[#allocation6 + $0x48] sm:$0xff] }
 0x528   :  { %v5031_v11 = vpop.eup %5030 }
 0x529   :  { %5036 = vrcp.f32 %v2240_v17  ;;  %v2246_v28 = vadd.f32 1.0, %v5031_v11  ;;  %v5033_v18 = vpop.eup %5032  ;;  %v5222_v17 = vld [vmem:[#allocation6 + $0x40] sm:$0xff]  ;;  %v5223_v11 = vld [vmem:[#allocation6 + $0x28] sm:$0xff] }
 0x52a   :  { %v5035_v20 = vpop.eup %5034 }
 0x52b   :  { %5038 = vrcp.f32 %v2246_v28  ;;  %v2253_v34 = vadd.f32 1.0, %v5035_v20  ;;  %v5224_v28 = vld [vmem:[#allocation6 + $0x20] sm:$0xff] }
 0x52d   :  { %5040 = vrcp.f32 %v2253_v34 }
 0x536   :  { %v5037_v61 = vpop.eup %5036 }
 0x537   :  { %v2257_v9 = vmul.f32 %v5037_v61, %v5033_v18  ;;  %v5225_v18 = vld [vmem:[#allocation6 + $0x8] sm:$0xff] }
 0x538   :  { %v5039_v60 = vpop.eup %5038 }
 0x539   :  { %v2256_v22 = vmul.f32 %v5039_v60, %v2077_v21 }
 0x53a   :  { %v5041_v13 = vpop.eup %5040 }
 0x53b   :  { %v2258_v26 = vadd.f32 %v2257_v9, %v2256_v22 }
 0x53d   :  { %5042 = vtanh.f32 %v2258_v26 }
 0x54a   :  { %v5043_v24 = vpop.eup %5042 }
 0x54b   :  { %v2260_v10 = vmul.f32 %v5043_v24, %v5041_v13  ;;  %v2448_v24 = vunpack.c.l.bf16 %v5907_v19 }
 0x54d   :  { %2262 = vst.msk [vmem:[#allocation3 + $0x20] sm:$0xff] %vm66_vm0, %v2260_v10  ;;  %4806 = vmatmul.mubr.msk.f32.vlgmr.msra.gmra.mxu0 %vm66_vm0, %v2260_v10  ;;  %4807 = vmatmul.mubr.msk.f32.vlgmr.msra.gmra.mxu1 %vm66_vm0, %v2260_v10 }
 0x54e   :  { %2478 = vmatpush1.msra.mxu0 %v5748_v42  ;;  %2549 = vmatpush1.msra.mxu1 %v5778_v48  ;;  %v2265_v42 = vunpack.c.l.bf16 %v5884_v62 }
 0x54f   :  { %2479 = vmatprep.subr.mxu0 %v5750_v43  ;;  %2550 = vmatprep.subr.mxu1 %v5781_v23 }
 0x550   :  { %2480 = vmatpush1.msra.mxu0 %v5753_v33  ;;  %2551 = vmatpush1.msra.mxu1 %v5786_v49 }
 0x551   :  { %2481 = vmatprep.subr.mxu0 %v5756_v6  ;;  %2552 = vmatprep.subr.mxu1 %v5790_v50  ;;  %v2266_v6 = vunpack.c.h.bf16 %v5884_v62 }
 0x552   :  { %2482 = vmatpush1.msra.mxu0 %v5760_v44  ;;  %2553 = vmatpush1.msra.mxu1 %v5794_v52 }
 0x553   :  { %2483 = vmatprep.subr.mxu0 %v5766_v45  ;;  %2554 = vmatprep.subr.mxu1 %v5798_v53 }
 0x554   :  { %2484 = vmatpush1.msra.mxu0 %v5770_v46  ;;  %2517 = vmatprep.mubr.f32.mxu0 %v5307_v7 }
 0x555   :  { %2555 = vmatpush1.msra.mxu1 %v5802_v54  ;;  %2588 = vmatprep.mubr.f32.mxu1 %v5307_v7 }
 0x556   :  { %2658 = vmatprep.subr.mxu0 %v5731_v29  ;;  %2729 = vmatprep.subr.mxu1 %v5763_v8  ;;  %v2267_v29 = vunpack.c.l.bf16 %v5899_v37 }
 0x60d   :  { %v2338_v43 = vpop.f32.mrf.mxu0  ;;  %v2409_v46 = vpop.f32.mrf.mxu1 }
 0x60e   :  { %v2414_v33 = vadd.f32 %v2338_v43, %v2265_v42  ;;  %v2416_v8 = vadd.f32 %v2409_v46, %v2267_v29 }
 0x60f   :  { %v2340_v44 = vpop.f32.mrf.mxu0  ;;  %v2411_v32 = vpop.f32.mrf.mxu1 }
 0x610   :  { %v4808_v45 = vmul.f32 -1.442695, %v2414_v33  ;;  %v2415_v0 = vadd.f32 %v2340_v44, %v2266_v6  ;;  %v2417_v15 = vadd.f32 %v2411_v32, %v2268_v31 }
 0x612   :  { %5044 = vpow2.f32 %v4808_v45  ;;  %v4809_v21 = vmul.f32 -1.442695, %v2415_v0  ;;  %v4810_v38 = vmul.f32 -1.442695, %v2417_v15 }
 0x614   :  { %5046 = vpow2.f32 %v4809_v21 }
 0x615   :  { %5048 = vtanh.f32 %v2416_v8  ;;  %v4950_v8 = vld [vmem:[%s6451_s4 + $0x20] ss:$16 sps:$4 sm:$0xff]  }
 0x616   :  { %5050 = vpow2.f32 %v4810_v38  ;;  %v4953_v38 = vld [vmem:[%s6451_s4 + $0x28] ss:$16 sps:$4 sm:$0xff]  }
 0x61f   :  { %v5045_v36 = vpop.eup %5044 }
 0x620   :  { %v2421_v39 = vadd.f32 1.0, %v5045_v36 }
 0x621   :  { %v5047_v35 = vpop.eup %5046 }
 0x622   :  { %5052 = vrcp.f32 %v2421_v39  ;;  %v2427_v62 = vadd.f32 1.0, %v5047_v35  ;;  %v5049_v30 = vpop.eup %5048  ;;  %v4958_v39 = vld [vmem:[%s6451_s4 + $0x4] ss:$16 sps:$4 sm:$0xff]   ;;  %v4961_v35 = vld [vmem:[%s6451_s4 + $0xc] ss:$16 sps:$4 sm:$0xff]  }
 0x623   :  { %v5051_v40 = vpop.eup %5050 }
 0x624   :  { %5054 = vrcp.f32 %v2427_v62  ;;  %v2434_v57 = vadd.f32 1.0, %v5051_v40  ;;  %v4956_v62 = vld [vmem:[%s6451_s4] ss:$16 sps:$4 sm:$0xff]   ;;  %v2818_v40 = vld [vmem:[#allocation3 + $0x8] sm:$0xff] }
 0x626   :  { %5056 = vrcp.f32 %v2434_v57  ;;  %v2819_v57 = vld [vmem:[#allocation3 + $0x10] sm:$0xff] }
 0x62f   :  { %v5053_v25 = vpop.eup %5052 }
 0x630   :  { %v2438_v47 = vmul.f32 %v5053_v25, %v5049_v30  ;;  %v4959_v30 = vld [vmem:[%s6451_s4 + $0x8] ss:$16 sps:$4 sm:$0xff]   ;;  %v2817_v25 = vld [vmem:[#allocation3] sm:$0xff] }
 0x631   :  { %v5055_v1 = vpop.eup %5054 }
 0x632   :  { %v2437_v5 = vmul.f32 %v5055_v1, %v2258_v26  ;;  %v2449_v26 = vunpack.c.h.bf16 %v5907_v19  ;;  %v2820_v1 = vld [vmem:[#allocation3 + $0x18] sm:$0xff] }
 0x633   :  { %v5057_v37 = vpop.eup %5056 }
 0x634   :  { %v6040_v12 = vadd.f32 %v2438_v47, %v2437_v5  ;;  %v2825_v47 = vpack.c.bf16 %v2818_v40, %v2817_v25  ;;  %v2826_v5 = vpack.c.bf16 %v2820_v1, %v2819_v57 }
 0x636   :  { %5058 = vtanh.f32 %v6040_v12 }
 0x643   :  { %v5059_v14 = vpop.eup %5058 }
 0x644   :  { %v2441_v56 = vmul.f32 %v5059_v14, %v5057_v37  ;;  %v2821_v37 = vld [vmem:[#allocation3 + $0x20] sm:$0xff] }
 0x646   :  { %2443 = vst.msk [vmem:[#allocation3 + $0x28] sm:$0xff] %vm66_vm0, %v2441_v56  ;;  %4811 = vmatmul.mubr.msk.f32.vlgmr.msra.gmra.mxu0 %vm66_vm0, %v2441_v56  ;;  %4812 = vmatmul.mubr.msk.f32.vlgmr.msra.gmra.mxu1 %vm66_vm0, %v2441_v56  ;;  %v6104_v56 = vld [vmem:[#allocation9 + $0x68] sm:$0xff] }
 0x647   :  { %2659 = vmatpush1.msra.mxu0 %v5220_v2  ;;  %2730 = vmatpush1.msra.mxu1 %v5778_v48  ;;  %v5226_v48 = vld [vmem:[#allocation6] sm:$0xff] }
 0x648   :  { %2660 = vmatprep.subr.mxu0 %v5221_v59  ;;  %2731 = vmatprep.subr.mxu1 %v5781_v23  ;;  %v4952_v23 = vld [vmem:[%s6451_s4 + $0x24] ss:$16 sps:$4 sm:$0xff]   ;;  %v6108_v59 = vld [vmem:[#allocation9 + $0x48] sm:$0xff] }
 0x649   :  { %2661 = vmatpush1.msra.mxu0 %v5222_v17  ;;  %2732 = vmatpush1.msra.mxu1 %v5786_v49  ;;  %v4955_v49 = vld [vmem:[%s6451_s4 + $0x2c] ss:$16 sps:$4 sm:$0xff]   ;;  %v6106_v2 = vld [vmem:[#allocation9 + $0x60] sm:$0xff] }
 0x64a   :  { %2662 = vmatprep.subr.mxu0 %v5223_v11  ;;  %2733 = vmatprep.subr.mxu1 %v5790_v50  ;;  %v2446_v50 = vunpack.c.l.bf16 %v5892_v27  ;;  %v6111_v17 = vld [vmem:[#allocation9 + $0x40] sm:$0xff]  ;;  %v6114_v11 = vld [vmem:[#allocation9 + $0x28] sm:$0xff] }
 0x64b   :  { %2663 = vmatpush1.msra.mxu0 %v5224_v28  ;;  %2734 = vmatpush1.msra.mxu1 %v5794_v52  ;;  %v6116_v28 = vld [vmem:[#allocation9 + $0x78] sm:$0xff] }
 0x64c   :  { %2664 = vmatprep.subr.mxu0 %v5225_v18  ;;  %2735 = vmatprep.subr.mxu1 %v5798_v53  ;;  %v6118_v18 = vld [vmem:[#allocation9 + $0x70] sm:$0xff] }
 0x64d   :  { %2665 = vmatpush1.msra.mxu0 %v5226_v48  ;;  %2736 = vmatpush1.msra.mxu1 %v5802_v54  ;;  %v2447_v54 = vunpack.c.h.bf16 %v5892_v27  ;;  %v6126_v48 = vld [vmem:[#allocation9 + $0x8] sm:$0xff] }
 0x64e   :  { %2698 = vmatprep.mubr.f32.mxu0 %v5307_v7  ;;  %2769 = vmatprep.mubr.f32.mxu1 %v5307_v7 }
 0x64f   :  { %2914 = vmatprep.subr.bf16.mxu0 %v4952_v23  ;;  %2987 = vmatprep.subr.bf16.mxu1 %v4955_v49  ;;  %v6131_v23 = vld [vmem:[#allocation9] sm:$0xff]  ;;  %v6133_v49 = vld [vmem:[#allocation9 + $0x58] sm:$0xff] }
 0x706   :  { %v2519_v52 = vpop.f32.mrf.mxu0  ;;  %v2590_v60 = vpop.f32.mrf.mxu1 }
 0x707   :  { %v2595_v53 = vadd.f32 %v2519_v52, %v2446_v50  ;;  %v2597_v10 = vadd.f32 %v2590_v60, %v2448_v24  ;;  %v6135_v50 = vld [vmem:[#allocation9 + $0x50] sm:$0xff]  ;;  %v6139_v52 = vld [vmem:[#allocation9 + $0x38] sm:$0xff] }
 0x708   :  { %v2521_v20 = vpop.f32.mrf.mxu0  ;;  %v2592_v22 = vpop.f32.mrf.mxu1 }
 0x709   :  { %v4813_v61 = vmul.f32 -1.442695, %v2595_v53  ;;  %v2596_v9 = vadd.f32 %v2521_v20, %v2447_v54  ;;  %v2598_v13 = vadd.f32 %v2592_v22, %v2449_v26  ;;  %v6141_v53 = vld [vmem:[#allocation9 + $0x30] sm:$0xff]  ;;  %v6144_v54 = vld [vmem:[#allocation9 + $0x18] sm:$0xff] }
 0x70a   :  { %v6148_v20 = vld [vmem:[#allocation9 + $0x10] sm:$0xff] }
 0x70b   :  { %5060 = vpow2.f32 %v4813_v61  ;;  %v4814_v34 = vmul.f32 -1.442695, %v2596_v9  ;;  %v4815_v42 = vmul.f32 -1.442695, %v2598_v13  ;;  %v2627_v61 = vunpack.c.l.bf16 %v5904_v16 }
 0x70d   :  { %5062 = vpow2.f32 %v4814_v34  ;;  %v2628_v34 = vunpack.c.h.bf16 %v5904_v16 }
 0x70e   :  { %5064 = vtanh.f32 %v2597_v10 }
 0x70f   :  { %5066 = vpow2.f32 %v4815_v42 }
 0x718   :  { %v5061_v43 = vpop.eup %5060 }
 0x719   :  { %v2602_v33 = vadd.f32 1.0, %v5061_v43 }
 0x71a   :  { %v5063_v6 = vpop.eup %5062 }
 0x71b   :  { %5068 = vrcp.f32 %v2602_v33  ;;  %v2608_v27 = vadd.f32 1.0, %v5063_v6  ;;  %v5065_v44 = vpop.eup %5064  ;;  %v2630_v6 = vunpack.c.h.bf16 %v5911_v41 }
 0x71c   :  { %v5067_v45 = vpop.eup %5066 }
 0x71d   :  { %5070 = vrcp.f32 %v2608_v27  ;;  %v2615_v32 = vadd.f32 1.0, %v5067_v45  ;;  %v2816_v27 = vld [vmem:[%s6453_s6] sm:$0xf]  ;;  %v2629_v45 = vunpack.c.l.bf16 %v5911_v41 }
 0x71f   :  { %5072 = vrcp.f32 %v2615_v32  ;;  %v6171_v32 = vrot.slane %v2816_v27, %v92_v55 }
 0x728   :  { %v5069_v0 = vpop.eup %5068 }
 0x729   :  { %v2619_v46 = vmul.f32 %v5069_v0, %v5065_v44 }
 0x72a   :  { %v5071_v21 = vpop.eup %5070 }
 0x72b   :  { %v2618_v31 = vmul.f32 %v5071_v21, %v6040_v12  ;;  %v2822_v12 = vld [vmem:[#allocation3 + $0x28] sm:$0xff] }
 0x72c   :  { %v5073_v19 = vpop.eup %5072  ;;  %v2827_v14 = vpack.c.bf16 %v2822_v12, %v2821_v37 }
 0x72d   :  { %v6066_v15 = vadd.f32 %v2619_v46, %v2618_v31  ;;  %v6175_v31 = vrot.slane %v2816_v27, %v100_v51 }
 0x72f   :  { %5074 = vtanh.f32 %v6066_v15 }
 0x73c   :  { %v5075_v29 = vpop.eup %5074 }
 0x73d   :  { %v2622_v36 = vmul.f32 %v5075_v29, %v5073_v19  ;;  %v6179_v19 = vrot.slane %v2816_v27, %v96_v58  ;;  %v6183_v29 = vrot.slane %v2816_v27, %v104_v63 }
 0x73f   :  { %2624 = vst.msk [vmem:[#allocation3 + $0x30] sm:$0xff] %vm66_vm0, %v2622_v36  ;;  %4816 = vmatmul.mubr.msk.f32.vlgmr.msra.gmra.mxu0 %vm66_vm0, %v2622_v36  ;;  %4817 = vmatmul.mubr.msk.f32.vlgmr.msra.gmra.mxu1 %vm66_vm0, %v2622_v36 }
 0x740   :  { %2915 = vmatpush1.bf16.msra.mxu0 %v4950_v8  ;;  %2988 = vmatpush1.bf16.msra.mxu1 %v4953_v38 }
 0x741   :  { %2916 = vmatprep.subr.bf16.mxu0 %v4958_v39  ;;  %2989 = vmatprep.subr.bf16.mxu1 %v4961_v35 }
 0x742   :  { %2934 = vmatprep.mubr.bf16.mxu0 %v5306_v3  ;;  %3007 = vmatprep.mubr.bf16.mxu1 %v5306_v3 }
 0x744   :  { %2917 = vmatpush1.bf16.msra.mxu0 %v4956_v62  ;;  %2990 = vmatpush1.bf16.msra.mxu1 %v4959_v30 }
 0x745   :  { %3245 = vmatprep.subr.mxu0 %v6104_v56  ;;  %3316 = vmatprep.subr.mxu1 %v6116_v28 }
 0x747   :  { %4829 = vmatmul.mubr.msk.bf16.vlgmr.msra.gmra.mxu0 %vm66_vm0, %v2825_v47  ;;  %4833 = vmatmul.mubr.msk.bf16.vlgmr.msra.gmra.mxu1 %vm66_vm0, %v2825_v47 }
 0x748   :  { %2944 = vmatprep.mubr.bf16.mxu0 %v5306_v3  ;;  %3017 = vmatprep.mubr.bf16.mxu1 %v5306_v3 }
 0x749   :  { %3246 = vmatpush1.msra.mxu0 %v6106_v2  ;;  %3317 = vmatpush1.msra.mxu1 %v6118_v18 }
 0x74a   :  { %3247 = vmatprep.subr.mxu0 %v6108_v59  ;;  %3318 = vmatprep.subr.mxu1 %v6133_v49 }
 0x74b   :  { %3248 = vmatpush1.msra.mxu0 %v6111_v17  ;;  %3319 = vmatpush1.msra.mxu1 %v6135_v50 }
 0x74c   :  { %3249 = vmatprep.subr.mxu0 %v6114_v11  ;;  %3320 = vmatprep.subr.mxu1 %v6139_v52 }
 0x74d   :  { %3321 = vmatpush1.msra.mxu1 %v6141_v53 }
 0x74e   :  { %3322 = vmatprep.subr.mxu1 %v6144_v54 }
 0x74f   :  { %4830 = vmatmul.mubr.msk.bf16.gmra.mxu0 %vm66_vm0, %v2826_v5  ;;  %4834 = vmatmul.mubr.msk.bf16.gmra.mxu1 %vm66_vm0, %v2826_v5 }
 0x750   :  { %2954 = vmatprep.mubr.bf16.mxu0 %v5306_v3  ;;  %3027 = vmatprep.mubr.bf16.mxu1 %v5306_v3 }
 0x751   :  { %3323 = vmatpush1.msra.mxu1 %v6148_v20 }
 0x752   :  { %3495 = vmatprep.subr.mxu1 %v6116_v28 }
 0x757   :  { %4831 = vmatmul.mubr.msk.bf16.gmra.mxu0 %vm66_vm0, %v2827_v14  ;;  %4835 = vmatmul.mubr.msk.bf16.gmra.mxu1 %vm66_vm0, %v2827_v14 }
 0x758   :  { %2964 = vmatprep.mubr.bf16.mxu0 %v5306_v3  ;;  %3037 = vmatprep.mubr.bf16.mxu1 %v5306_v3  ;;  %v6121_v3 = vld [vmem:[#allocation9 + $0x20] sm:$0xff] }
 0x759   :  { %3250 = vmatpush1.msra.mxu0 %v6121_v3 }
 0x75a   :  { %3251 = vmatprep.subr.mxu0 %v6126_v48 }
 0x75b   :  { %3252 = vmatpush1.msra.mxu0 %v6131_v23 }
 0x75c   :  { %3424 = vmatprep.subr.mxu0 %v6104_v56 }
 0x7ff   :  { %v2700_v9 = vpop.f32.mrf.mxu0  ;;  %v2771_v22 = vpop.f32.mrf.mxu1 }
 0x800   :  { %v2776_v60 = vadd.f32 %v2700_v9, %v2627_v61  ;;  %v2778_v41 = vadd.f32 %v2771_v22, %v2629_v45 }
 0x801   :  { %v2702_v26 = vpop.f32.mrf.mxu0  ;;  %v2773_v42 = vpop.f32.mrf.mxu1 }
 0x802   :  { %v4818_v13 = vmul.f32 -1.442695, %v2776_v60  ;;  %v2777_v24 = vadd.f32 %v2702_v26, %v2628_v34  ;;  %v2779_v0 = vadd.f32 %v2773_v42, %v2630_v6 }
 0x804   :  { %5076 = vpow2.f32 %v4818_v13  ;;  %v4819_v10 = vmul.f32 -1.442695, %v2777_v24  ;;  %v4820_v35 = vmul.f32 -1.442695, %v2779_v0 }
 0x806   :  { %5078 = vpow2.f32 %v4819_v10 }
 0x807   :  { %v6156_v43 = vpop.f32.mrf.mxu0  ;;  %v6158_v33 = vpop.f32.mrf.mxu1  ;;  %5080 = vtanh.f32 %v2778_v41 }
 0x808   :  { %5082 = vpow2.f32 %v4820_v35 }
 0x809   :  { %v6164_v44 = vpop.f32.mrf.mxu0  ;;  %v6166_v16 = vpop.f32.mrf.mxu1 }
 0x80b   :  { %v2940_v46 = vpop.f32.mrf.mxu0  ;;  %v3013_v21 = vpop.f32.mrf.mxu1 }
 0x80c   :  { %v2941_v36 = vadd.f32 %v2940_v46, %v6171_v32  ;;  %v3014_v55 = vadd.f32 %v3013_v21, %v6175_v31 }
 0x80d   :  { %v2942_v8 = vpop.f32.mrf.mxu0  ;;  %v3015_v38 = vpop.f32.mrf.mxu1 }
 0x80e   :  { %v2943_v39 = vadd.f32 %v2942_v8, %v6179_v19  ;;  %v3016_v51 = vadd.f32 %v3015_v38, %v6183_v29 }
 0x80f   :  { %v2946_v62 = vpop.f32.mrf.mxu0  ;;  %v3019_v30 = vpop.f32.mrf.mxu1 }
 0x810   :  { %v6189_v58 = vpack.c.bf16 %v2943_v39, %v2941_v36  ;;  %v6191_v40 = vpack.c.bf16 %v3016_v51, %v3014_v55  ;;  %v2947_v63 = vadd.f32 %v2946_v62, %v6171_v32  ;;  %v3020_v57 = vadd.f32 %v3019_v30, %v6175_v31 }
 0x811   :  { %v5077_v4 = vpop.eup %5076  ;;  %v2948_v25 = vpop.f32.mrf.mxu0 }
 0x812   :  { %v3021_v47 = vpop.f32.mrf.mxu1  ;;  %v2783_v1 = vadd.f32 1.0, %v5077_v4  ;;  %v2949_v5 = vadd.f32 %v2948_v25, %v6179_v19 }
 0x813   :  { %v3022_v12 = vadd.f32 %v3021_v47, %v6183_v29  ;;  %v5079_v37 = vpop.eup %5078  ;;  %v2950_v14 = vpop.f32.mrf.mxu0 }
 0x814   :  { %v3023_v61 = vpop.f32.mrf.mxu1  ;;  %5084 = vrcp.f32 %v2783_v1  ;;  %v2789_v9 = vadd.f32 1.0, %v5079_v37  ;;  %v6197_v60 = vpack.c.bf16 %v2949_v5, %v2947_v63  ;;  %v2951_v22 = vadd.f32 %v2950_v14, %v6171_v32  ;;  %v5081_v51 = vpop.eup %5080 }
 0x815   :  { %v6199_v34 = vpack.c.bf16 %v3022_v12, %v3020_v57  ;;  %v2952_v26 = vpop.f32.mrf.mxu0  ;;  %v3024_v24 = vadd.f32 %v3023_v61, %v6175_v31  ;;  %v5083_v35 = vpop.eup %5082  ;;  %v2823_v12 = vld [vmem:[#allocation3 + $0x30] sm:$0xff] }
 0x816   :  { %v3025_v13 = vpop.f32.mrf.mxu1  ;;  %5086 = vrcp.f32 %v2789_v9  ;;  %v2953_v10 = vadd.f32 %v2952_v26, %v6179_v19  ;;  %v2796_v63 = vadd.f32 1.0, %v5083_v35 }
 0x817   :  { %v3026_v42 = vadd.f32 %v3025_v13, %v6183_v29  ;;  %v2956_v6 = vpop.f32.mrf.mxu0 }
 0x818   :  { %v3029_v27 = vpop.f32.mrf.mxu1  ;;  %v6205_v45 = vpack.c.bf16 %v2953_v10, %v2951_v22  ;;  %v2957_v41 = vadd.f32 %v2956_v6, %v6171_v32  ;;  %5088 = vrcp.f32 %v2796_v63  ;;  %v2939_v22 = vadd.f32 %v6164_v44, %v6179_v19 }
 0x819   :  { %v6207_v0 = vpack.c.bf16 %v3026_v42, %v3024_v24  ;;  %v2958_v46 = vpop.f32.mrf.mxu0  ;;  %v3030_v8 = vadd.f32 %v3029_v27, %v6175_v31  ;;  %v2937_v24 = vadd.f32 %v6156_v43, %v6171_v32 }
 0x81a   :  { %v3031_v21 = vpop.f32.mrf.mxu1  ;;  %v2959_v38 = vadd.f32 %v2958_v46, %v6179_v19 }
 0x81b   :  { %v3032_v36 = vadd.f32 %v3031_v21, %v6183_v29  ;;  %v6245_v61 = vpop.f32.mrf.mxu0  ;;  %v4913_v6 = vpack.c.bf16 %v2939_v22, %v2937_v24 }
 0x81c   :  { %v6213_v55 = vpack.c.bf16 %v2959_v38, %v2957_v41  ;;  %v6247_v9 = vpop.f32.mrf.mxu1 }
 0x81d   :  { %v6215_v39 = vpack.c.bf16 %v3032_v36, %v3030_v8  ;;  %v6251_v26 = vpop.f32.mrf.mxu0 }
 0x81e   :  { %v6253_v13 = vpop.f32.mrf.mxu1 }
 0x821   :  { %v5085_v62 = vpop.eup %5084 }
 0x822   :  { %v2800_v30 = vmul.f32 %v5085_v62, %v5081_v51 }
 0x823   :  { %v5087_v4 = vpop.eup %5086 }
 0x824   :  { %v2799_v25 = vmul.f32 %v5087_v4, %v6066_v15  ;;  %v3209_v15 = vld [vmem:[#allocation4 + $0x8] sm:$0xff] }
 0x825   :  { %v5089_v1 = vpop.eup %5088 }
 0x826   :  { %v2801_v47 = vadd.f32 %v2800_v30, %v2799_v25  ;;  %v3214_v30 = vunpack.c.l.bf16 %v4913_v6 }
 0x828   :  { %5090 = vtanh.f32 %v2801_v47  ;;  %2807 = vst.msk [vmem:[#allocation5] sm:$0xff] %vm66_vm0, %v2801_v47 }
 0x835   :  { %v5091_v57 = vpop.eup %5090 }
 0x836   :  { %v2803_v5 = vmul.f32 %v5091_v57, %v5089_v1 }
 0x838   :  { %2805 = vst.msk [vmem:[#allocation3 + $0x38] sm:$0xff] %vm66_vm0, %v2803_v5  ;;  %2806 = vst.msk [vmem:[#allocation4] sm:$0xff] %vm66_vm0, %v2803_v5 }
 0x83f   :  { %v2824_v37 = vld [vmem:[#allocation3 + $0x38] sm:$0xff] }
 0x840   :  { %v2828_v14 = vpack.c.bf16 %v2824_v37, %v2823_v12  ;;  %v3215_v37 = vunpack.c.h.bf16 %v4913_v6 }
 0x842   :  { %4832 = vmatmul.mubr.msk.bf16.gmra.mxu0 %vm66_vm0, %v2828_v14  ;;  %4836 = vmatmul.mubr.msk.bf16.gmra.mxu1 %vm66_vm0, %v2828_v14  ;;  %v3012_v14 = vadd.f32 %v6166_v16, %v6183_v29 }
 0x843   :  { %3285 = vmatprep.mubr.f32.mxu0 %v5307_v7  ;;  %3356 = vmatprep.mubr.f32.mxu1 %v5307_v7 }
 0x84a   :  { %4853 = vmatmul.mubr.msk.f32.vlgmr.msra.gmra.mxu0 %vm66_vm0, %v3209_v15  ;;  %4854 = vmatmul.mubr.msk.f32.vlgmr.msra.gmra.mxu1 %vm66_vm0, %v3209_v15 }
 0x84b   :  { %3425 = vmatpush1.msra.mxu0 %v6106_v2  ;;  %3496 = vmatpush1.msra.mxu1 %v6118_v18 }
 0x84c   :  { %3426 = vmatprep.subr.mxu0 %v6108_v59  ;;  %3497 = vmatprep.subr.mxu1 %v6133_v49 }
 0x84d   :  { %3427 = vmatpush1.msra.mxu0 %v6111_v17  ;;  %3498 = vmatpush1.msra.mxu1 %v6135_v50 }
 0x84e   :  { %3428 = vmatprep.subr.mxu0 %v6114_v11  ;;  %3499 = vmatprep.subr.mxu1 %v6139_v52 }
 0x84f   :  { %3429 = vmatpush1.msra.mxu0 %v6121_v3  ;;  %3500 = vmatpush1.msra.mxu1 %v6141_v53 }
 0x850   :  { %3430 = vmatprep.subr.mxu0 %v6126_v48  ;;  %3501 = vmatprep.subr.mxu1 %v6144_v54 }
 0x851   :  { %3431 = vmatpush1.msra.mxu0 %v6131_v23  ;;  %3464 = vmatprep.mubr.f32.mxu0 %v5307_v7 }
 0x852   :  { %3502 = vmatpush1.msra.mxu1 %v6148_v20  ;;  %3535 = vmatprep.mubr.f32.mxu1 %v5307_v7 }
 0x853   :  { %3603 = vmatprep.subr.mxu0 %v6104_v56  ;;  %3674 = vmatprep.subr.mxu1 %v6116_v28 }
 0x902   :  { %v2966_v10 = vpop.f32.mrf.mxu0  ;;  %v3039_v42 = vpop.f32.mrf.mxu1 }
 0x903   :  { %v2967_v21 = vadd.f32 %v2966_v10, %v6171_v32  ;;  %v3040_v41 = vadd.f32 %v3039_v42, %v6175_v31  ;;  %v3010_v10 = vadd.f32 %v6158_v33, %v6175_v31 }
 0x904   :  { %v2968_v27 = vpop.f32.mrf.mxu0  ;;  %v3041_v46 = vpop.f32.mrf.mxu1 }
 0x905   :  { %v2969_v8 = vadd.f32 %v2968_v27, %v6179_v19  ;;  %v3042_v44 = vadd.f32 %v3041_v46, %v6183_v29  ;;  %v4914_v46 = vpack.c.bf16 %v3012_v14, %v3010_v10 }
 0x906   :  { %v2970_v38 = vpop.f32.mrf.mxu0  ;;  %v3043_v36 = vpop.f32.mrf.mxu1 }
 0x907   :  { %v6261_v51 = vpack.c.bf16 %v2969_v8, %v2967_v21  ;;  %v6263_v35 = vpack.c.bf16 %v3042_v44, %v3040_v41  ;;  %v2971_v4 = vadd.f32 %v2970_v38, %v6171_v32  ;;  %v3044_v63 = vadd.f32 %v3043_v36, %v6175_v31 }
 0x908   :  { %v2972_v43 = vpop.f32.mrf.mxu0  ;;  %v3045_v62 = vpop.f32.mrf.mxu1  ;;  %v3217_v41 = vunpack.c.h.bf16 %v4914_v46  ;;  %v3216_v44 = vunpack.c.l.bf16 %v4914_v46 }
 0x909   :  { %v2973_v25 = vadd.f32 %v2972_v43, %v6179_v19  ;;  %v3046_v47 = vadd.f32 %v3045_v62, %v6183_v29 }
 0x90a   :  { %v3287_v1 = vpop.f32.mrf.mxu0  ;;  %v3358_v42 = vpop.f32.mrf.mxu1 }
 0x90b   :  { %v6269_v57 = vpack.c.bf16 %v2973_v25, %v2971_v4  ;;  %v6271_v5 = vpack.c.bf16 %v3046_v47, %v3044_v63  ;;  %v3363_v12 = vadd.f32 %v3287_v1, %v3214_v30  ;;  %v3365_v36 = vadd.f32 %v3358_v42, %v3216_v44  ;;  %v3211_v4 = vld [vmem:[#allocation5 + $0x8] sm:$0xff] }
 0x90c   :  { %v3289_v15 = vpop.f32.mrf.mxu0  ;;  %v3360_v21 = vpop.f32.mrf.mxu1 }
 0x90d   :  { %v4855_v22 = vmul.f32 -1.442695, %v3363_v12  ;;  %v3364_v24 = vadd.f32 %v3289_v15, %v3215_v37  ;;  %v3366_v8 = vadd.f32 %v3360_v21, %v3217_v41 }
 0x90f   :  { %5092 = vpow2.f32 %v4855_v22  ;;  %v4856_v27 = vmul.f32 -1.442695, %v3364_v24  ;;  %v4857_v38 = vmul.f32 -1.442695, %v3366_v8  ;;  %v3393_v24 = vunpack.c.l.bf16 %v6189_v58 }
 0x911   :  { %5094 = vpow2.f32 %v4856_v27  ;;  %v3394_v27 = vunpack.c.h.bf16 %v6189_v58 }
 0x912   :  { %5096 = vpow2.f32 %v4857_v38 }
 0x91c   :  { %v5093_v6 = vpop.eup %5092 }
 0x91d   :  { %v3370_v43 = vadd.f32 1.0, %v5093_v6  ;;  %v3396_v6 = vunpack.c.h.bf16 %v6191_v40 }
 0x91e   :  { %v5095_v16 = vpop.eup %5094 }
 0x91f   :  { %5098 = vrcp.f32 %v3370_v43  ;;  %v3376_v62 = vadd.f32 1.0, %v5095_v16  ;;  %v5097_v33 = vpop.eup %5096  ;;  %v3395_v43 = vunpack.c.l.bf16 %v6191_v40 }
 0x920   :  { %5100 = vtanh.f32 %v3365_v36  ;;  %v3383_v47 = vadd.f32 1.0, %v5097_v33 }
 0x921   :  { %5102 = vrcp.f32 %v3376_v62 }
 0x922   :  { %5104 = vrcp.f32 %v3383_v47 }
 0x92c   :  { %v5099_v30 = vpop.eup %5098 }
 0x92d   :  { %v5101_v63 = vpop.eup %5100 }
 0x92e   :  { %v5103_v25 = vpop.eup %5102  ;;  %v3387_v1 = vmul.f32 %v5101_v63, %v5099_v30 }
 0x92f   :  { %v3386_v12 = vmul.f32 %v5103_v25, %v3211_v4  ;;  %v5105_v14 = vpop.eup %5104 }
 0x931   :  { %v3388_v37 = vadd.f32 %v3387_v1, %v3386_v12 }
 0x933   :  { %5106 = vtanh.f32 %v3388_v37 }
 0x940   :  { %v5107_v15 = vpop.eup %5106 }
 0x941   :  { %v3390_v22 = vmul.f32 %v5107_v15, %v5105_v14 }
 0x943   :  { %4858 = vmatmul.mubr.msk.f32.vlgmr.msra.gmra.mxu0 %vm66_vm0, %v3390_v22  ;;  %4859 = vmatmul.mubr.msk.f32.vlgmr.msra.gmra.mxu1 %vm66_vm0, %v3390_v22 }
 0x944   :  { %3604 = vmatpush1.msra.mxu0 %v6106_v2  ;;  %3675 = vmatpush1.msra.mxu1 %v6118_v18 }
 0x945   :  { %3605 = vmatprep.subr.mxu0 %v6108_v59  ;;  %3676 = vmatprep.subr.mxu1 %v6133_v49 }
 0x946   :  { %3606 = vmatpush1.msra.mxu0 %v6111_v17  ;;  %3677 = vmatpush1.msra.mxu1 %v6135_v50 }
 0x947   :  { %3607 = vmatprep.subr.mxu0 %v6114_v11  ;;  %3678 = vmatprep.subr.mxu1 %v6139_v52 }
 0x948   :  { %3608 = vmatpush1.msra.mxu0 %v6121_v3  ;;  %3679 = vmatpush1.msra.mxu1 %v6141_v53 }
 0x949   :  { %3609 = vmatprep.subr.mxu0 %v6126_v48  ;;  %3680 = vmatprep.subr.mxu1 %v6144_v54 }
 0x94a   :  { %3610 = vmatpush1.msra.mxu0 %v6131_v23  ;;  %3643 = vmatprep.mubr.f32.mxu0 %v5307_v7 }
 0x94b   :  { %3681 = vmatpush1.msra.mxu1 %v6148_v20  ;;  %3714 = vmatprep.mubr.f32.mxu1 %v5307_v7 }
 0x94c   :  { %3782 = vmatprep.subr.mxu0 %v6104_v56  ;;  %3853 = vmatprep.subr.mxu1 %v6116_v28 }
 0xa03   :  { %v3466_v10 = vpop.f32.mrf.mxu0  ;;  %v3537_v8 = vpop.f32.mrf.mxu1 }
 0xa04   :  { %v3542_v42 = vadd.f32 %v3466_v10, %v3393_v24  ;;  %v3544_v16 = vadd.f32 %v3537_v8, %v3395_v43 }
 0xa05   :  { %v3468_v46 = vpop.f32.mrf.mxu0  ;;  %v3539_v38 = vpop.f32.mrf.mxu1 }
 0xa06   :  { %v4860_v21 = vmul.f32 -1.442695, %v3542_v42  ;;  %v3543_v41 = vadd.f32 %v3468_v46, %v3394_v27  ;;  %v3545_v36 = vadd.f32 %v3539_v38, %v3396_v6  ;;  %v3573_v46 = vunpack.c.h.bf16 %v6197_v60 }
 0xa08   :  { %5108 = vpow2.f32 %v4860_v21  ;;  %v4861_v44 = vmul.f32 -1.442695, %v3543_v41  ;;  %v4862_v62 = vmul.f32 -1.442695, %v3545_v36  ;;  %v3575_v36 = vunpack.c.h.bf16 %v6199_v34 }
 0xa0a   :  { %5110 = vpow2.f32 %v4861_v44 }
 0xa0b   :  { %5112 = vtanh.f32 %v3544_v16  ;;  %v3574_v16 = vunpack.c.l.bf16 %v6199_v34 }
 0xa0c   :  { %5114 = vpow2.f32 %v4862_v62 }
 0xa15   :  { %v5109_v33 = vpop.eup %5108 }
 0xa16   :  { %v3549_v30 = vadd.f32 1.0, %v5109_v33 }
 0xa17   :  { %v5111_v4 = vpop.eup %5110 }
 0xa18   :  { %5116 = vrcp.f32 %v3549_v30  ;;  %v3555_v58 = vadd.f32 1.0, %v5111_v4  ;;  %v5113_v63 = vpop.eup %5112 }
 0xa19   :  { %v5115_v25 = vpop.eup %5114 }
 0xa1a   :  { %5118 = vrcp.f32 %v3555_v58  ;;  %v3562_v14 = vadd.f32 1.0, %v5115_v25 }
 0xa1c   :  { %5120 = vrcp.f32 %v3562_v14 }
 0xa25   :  { %v5117_v47 = vpop.eup %5116 }
 0xa26   :  { %v3566_v1 = vmul.f32 %v5117_v47, %v5113_v63 }
 0xa27   :  { %v5119_v12 = vpop.eup %5118 }
 0xa28   :  { %v3565_v15 = vmul.f32 %v5119_v12, %v3388_v37  ;;  %v3572_v37 = vunpack.c.l.bf16 %v6197_v60 }
 0xa29   :  { %v5121_v40 = vpop.eup %5120 }
 0xa2a   :  { %v3567_v22 = vadd.f32 %v3566_v1, %v3565_v15 }
 0xa2c   :  { %5122 = vtanh.f32 %v3567_v22 }
 0xa39   :  { %v5123_v24 = vpop.eup %5122 }
 0xa3a   :  { %v3569_v10 = vmul.f32 %v5123_v24, %v5121_v40 }
 0xa3c   :  { %4863 = vmatmul.mubr.msk.f32.vlgmr.msra.gmra.mxu0 %vm66_vm0, %v3569_v10  ;;  %4864 = vmatmul.mubr.msk.f32.vlgmr.msra.gmra.mxu1 %vm66_vm0, %v3569_v10 }
 0xa3d   :  { %3783 = vmatpush1.msra.mxu0 %v6106_v2  ;;  %3854 = vmatpush1.msra.mxu1 %v6118_v18 }
 0xa3e   :  { %3784 = vmatprep.subr.mxu0 %v6108_v59  ;;  %3855 = vmatprep.subr.mxu1 %v6133_v49 }
 0xa3f   :  { %3785 = vmatpush1.msra.mxu0 %v6111_v17  ;;  %3856 = vmatpush1.msra.mxu1 %v6135_v50 }
 0xa40   :  { %3786 = vmatprep.subr.mxu0 %v6114_v11  ;;  %3857 = vmatprep.subr.mxu1 %v6139_v52 }
 0xa41   :  { %3787 = vmatpush1.msra.mxu0 %v6121_v3  ;;  %3858 = vmatpush1.msra.mxu1 %v6141_v53 }
 0xa42   :  { %3788 = vmatprep.subr.mxu0 %v6126_v48  ;;  %3859 = vmatprep.subr.mxu1 %v6144_v54 }
 0xa43   :  { %3789 = vmatpush1.msra.mxu0 %v6131_v23  ;;  %3822 = vmatprep.mubr.f32.mxu0 %v5307_v7 }
 0xa44   :  { %3860 = vmatpush1.msra.mxu1 %v6148_v20  ;;  %3893 = vmatprep.mubr.f32.mxu1 %v5307_v7 }
 0xa45   :  { %3961 = vmatprep.subr.mxu0 %v6104_v56  ;;  %4032 = vmatprep.subr.mxu1 %v6116_v28 }
 0xafc   :  { %v3645_v42 = vpop.f32.mrf.mxu0  ;;  %v3716_v44 = vpop.f32.mrf.mxu1 }
 0xafd   :  { %v3721_v27 = vadd.f32 %v3645_v42, %v3572_v37  ;;  %v3723_v62 = vadd.f32 %v3716_v44, %v3574_v16 }
 0xafe   :  { %v3647_v21 = vpop.f32.mrf.mxu0  ;;  %v3718_v6 = vpop.f32.mrf.mxu1 }
 0xaff   :  { %v4865_v41 = vmul.f32 -1.442695, %v3721_v27  ;;  %v3722_v8 = vadd.f32 %v3647_v21, %v3573_v46  ;;  %v3724_v43 = vadd.f32 %v3718_v6, %v3575_v36  ;;  %v3752_v27 = vunpack.c.h.bf16 %v6205_v45 }
 0xb00   :  { %v3754_v6 = vunpack.c.h.bf16 %v6207_v0 }
 0xb01   :  { %5124 = vpow2.f32 %v4865_v41  ;;  %v4866_v38 = vmul.f32 -1.442695, %v3722_v8  ;;  %v4867_v33 = vmul.f32 -1.442695, %v3724_v43  ;;  %v3753_v43 = vunpack.c.l.bf16 %v6207_v0 }
 0xb03   :  { %5126 = vpow2.f32 %v4866_v38 }
 0xb04   :  { %5128 = vtanh.f32 %v3723_v62 }
 0xb05   :  { %5130 = vpow2.f32 %v4867_v33 }
 0xb0e   :  { %v5125_v30 = vpop.eup %5124 }
 0xb0f   :  { %v3728_v4 = vadd.f32 1.0, %v5125_v30 }
 0xb10   :  { %v5127_v58 = vpop.eup %5126 }
 0xb11   :  { %5132 = vrcp.f32 %v3728_v4  ;;  %v3734_v60 = vadd.f32 1.0, %v5127_v58  ;;  %v5129_v63 = vpop.eup %5128 }
 0xb12   :  { %v5131_v25 = vpop.eup %5130 }
 0xb13   :  { %5134 = vrcp.f32 %v3734_v60  ;;  %v3741_v14 = vadd.f32 1.0, %v5131_v25 }
 0xb15   :  { %5136 = vrcp.f32 %v3741_v14 }
 0xb1e   :  { %v5133_v47 = vpop.eup %5132 }
 0xb1f   :  { %v3745_v1 = vmul.f32 %v5133_v47, %v5129_v63 }
 0xb20   :  { %v5135_v12 = vpop.eup %5134 }
 0xb21   :  { %v3744_v15 = vmul.f32 %v5135_v12, %v3567_v22  ;;  %v3751_v22 = vunpack.c.l.bf16 %v6205_v45 }
 0xb22   :  { %v5137_v34 = vpop.eup %5136 }
 0xb23   :  { %v3746_v40 = vadd.f32 %v3745_v1, %v3744_v15 }
 0xb25   :  { %5138 = vtanh.f32 %v3746_v40 }
 0xb32   :  { %v5139_v24 = vpop.eup %5138 }
 0xb33   :  { %v3748_v10 = vmul.f32 %v5139_v24, %v5137_v34 }
 0xb35   :  { %4868 = vmatmul.mubr.msk.f32.vlgmr.msra.gmra.mxu0 %vm66_vm0, %v3748_v10  ;;  %4869 = vmatmul.mubr.msk.f32.vlgmr.msra.gmra.mxu1 %vm66_vm0, %v3748_v10 }
 0xb36   :  { %3962 = vmatpush1.msra.mxu0 %v6106_v2  ;;  %4033 = vmatpush1.msra.mxu1 %v6118_v18 }
 0xb37   :  { %3963 = vmatprep.subr.mxu0 %v6108_v59  ;;  %4034 = vmatprep.subr.mxu1 %v6133_v49 }
 0xb38   :  { %3964 = vmatpush1.msra.mxu0 %v6111_v17  ;;  %4035 = vmatpush1.msra.mxu1 %v6135_v50 }
 0xb39   :  { %3965 = vmatprep.subr.mxu0 %v6114_v11  ;;  %4036 = vmatprep.subr.mxu1 %v6139_v52 }
 0xb3a   :  { %3966 = vmatpush1.msra.mxu0 %v6121_v3  ;;  %4037 = vmatpush1.msra.mxu1 %v6141_v53 }
 0xb3b   :  { %3967 = vmatprep.subr.mxu0 %v6126_v48  ;;  %4038 = vmatprep.subr.mxu1 %v6144_v54 }
 0xb3c   :  { %3968 = vmatpush1.msra.mxu0 %v6131_v23  ;;  %4001 = vmatprep.mubr.f32.mxu0 %v5307_v7 }
 0xb3d   :  { %4039 = vmatpush1.msra.mxu1 %v6148_v20  ;;  %4072 = vmatprep.mubr.f32.mxu1 %v5307_v7 }
 0xb3e   :  { %4140 = vmatprep.subr.mxu0 %v6104_v56  ;;  %4211 = vmatprep.subr.mxu1 %v6116_v28 }
 0xbf5   :  { %v3824_v37 = vpop.f32.mrf.mxu0  ;;  %v3895_v8 = vpop.f32.mrf.mxu1 }
 0xbf6   :  { %v3900_v42 = vadd.f32 %v3824_v37, %v3751_v22  ;;  %v3902_v16 = vadd.f32 %v3895_v8, %v3753_v43  ;;  %v3931_v22 = vunpack.c.h.bf16 %v6213_v55  ;;  %v3933_v8 = vunpack.c.h.bf16 %v6215_v39 }
 0xbf7   :  { %v3826_v46 = vpop.f32.mrf.mxu0  ;;  %v3897_v38 = vpop.f32.mrf.mxu1 }
 0xbf8   :  { %v4870_v21 = vmul.f32 -1.442695, %v3900_v42  ;;  %v3901_v41 = vadd.f32 %v3826_v46, %v3752_v27  ;;  %v3903_v36 = vadd.f32 %v3897_v38, %v3754_v6  ;;  %v3932_v38 = vunpack.c.l.bf16 %v6215_v39 }
 0xbfa   :  { %5140 = vpow2.f32 %v4870_v21  ;;  %v4871_v44 = vmul.f32 -1.442695, %v3901_v41  ;;  %v4872_v62 = vmul.f32 -1.442695, %v3903_v36 }
 0xbfc   :  { %5142 = vpow2.f32 %v4871_v44 }
 0xbfd   :  { %5144 = vtanh.f32 %v3902_v16 }
 0xbfe   :  { %5146 = vpow2.f32 %v4872_v62 }
 0xc07   :  { %v5141_v33 = vpop.eup %5140 }
 0xc08   :  { %v3907_v30 = vadd.f32 1.0, %v5141_v33 }
 0xc09   :  { %v5143_v4 = vpop.eup %5142 }
 0xc0a   :  { %5148 = vrcp.f32 %v3907_v30  ;;  %v3913_v45 = vadd.f32 1.0, %v5143_v4  ;;  %v5145_v58 = vpop.eup %5144 }
 0xc0b   :  { %v5147_v60 = vpop.eup %5146 }
 0xc0c   :  { %5150 = vrcp.f32 %v3913_v45  ;;  %v3920_v1 = vadd.f32 1.0, %v5147_v60 }
 0xc0e   :  { %5152 = vrcp.f32 %v3920_v1 }
 0xc17   :  { %v5149_v63 = vpop.eup %5148 }
 0xc18   :  { %v3924_v25 = vmul.f32 %v5149_v63, %v5145_v58 }
 0xc19   :  { %v5151_v47 = vpop.eup %5150 }
 0xc1a   :  { %v3923_v12 = vmul.f32 %v5151_v47, %v3746_v40  ;;  %v3930_v40 = vunpack.c.l.bf16 %v6213_v55 }
 0xc1b   :  { %v5153_v0 = vpop.eup %5152 }
 0xc1c   :  { %v3925_v14 = vadd.f32 %v3924_v25, %v3923_v12 }
 0xc1e   :  { %5154 = vtanh.f32 %v3925_v14 }
 0xc2b   :  { %v5155_v15 = vpop.eup %5154 }
 0xc2c   :  { %v3927_v34 = vmul.f32 %v5155_v15, %v5153_v0 }
 0xc2e   :  { %4873 = vmatmul.mubr.msk.f32.vlgmr.msra.gmra.mxu0 %vm66_vm0, %v3927_v34  ;;  %4874 = vmatmul.mubr.msk.f32.vlgmr.msra.gmra.mxu1 %vm66_vm0, %v3927_v34 }
 0xc2f   :  { %4141 = vmatpush1.msra.mxu0 %v6106_v2  ;;  %4212 = vmatpush1.msra.mxu1 %v6118_v18 }
 0xc30   :  { %4142 = vmatprep.subr.mxu0 %v6108_v59  ;;  %4213 = vmatprep.subr.mxu1 %v6133_v49 }
 0xc31   :  { %4143 = vmatpush1.msra.mxu0 %v6111_v17  ;;  %4214 = vmatpush1.msra.mxu1 %v6135_v50 }
 0xc32   :  { %4144 = vmatprep.subr.mxu0 %v6114_v11  ;;  %4215 = vmatprep.subr.mxu1 %v6139_v52 }
 0xc33   :  { %4145 = vmatpush1.msra.mxu0 %v6121_v3  ;;  %4216 = vmatpush1.msra.mxu1 %v6141_v53 }
 0xc34   :  { %4146 = vmatprep.subr.mxu0 %v6126_v48  ;;  %4217 = vmatprep.subr.mxu1 %v6144_v54 }
 0xc35   :  { %4147 = vmatpush1.msra.mxu0 %v6131_v23  ;;  %4180 = vmatprep.mubr.f32.mxu0 %v5307_v7 }
 0xc36   :  { %4218 = vmatpush1.msra.mxu1 %v6148_v20  ;;  %4251 = vmatprep.mubr.f32.mxu1 %v5307_v7 }
 0xc37   :  { %4319 = vmatprep.subr.mxu0 %v6104_v56  ;;  %4390 = vmatprep.subr.mxu1 %v6116_v28 }
 0xcee   :  { %v4003_v24 = vpop.f32.mrf.mxu0  ;;  %v4074_v46 = vpop.f32.mrf.mxu1 }
 0xcef   :  { %v4079_v10 = vadd.f32 %v4003_v24, %v3930_v40  ;;  %v4081_v6 = vadd.f32 %v4074_v46, %v3932_v38 }
 0xcf0   :  { %v4005_v37 = vpop.f32.mrf.mxu0  ;;  %v4076_v41 = vpop.f32.mrf.mxu1 }
 0xcf1   :  { %v4875_v42 = vmul.f32 -1.442695, %v4079_v10  ;;  %v4080_v27 = vadd.f32 %v4005_v37, %v3931_v22  ;;  %v4082_v44 = vadd.f32 %v4076_v41, %v3933_v8 }
 0xcf3   :  { %5156 = vpow2.f32 %v4875_v42  ;;  %v4876_v21 = vmul.f32 -1.442695, %v4080_v27  ;;  %v4877_v36 = vmul.f32 -1.442695, %v4082_v44 }
 0xcf5   :  { %5158 = vpow2.f32 %v4876_v21 }
 0xcf6   :  { %5160 = vtanh.f32 %v4081_v6  ;;  %v5227_v6 = vld [vmem:[#allocation9 + $0x60] sm:$0xff] }
 0xcf7   :  { %5162 = vpow2.f32 %v4877_v36  ;;  %v5228_v36 = vld [vmem:[#allocation9 + $0x70] sm:$0xff] }
 0xd00   :  { %v5157_v43 = vpop.eup %5156 }
 0xd01   :  { %v4086_v16 = vadd.f32 1.0, %v5157_v43  ;;  %v5229_v43 = vld [vmem:[#allocation9 + $0x48] sm:$0xff] }
 0xd02   :  { %v5159_v62 = vpop.eup %5158 }
 0xd03   :  { %5164 = vrcp.f32 %v4086_v16  ;;  %v4092_v55 = vadd.f32 1.0, %v5159_v62  ;;  %v5161_v33 = vpop.eup %5160  ;;  %v5230_v16 = vld [vmem:[#allocation9 + $0x40] sm:$0xff]  ;;  %v5231_v62 = vld [vmem:[#allocation9 + $0x28] sm:$0xff] }
 0xd04   :  { %v5163_v30 = vpop.eup %5162 }
 0xd05   :  { %5166 = vrcp.f32 %v4092_v55  ;;  %v4099_v60 = vadd.f32 1.0, %v5163_v30  ;;  %v5232_v55 = vld [vmem:[#allocation9 + $0x20] sm:$0xff] }
 0xd06   :  { %v5234_v30 = vld [vmem:[#allocation9] sm:$0xff] }
 0xd07   :  { %5168 = vrcp.f32 %v4099_v60 }
 0xd10   :  { %v5165_v4 = vpop.eup %5164 }
 0xd11   :  { %v4103_v45 = vmul.f32 %v5165_v4, %v5161_v33  ;;  %v5233_v33 = vld [vmem:[#allocation9 + $0x8] sm:$0xff] }
 0xd12   :  { %v5167_v58 = vpop.eup %5166 }
 0xd13   :  { %v4102_v63 = vmul.f32 %v5167_v58, %v3925_v14 }
 0xd14   :  { %v5169_v39 = vpop.eup %5168 }
 0xd15   :  { %v6373_v25 = vadd.f32 %v4103_v45, %v4102_v63 }
 0xd17   :  { %5170 = vtanh.f32 %v6373_v25 }
 0xd24   :  { %v5171_v47 = vpop.eup %5170 }
 0xd25   :  { %v4106_v1 = vmul.f32 %v5171_v47, %v5169_v39  ;;  %v4290_v39 = vunpack.c.l.bf16 %v6263_v35 }
 0xd27   :  { %4878 = vmatmul.mubr.msk.f32.vlgmr.msra.gmra.mxu0 %vm66_vm0, %v4106_v1  ;;  %4879 = vmatmul.mubr.msk.f32.vlgmr.msra.gmra.mxu1 %vm66_vm0, %v4106_v1 }
 0xd28   :  { %4320 = vmatpush1.msra.mxu0 %v6106_v2  ;;  %4391 = vmatpush1.msra.mxu1 %v6118_v18  ;;  %v2963_v2 = vadd.f32 %v6251_v26, %v6179_v19 }
 0xd29   :  { %4321 = vmatprep.subr.mxu0 %v6108_v59  ;;  %4392 = vmatprep.subr.mxu1 %v6133_v49  ;;  %v2961_v59 = vadd.f32 %v6245_v61, %v6171_v32 }
 0xd2a   :  { %4322 = vmatpush1.msra.mxu0 %v6111_v17  ;;  %4393 = vmatpush1.msra.mxu1 %v6135_v50 }
 0xd2b   :  { %4323 = vmatprep.subr.mxu0 %v6114_v11  ;;  %4394 = vmatprep.subr.mxu1 %v6139_v52  ;;  %v4923_v17 = vpack.c.bf16 %v2963_v2, %v2961_v59 }
 0xd2c   :  { %4324 = vmatpush1.msra.mxu0 %v6121_v3  ;;  %4395 = vmatpush1.msra.mxu1 %v6141_v53 }
 0xd2d   :  { %4325 = vmatprep.subr.mxu0 %v6126_v48  ;;  %4396 = vmatprep.subr.mxu1 %v6144_v54  ;;  %v4109_v11 = vunpack.c.l.bf16 %v4923_v17  ;;  %v4110_v48 = vunpack.c.h.bf16 %v4923_v17 }
 0xd2e   :  { %4326 = vmatpush1.msra.mxu0 %v6131_v23  ;;  %4359 = vmatprep.mubr.f32.mxu0 %v5307_v7  ;;  %v3036_v23 = vadd.f32 %v6253_v13, %v6183_v29 }
 0xd2f   :  { %4397 = vmatpush1.msra.mxu1 %v6148_v20  ;;  %4430 = vmatprep.mubr.f32.mxu1 %v5307_v7 }
 0xd30   :  { %4498 = vmatprep.subr.mxu0 %v6104_v56  ;;  %4569 = vmatprep.subr.mxu1 %v6116_v28  ;;  %v3034_v56 = vadd.f32 %v6247_v9, %v6175_v31 }
 0xd32   :  { %v4924_v26 = vpack.c.bf16 %v3036_v23, %v3034_v56 }
 0xd34   :  { %v4112_v61 = vunpack.c.h.bf16 %v4924_v26  ;;  %v4111_v34 = vunpack.c.l.bf16 %v4924_v26  ;;  %v4963_v26 = vld [vmem:[%s6454_s7] sm:$0xff]  }
 0xde7   :  { %v4182_v18 = vpop.f32.mrf.mxu0  ;;  %v4253_v28 = vpop.f32.mrf.mxu1 }
 0xde8   :  { %v4258_v3 = vadd.f32 %v4182_v18, %v4109_v11  ;;  %v4260_v40 = vadd.f32 %v4253_v28, %v4111_v34  ;;  %v4468_v34 = vunpack.c.h.bf16 %v6269_v57 }
 0xde9   :  { %v4184_v12 = vpop.f32.mrf.mxu0  ;;  %v4255_v32 = vpop.f32.mrf.mxu1 }
 0xdea   :  { %v4880_v14 = vmul.f32 -1.442695, %v4258_v3  ;;  %v4259_v0 = vadd.f32 %v4184_v12, %v4110_v48  ;;  %v4261_v15 = vadd.f32 %v4255_v32, %v4112_v61  ;;  %v4467_v32 = vunpack.c.l.bf16 %v6269_v57 }
 0xdec   :  { %5172 = vpow2.f32 %v4880_v14  ;;  %v4881_v19 = vmul.f32 -1.442695, %v4259_v0  ;;  %v4882_v24 = vmul.f32 -1.442695, %v4261_v15 }
 0xdee   :  { %5174 = vpow2.f32 %v4881_v19  ;;  %v4962_v19 = vld [vmem:[%s6454_s7 + $0x8] sm:$0xff]  }
 0xdef   :  { %5176 = vtanh.f32 %v4260_v40 }
 0xdf0   :  { %5178 = vpow2.f32 %v4882_v24 }
 0xdf9   :  { %v5173_v10 = vpop.eup %5172 }
 0xdfa   :  { %v4265_v22 = vadd.f32 1.0, %v5173_v10 }
 0xdfb   :  { %v5175_v29 = vpop.eup %5174 }
 0xdfc   :  { %5180 = vrcp.f32 %v4265_v22  ;;  %v4271_v13 = vadd.f32 1.0, %v5175_v29  ;;  %v5177_v31 = vpop.eup %5176 }
 0xdfd   :  { %v5179_v9 = vpop.eup %5178 }
 0xdfe   :  { %5182 = vrcp.f32 %v4271_v13  ;;  %v4278_v46 = vadd.f32 1.0, %v5179_v9 }
 0xe00   :  { %5184 = vrcp.f32 %v4278_v46 }
 0xe09   :  { %v5181_v37 = vpop.eup %5180 }
 0xe0a   :  { %v4282_v42 = vmul.f32 %v5181_v37, %v5177_v31  ;;  %v4470_v31 = vunpack.c.h.bf16 %v6271_v5 }
 0xe0b   :  { %v5183_v27 = vpop.eup %5182 }
 0xe0c   :  { %v4281_v21 = vmul.f32 %v5183_v27, %v6373_v25 }
 0xe0d   :  { %v5185_v8 = vpop.eup %5184 }
 0xe0e   :  { %v6405_v41 = vadd.f32 %v4282_v42, %v4281_v21 }
 0xe10   :  { %5186 = vtanh.f32 %v6405_v41 }
 0xe1d   :  { %v5187_v44 = vpop.eup %5186 }
 0xe1e   :  { %v4285_v38 = vmul.f32 %v5187_v44, %v5185_v8 }
 0xe20   :  { %4883 = vmatmul.mubr.msk.f32.vlgmr.msra.gmra.mxu0 %vm66_vm0, %v4285_v38  ;;  %4884 = vmatmul.mubr.msk.f32.vlgmr.msra.gmra.mxu1 %vm66_vm0, %v4285_v38 }
 0xe21   :  { %4499 = vmatpush1.msra.mxu0 %v5227_v6  ;;  %4570 = vmatpush1.msra.mxu1 %v5228_v36 }
 0xe22   :  { %4500 = vmatprep.subr.mxu0 %v5229_v43  ;;  %4571 = vmatprep.subr.mxu1 %v6133_v49  ;;  %v4288_v49 = vunpack.c.l.bf16 %v6261_v51 }
 0xe23   :  { %4501 = vmatpush1.msra.mxu0 %v5230_v16  ;;  %4572 = vmatpush1.msra.mxu1 %v6135_v50 }
 0xe24   :  { %4502 = vmatprep.subr.mxu0 %v5231_v62  ;;  %4573 = vmatprep.subr.mxu1 %v6139_v52 }
 0xe25   :  { %4503 = vmatpush1.msra.mxu0 %v5232_v55  ;;  %4574 = vmatpush1.msra.mxu1 %v6141_v53  ;;  %v4289_v53 = vunpack.c.h.bf16 %v6261_v51 }
 0xe26   :  { %4504 = vmatprep.subr.mxu0 %v5233_v33  ;;  %4575 = vmatprep.subr.mxu1 %v6144_v54 }
 0xe27   :  { %4505 = vmatpush1.msra.mxu0 %v5234_v30  ;;  %4538 = vmatprep.mubr.f32.mxu0 %v5307_v7  ;;  %v4893_v30 = vld [vmem:[%s6455_s8] ss:$0 sm:$0xff] }
 0xe28   :  { %4576 = vmatpush1.msra.mxu1 %v6148_v20  ;;  %4609 = vmatprep.mubr.f32.mxu1 %v5307_v7  ;;  %v4291_v20 = vunpack.c.h.bf16 %v6263_v35 }
 0xe29   :  { %4932 = vmatprep.subr.bf16.mxu0 %v5307_v7 }
 0xee0   :  { %v4361_v50 = vpop.f32.mrf.mxu0  ;;  %v4432_v54 = vpop.f32.mrf.mxu1 }
 0xee1   :  { %v4437_v52 = vadd.f32 %v4361_v50, %v4288_v49  ;;  %v4439_v47 = vadd.f32 %v4432_v54, %v4290_v39 }
 0xee2   :  { %v4363_v4 = vpop.f32.mrf.mxu0  ;;  %v4434_v63 = vpop.f32.mrf.mxu1 }
 0xee3   :  { %v4885_v45 = vmul.f32 -1.442695, %v4437_v52  ;;  %v4438_v58 = vadd.f32 %v4363_v4, %v4289_v53  ;;  %v4440_v25 = vadd.f32 %v4434_v63, %v4291_v20 }
 0xee5   :  { %5188 = vpow2.f32 %v4885_v45  ;;  %v4886_v60 = vmul.f32 -1.442695, %v4438_v58  ;;  %v4887_v1 = vmul.f32 -1.442695, %v4440_v25 }
 0xee7   :  { %5190 = vpow2.f32 %v4886_v60 }
 0xee8   :  { %5192 = vtanh.f32 %v4439_v47 }
 0xee9   :  { %5194 = vpow2.f32 %v4887_v1 }
 0xef2   :  { %v5189_v2 = vpop.eup %5188 }
 0xef3   :  { %v4444_v59 = vadd.f32 1.0, %v5189_v2 }
 0xef4   :  { %v5191_v17 = vpop.eup %5190 }
 0xef5   :  { %5196 = vrcp.f32 %v4444_v59  ;;  %v4450_v51 = vadd.f32 1.0, %v5191_v17  ;;  %v5193_v11 = vpop.eup %5192 }
 0xef6   :  { %v5195_v18 = vpop.eup %5194 }
 0xef7   :  { %5198 = vrcp.f32 %v4450_v51  ;;  %v4457_v12 = vadd.f32 1.0, %v5195_v18 }
 0xef9   :  { %5200 = vrcp.f32 %v4457_v12 }
 0xf02   :  { %v5197_v3 = vpop.eup %5196 }
 0xf03   :  { %v4461_v48 = vmul.f32 %v5197_v3, %v5193_v11 }
 0xf04   :  { %v5199_v23 = vpop.eup %5198 }
 0xf05   :  { %v4460_v14 = vmul.f32 %v5199_v23, %v6405_v41 }
 0xf06   :  { %v5201_v35 = vpop.eup %5200 }
 0xf07   :  { %v4462_v0 = vadd.f32 %v4461_v48, %v4460_v14 }
 0xf09   :  { %5202 = vtanh.f32 %v4462_v0 }
 0xf16   :  { %v5203_v56 = vpop.eup %5202 }
 0xf17   :  { %v4464_v28 = vmul.f32 %v5203_v56, %v5201_v35 }
 0xf19   :  { %4888 = vmatmul.mubr.msk.f32.vlgmr.msra.gmra.mxu0 %vm66_vm0, %v4464_v28  ;;  %4889 = vmatmul.mubr.msk.f32.vlgmr.msra.gmra.mxu1 %vm66_vm0, %v4464_v28 }
 0xf1a   :  { %4936 = vmatprep.mubr.msk.bf16.mxu0 %vm5308_vm10, %v5307_v7  ;;  %4933 = vmatpush3.bf16.msra.mxu0 %v4962_v19 }
 0xf1b   :  { %4934 = vmatprep.subr.bf16.mxu0 %v5307_v7  ;;  %v4469_v7 = vunpack.c.l.bf16 %v6271_v5 }
 0xf1e   :  { %4935 = vmatpush3.bf16.msra.mxu0 %v4963_v26 }
 0xfd9   :  { %v4540_v61 = vpop.f32.mrf.mxu0  ;;  %v4611_v22 = vpop.f32.mrf.mxu1 }
 0xfda   :  { %v4616_v15 = vadd.f32 %v4540_v61, %v4467_v32  ;;  %v4618_v37 = vadd.f32 %v4611_v22, %v4469_v7 }
 0xfdb   :  { %v4542_v40 = vpop.f32.mrf.mxu0  ;;  %v4613_v13 = vpop.f32.mrf.mxu1 }
 0xfdc   :  { %v4890_v24 = vmul.f32 -1.442695, %v4616_v15  ;;  %v4617_v10 = vadd.f32 %v4542_v40, %v4468_v34  ;;  %v4619_v9 = vadd.f32 %v4613_v13, %v4470_v31 }
 0xfde   :  { %5204 = vpow2.f32 %v4890_v24  ;;  %v4891_v29 = vmul.f32 -1.442695, %v4617_v10  ;;  %v4892_v42 = vmul.f32 -1.442695, %v4619_v9 }
 0xfe0   :  { %5206 = vpow2.f32 %v4891_v29 }
 0xfe1   :  { %5208 = vtanh.f32 %v4618_v37 }
 0xfe2   :  { %5210 = vpow2.f32 %v4892_v42 }
 0xfeb   :  { %v5205_v27 = vpop.eup %5204 }
 0xfec   :  { %v4623_v46 = vadd.f32 1.0, %v5205_v27 }
 0xfed   :  { %v5207_v21 = vpop.eup %5206 }
 0xfee   :  { %5212 = vrcp.f32 %v4623_v46  ;;  %v4629_v57 = vadd.f32 1.0, %v5207_v21  ;;  %v5209_v41 = vpop.eup %5208 }
 0xfef   :  { %v5211_v8 = vpop.eup %5210 }
 0xff0   :  { %5214 = vrcp.f32 %v4629_v57  ;;  %v4636_v36 = vadd.f32 1.0, %v5211_v8 }
 0xff2   :  { %5216 = vrcp.f32 %v4636_v36 }
 0xffb   :  { %v5213_v44 = vpop.eup %5212 }
 0xffc   :  { %v4640_v38 = vmul.f32 %v5213_v44, %v5209_v41 }
 0xffd   :  { %v5215_v6 = vpop.eup %5214 }
 0xffe   :  { %v4639_v43 = vmul.f32 %v5215_v6, %v4462_v0 }
 0xfff   :  { %v5217_v5 = vpop.eup %5216 }
0x1000   :  { %v4641_v16 = vadd.f32 %v4640_v38, %v4639_v43 }
0x1002   :  { %5218 = vtanh.f32 %v4641_v16  ;;  %4645 = vst.msk [vmem:[#allocation5 + $0x8] sm:$0xff] %vm66_vm0, %v4641_v16 }
0x100f   :  { %v5219_v62 = vpop.eup %5218 }
0x1010   :  { %v4643_v55 = vmul.f32 %v5219_v62, %v5217_v5 }
0x1012   :  { %4644 = vst.msk [vmem:[#allocation4 + $0x8] sm:$0xff] %vm66_vm0, %v4643_v55  ;;  %v4649_v33 = vpack.c.bf16 %v4643_v55, %v4643_v55 }
0x1014   :  { %4937 = vmatmul.mubr.msk.bf16.vlgmr.msra.gmra.mxu0 %vm66_vm0, %v4649_v33 }
0x10d4   :  { %v4710_v49 = vpop.f32.mrf.mxu0 }
0x10d5   :  { %v4711_v50 = vadd.f32 %v4893_v30, %v4710_v49 }
0x10d6   :  { %v4938_v52 = vpop.f32.mrf.mxu0 }
0x10d7   :  { %4716 = vst [vmem:[#allocation11] sm:$0xff] %v4711_v50 }
0x10d8   :  { %v4713_v53 = vpop.f32.mrf.mxu0 }
0x10d9   :  { %5286 = shalt.err (!%p5283_p0)
}
0x10da   :  { %4726 = dma.vmem_to_hbm [thread:$0]  %s4724_s27, 128, %s6456_s9, [#allocation8]   ;;  %v4939_v4 = vpop.f32.mrf.mxu0 }
0x10db   :  { %5299 = dma.done.wait [#allocation8], 128  }
0x10dc   :  { %5300 = vsyncadd [#allocation8], 4294967168 }
0x10dd   :  { %4730 = vsyncpa [#allocation7], 1 }
0x10de   :  { %4731 = vsyncpa [#allocation10], 1 }
0x10df   :  { %4732 = vsyncpa [#allocation8], 1 }

</bundles_post_ra>
